<compile_context>
chip_gen: v5e
topology: v5e:2x2
jax: 0.10.0
libtpu: 0.0.40
codegen_flags: <defaults>
</compile_context>

<pallas_src>
import functools

import jax
import jax.numpy as jnp
from jax.experimental import pallas as pl
from jax.experimental.pallas import tpu as pltpu

LAYER_SIZES = [16, 128, 64, 32, 16, 8, 4, 2]   # 7 Linear layers
N_LAYERS = len(LAYER_SIZES) - 1                # 7
HID = 128                                      # padded hidden width (lane-dense)
SUB = 512                                      # inner row sub-tile


def mlp_kernel(x_ref, w0_ref, w_ref, b_ref, o_ref, *, nsub, sub):
    """One batch tile of the full MLP + 2-class softmax.

    x_ref : (TB, 16)       f32   input features
    w0_ref: (16, 128)      bf16  layer-0 weight, (in, out)
    w_ref : (6, 128, 128)  bf16  layers 1..6, zero-padded to 128x128, (in, out);
                                 layer 6 holds the folded logit-difference column.
    b_ref : (7, 1, 128)    f32   biases, zero-padded to 128 (b[6,0,0] = b6[0]-b6[1])
    o_ref : (TB, 2)        f32   softmax probabilities
    """
    w0 = w0_ref[...]

    def body(s, carry):
        r0 = pl.multiple_of(s * sub, sub)
        # Layer 0: (SUB,16) @ (16,128) on the MXU, f32 accumulation, then ReLU.
        xb = x_ref[pl.ds(r0, sub), :].astype(jnp.bfloat16)
        acc = jnp.dot(xb, w0, preferred_element_type=jnp.float32)
        h = jnp.maximum(acc + b_ref[0], 0.0).astype(jnp.bfloat16)       # (SUB,128)

        # Layers 1..5: padded 128x128 matmuls + ReLU.
        # Zero padding is exactly preserved (0-cols @ 0-rows, bias pad = 0, ReLU(0)=0).
        for l in range(5):
            acc = jnp.dot(h, w_ref[l], preferred_element_type=jnp.float32)
            h = jnp.maximum(acc + b_ref[l + 1], 0.0).astype(jnp.bfloat16)

        # Layer 6 (folded): lane 0 holds d = logit0 - logit1 directly.
        d = (jnp.dot(h, w_ref[5], preferred_element_type=jnp.float32)
             + b_ref[6])[:, 0:1]                                         # (SUB,1)

        # 2-class softmax: p0 = sigmoid(d), p1 = 1 - p0.
        # Clamp d so exp never overflows (garbage rows of a ragged tile are
        # masked on writeback, but must not produce inf/NaN traps here).
        d = jnp.clip(d, -60.0, 60.0)
        p0 = pl.reciprocal(1.0 + jnp.exp(-d), approx=True)               # sigmoid(d)

        # Single merged store: select p0/p1 on a lane iota, one vst per group.
        lane = jax.lax.broadcasted_iota(jnp.int32, (sub, 2), 1)
        o_ref[pl.ds(r0, sub), :] = jnp.where(lane == 0, p0, 1.0 - p0)
        return carry

    jax.lax.fori_loop(0, nsub, body, None, unroll=True)


def init_params(key):
    """nn.Linear-style params: weight (out, in), bias (out,)."""
    params = []
    for i, (fin, fout) in enumerate(zip(LAYER_SIZES[:-1], LAYER_SIZES[1:])):
        kw, kb, key = jax.random.split(jax.random.fold_in(key, i), 3)
        bound = 1.0 / jnp.sqrt(fin)
        w = jax.random.uniform(kw, (fout, fin), jnp.float32, -bound, bound)
        b = jax.random.uniform(kb, (fout,), jnp.float32, -bound, bound)
        params.append((w, b))
    return params


def prepare_params(params):
    """One-time preprocessing (hoisted out of the forward hot path):
    transpose to (in,out), zero-pad to 128 width, cast weights to bf16,
    pack layers 1..6 into one slab; layer 6 is folded into a single
    logit-difference column so the kernel epilogue reads lane 0 only."""
    w0 = jnp.asarray(params[0][0].T, jnp.bfloat16)                     # (16, 128)
    w_slab = jnp.zeros((N_LAYERS - 1, HID, HID), jnp.float32)
    b_slab = jnp.zeros((N_LAYERS, 1, HID), jnp.float32)
    b_slab = b_slab.at[0, 0, :LAYER_SIZES[1]].set(params[0][1])
    for l in range(1, N_LAYERS - 1):                                   # layers 1..5
        w, b = params[l]
        fin, fout = LAYER_SIZES[l], LAYER_SIZES[l + 1]
        w_slab = w_slab.at[l - 1, :fin, :fout].set(w.T)
        b_slab = b_slab.at[l, 0, :fout].set(b)
    # Layer 6 (4 -> 2): fold softmax's logit difference into one column.
    w6, b6 = params[N_LAYERS - 1]                                      # (2,4), (2,)
    fin = LAYER_SIZES[N_LAYERS - 1]                                    # 4
    w_slab = w_slab.at[N_LAYERS - 2, :fin, 0].set(w6[0] - w6[1])       # W6ᵀ[:,0]-W6ᵀ[:,1]
    b_slab = b_slab.at[N_LAYERS - 1, 0, 0].set(b6[0] - b6[1])
    return w0, w_slab.astype(jnp.bfloat16), b_slab


@functools.partial(jax.jit, static_argnames=("block_b",))
def mlp_forward(x, w0, w_slab, b_slab, *, block_b=4096):
    B = x.shape[0]
    x = x.astype(jnp.float32)
    # Effective batch tile: multiple of SUB, shrunk for small batches so tiny
    # inputs don't compute a full 4096-row tile of garbage.
    tb = min(block_b, ((B + SUB - 1) // SUB) * SUB)
    tb = max((tb // SUB) * SUB, SUB)
    grid = (pl.cdiv(B, tb),)   # ragged last tile: OOB rows masked on writeback

    out = pl.pallas_call(
        functools.partial(mlp_kernel, nsub=tb // SUB, sub=SUB),
        out_shape=jax.ShapeDtypeStruct((B, LAYER_SIZES[-1]), jnp.float32),
        grid=grid,
        in_specs=[
            # batch-tiled input (no wrapper-side padding copy)
            pl.BlockSpec((tb, LAYER_SIZES[0]), lambda i: (i, 0)),
            # weights/biases: full-shape blocks, constant index_map -> VMEM-resident
            pl.BlockSpec((LAYER_SIZES[0], HID), lambda i: (0, 0)),
            pl.BlockSpec((N_LAYERS - 1, HID, HID), lambda i: (0, 0, 0)),
            pl.BlockSpec((N_LAYERS, 1, HID), lambda i: (0, 0, 0)),
        ],
        out_specs=pl.BlockSpec((tb, LAYER_SIZES[-1]), lambda i: (i, 0)),
        compiler_params=pltpu.CompilerParams(
            dimension_semantics=("parallel",),      # megacore-shard the batch axis
            vmem_limit_bytes=48 * 1024 * 1024,      # headroom vs v5e 16 MiB default
        ),
    )(x, w0, w_slab, b_slab)
    return out


def mlp_reference(x, params):
    h = x.astype(jnp.float32)
    for i, (w, b) in enumerate(params):
        h = h @ w.T + b
        if i < len(params) - 1:
            h = jnp.maximum(h, 0.0)
    return jax.nn.softmax(h, axis=1)


if __name__ == "__main__":
    key = jax.random.PRNGKey(0)
    kx, kp = jax.random.split(key)
    B = 8
    x = jax.random.normal(kx, (B, LAYER_SIZES[0]), jnp.float32)
    params = init_params(kp)

    # One-time parameter packing (outside the per-call hot path).
    w0, w_slab, b_slab = prepare_params(params)

    score = mlp_forward(x, w0, w_slab, b_slab)
    jax.block_until_ready(score)

    ref = mlp_reference(x, params)
    assert score.shape == (B, LAYER_SIZES[-1])
    # bf16 matmuls + approx reciprocal -> loose tolerance on probabilities.
    assert jnp.allclose(score, ref, atol=3e-2, rtol=3e-2), "mismatch vs reference"

    # run_inference: label = argmax(score) is trivial glue outside the kernel.
    label = jnp.argmax(score, axis=1)
    jax.block_until_ready(label)
    print("KERNEL_OK")
</pallas_src>

<mosaic_0001>
module attributes {stable_mosaic.version = 11 : i64} {
  func.func @mlp_kernel(%arg0: i32, %arg1: memref<512x16xf32, #tpu.memory_space<vmem>>, %arg2: memref<16x128xbf16, #tpu.memory_space<vmem>>, %arg3: memref<6x128x128xbf16, #tpu.memory_space<vmem>>, %arg4: memref<7x1x128xf32, #tpu.memory_space<vmem>>, %arg5: memref<512x2xf32, #tpu.memory_space<vmem>>) attributes {dimension_semantics = [#tpu.dimension_semantics<parallel>], iteration_bounds = array<i64: 1>, scalar_prefetch = 0 : i64, scratch_operands = 0 : i64, tpu.core_type = #tpu.core_type<tc>, window_params = [{transform_indices = @transform_0, window_bounds = array<i64: 512, 16>}, {pipeline_mode = #tpu.pipeline_mode<synchronous>, transform_indices = @transform_1, window_bounds = array<i64: 16, 128>}, {pipeline_mode = #tpu.pipeline_mode<synchronous>, transform_indices = @transform_2, window_bounds = array<i64: 6, 128, 128>}, {pipeline_mode = #tpu.pipeline_mode<synchronous>, transform_indices = @transform_3, window_bounds = array<i64: 7, 1, 128>}, {transform_indices = @transform_4, window_bounds = array<i64: 512, 2>}]} {
    %c0 = arith.constant 0 : index
    %c0_0 = arith.constant 0 : index
    %0 = vector.load %arg2[%c0, %c0_0] : memref<16x128xbf16, #tpu.memory_space<vmem>>, vector<16x128xbf16>
    %c0_i32 = arith.constant 0 : i32
    %c512_i32 = arith.constant 512 : i32
    %1 = arith.muli %c0_i32, %c512_i32 : i32
    %2 = tpu.assume_multiple %1, 512 : i32
    %3 = arith.index_cast %2 : i32 to index
    %c0_1 = arith.constant 0 : index
    %4 = vector.load %arg1[%3, %c0_1] : memref<512x16xf32, #tpu.memory_space<vmem>>, vector<512x16xf32>
    %5 = arith.truncf %4 : vector<512x16xf32> to vector<512x16xbf16>
    %cst = arith.constant dense<0.000000e+00> : vector<512x128xf32>
    %6 = tpu.matmul %5, %0, %cst {dimension_numbers = #tpu.dot_dimension_numbers<[1], [0], [0], [1], [0, 0, 1, 1], [], []>} : vector<512x16xbf16>, vector<16x128xbf16>, vector<512x128xf32> -> vector<512x128xf32>
    %c0_2 = arith.constant 0 : index
    %c0_3 = arith.constant 0 : index
    %c0_4 = arith.constant 0 : index
    %7 = vector.load %arg4[%c0_2, %c0_3, %c0_4] : memref<7x1x128xf32, #tpu.memory_space<vmem>>, vector<1x1x128xf32>
    %8 = vector.shape_cast %7 : vector<1x1x128xf32> to vector<1x128xf32>
    %9 = vector.broadcast %8 : vector<1x128xf32> to vector<512x128xf32>
    %10 = arith.addf %6, %9 : vector<512x128xf32>
    %cst_5 = arith.constant 0.000000e+00 : f32
    %11 = vector.broadcast %cst_5 : f32 to vector<512x128xf32>
    %12 = arith.maximumf %10, %11 : vector<512x128xf32>
    %13 = arith.truncf %12 : vector<512x128xf32> to vector<512x128xbf16>
    %c0_6 = arith.constant 0 : index
    %c0_7 = arith.constant 0 : index
    %c0_8 = arith.constant 0 : index
    %14 = vector.load %arg3[%c0_6, %c0_7, %c0_8] : memref<6x128x128xbf16, #tpu.memory_space<vmem>>, vector<1x128x128xbf16>
    %15 = vector.shape_cast %14 : vector<1x128x128xbf16> to vector<128x128xbf16>
    %cst_9 = arith.constant dense<0.000000e+00> : vector<512x128xf32>
    %16 = tpu.matmul %13, %15, %cst_9 {dimension_numbers = #tpu.dot_dimension_numbers<[1], [0], [0], [1], [0, 0, 1, 1], [], []>} : vector<512x128xbf16>, vector<128x128xbf16>, vector<512x128xf32> -> vector<512x128xf32>
    %c1 = arith.constant 1 : index
    %c0_10 = arith.constant 0 : index
    %c0_11 = arith.constant 0 : index
    %17 = vector.load %arg4[%c1, %c0_10, %c0_11] : memref<7x1x128xf32, #tpu.memory_space<vmem>>, vector<1x1x128xf32>
    %18 = vector.shape_cast %17 : vector<1x1x128xf32> to vector<1x128xf32>
    %19 = vector.broadcast %18 : vector<1x128xf32> to vector<512x128xf32>
    %20 = arith.addf %16, %19 : vector<512x128xf32>
    %cst_12 = arith.constant 0.000000e+00 : f32
    %21 = vector.broadcast %cst_12 : f32 to vector<512x128xf32>
    %22 = arith.maximumf %20, %21 : vector<512x128xf32>
    %23 = arith.truncf %22 : vector<512x128xf32> to vector<512x128xbf16>
    %c1_13 = arith.constant 1 : index
    %c0_14 = arith.constant 0 : index
    %c0_15 = arith.constant 0 : index
    %24 = vector.load %arg3[%c1_13, %c0_14, %c0_15] : memref<6x128x128xbf16, #tpu.memory_space<vmem>>, vector<1x128x128xbf16>
    %25 = vector.shape_cast %24 : vector<1x128x128xbf16> to vector<128x128xbf16>
    %cst_16 = arith.constant dense<0.000000e+00> : vector<512x128xf32>
    %26 = tpu.matmul %23, %25, %cst_16 {dimension_numbers = #tpu.dot_dimension_numbers<[1], [0], [0], [1], [0, 0, 1, 1], [], []>} : vector<512x128xbf16>, vector<128x128xbf16>, vector<512x128xf32> -> vector<512x128xf32>
    %c2 = arith.constant 2 : index
    %c0_17 = arith.constant 0 : index
    %c0_18 = arith.constant 0 : index
    %27 = vector.load %arg4[%c2, %c0_17, %c0_18] : memref<7x1x128xf32, #tpu.memory_space<vmem>>, vector<1x1x128xf32>
    %28 = vector.shape_cast %27 : vector<1x1x128xf32> to vector<1x128xf32>
    %29 = vector.broadcast %28 : vector<1x128xf32> to vector<512x128xf32>
    %30 = arith.addf %26, %29 : vector<512x128xf32>
    %cst_19 = arith.constant 0.000000e+00 : f32
    %31 = vector.broadcast %cst_19 : f32 to vector<512x128xf32>
    %32 = arith.maximumf %30, %31 : vector<512x128xf32>
    %33 = arith.truncf %32 : vector<512x128xf32> to vector<512x128xbf16>
    %c2_20 = arith.constant 2 : index
    %c0_21 = arith.constant 0 : index
    %c0_22 = arith.constant 0 : index
    %34 = vector.load %arg3[%c2_20, %c0_21, %c0_22] : memref<6x128x128xbf16, #tpu.memory_space<vmem>>, vector<1x128x128xbf16>
    %35 = vector.shape_cast %34 : vector<1x128x128xbf16> to vector<128x128xbf16>
    %cst_23 = arith.constant dense<0.000000e+00> : vector<512x128xf32>
    %36 = tpu.matmul %33, %35, %cst_23 {dimension_numbers = #tpu.dot_dimension_numbers<[1], [0], [0], [1], [0, 0, 1, 1], [], []>} : vector<512x128xbf16>, vector<128x128xbf16>, vector<512x128xf32> -> vector<512x128xf32>
    %c3 = arith.constant 3 : index
    %c0_24 = arith.constant 0 : index
    %c0_25 = arith.constant 0 : index
    %37 = vector.load %arg4[%c3, %c0_24, %c0_25] : memref<7x1x128xf32, #tpu.memory_space<vmem>>, vector<1x1x128xf32>
    %38 = vector.shape_cast %37 : vector<1x1x128xf32> to vector<1x128xf32>
    %39 = vector.broadcast %38 : vector<1x128xf32> to vector<512x128xf32>
    %40 = arith.addf %36, %39 : vector<512x128xf32>
    %cst_26 = arith.constant 0.000000e+00 : f32
    %41 = vector.broadcast %cst_26 : f32 to vector<512x128xf32>
    %42 = arith.maximumf %40, %41 : vector<512x128xf32>
    %43 = arith.truncf %42 : vector<512x128xf32> to vector<512x128xbf16>
    %c3_27 = arith.constant 3 : index
    %c0_28 = arith.constant 0 : index
    %c0_29 = arith.constant 0 : index
    %44 = vector.load %arg3[%c3_27, %c0_28, %c0_29] : memref<6x128x128xbf16, #tpu.memory_space<vmem>>, vector<1x128x128xbf16>
    %45 = vector.shape_cast %44 : vector<1x128x128xbf16> to vector<128x128xbf16>
    %cst_30 = arith.constant dense<0.000000e+00> : vector<512x128xf32>
    %46 = tpu.matmul %43, %45, %cst_30 {dimension_numbers = #tpu.dot_dimension_numbers<[1], [0], [0], [1], [0, 0, 1, 1], [], []>} : vector<512x128xbf16>, vector<128x128xbf16>, vector<512x128xf32> -> vector<512x128xf32>
    %c4 = arith.constant 4 : index
    %c0_31 = arith.constant 0 : index
    %c0_32 = arith.constant 0 : index
    %47 = vector.load %arg4[%c4, %c0_31, %c0_32] : memref<7x1x128xf32, #tpu.memory_space<vmem>>, vector<1x1x128xf32>
    %48 = vector.shape_cast %47 : vector<1x1x128xf32> to vector<1x128xf32>
    %49 = vector.broadcast %48 : vector<1x128xf32> to vector<512x128xf32>
    %50 = arith.addf %46, %49 : vector<512x128xf32>
    %cst_33 = arith.constant 0.000000e+00 : f32
    %51 = vector.broadcast %cst_33 : f32 to vector<512x128xf32>
    %52 = arith.maximumf %50, %51 : vector<512x128xf32>
    %53 = arith.truncf %52 : vector<512x128xf32> to vector<512x128xbf16>
    %c4_34 = arith.constant 4 : index
    %c0_35 = arith.constant 0 : index
    %c0_36 = arith.constant 0 : index
    %54 = vector.load %arg3[%c4_34, %c0_35, %c0_36] : memref<6x128x128xbf16, #tpu.memory_space<vmem>>, vector<1x128x128xbf16>
    %55 = vector.shape_cast %54 : vector<1x128x128xbf16> to vector<128x128xbf16>
    %cst_37 = arith.constant dense<0.000000e+00> : vector<512x128xf32>
    %56 = tpu.matmul %53, %55, %cst_37 {dimension_numbers = #tpu.dot_dimension_numbers<[1], [0], [0], [1], [0, 0, 1, 1], [], []>} : vector<512x128xbf16>, vector<128x128xbf16>, vector<512x128xf32> -> vector<512x128xf32>
    %c5 = arith.constant 5 : index
    %c0_38 = arith.constant 0 : index
    %c0_39 = arith.constant 0 : index
    %57 = vector.load %arg4[%c5, %c0_38, %c0_39] : memref<7x1x128xf32, #tpu.memory_space<vmem>>, vector<1x1x128xf32>
    %58 = vector.shape_cast %57 : vector<1x1x128xf32> to vector<1x128xf32>
    %59 = vector.broadcast %58 : vector<1x128xf32> to vector<512x128xf32>
    %60 = arith.addf %56, %59 : vector<512x128xf32>
    %cst_40 = arith.constant 0.000000e+00 : f32
    %61 = vector.broadcast %cst_40 : f32 to vector<512x128xf32>
    %62 = arith.maximumf %60, %61 : vector<512x128xf32>
    %63 = arith.truncf %62 : vector<512x128xf32> to vector<512x128xbf16>
    %c5_41 = arith.constant 5 : index
    %c0_42 = arith.constant 0 : index
    %c0_43 = arith.constant 0 : index
    %64 = vector.load %arg3[%c5_41, %c0_42, %c0_43] : memref<6x128x128xbf16, #tpu.memory_space<vmem>>, vector<1x128x128xbf16>
    %65 = vector.shape_cast %64 : vector<1x128x128xbf16> to vector<128x128xbf16>
    %cst_44 = arith.constant dense<0.000000e+00> : vector<512x128xf32>
    %66 = tpu.matmul %63, %65, %cst_44 {dimension_numbers = #tpu.dot_dimension_numbers<[1], [0], [0], [1], [0, 0, 1, 1], [], []>} : vector<512x128xbf16>, vector<128x128xbf16>, vector<512x128xf32> -> vector<512x128xf32>
    %c6 = arith.constant 6 : index
    %c0_45 = arith.constant 0 : index
    %c0_46 = arith.constant 0 : index
    %67 = vector.load %arg4[%c6, %c0_45, %c0_46] : memref<7x1x128xf32, #tpu.memory_space<vmem>>, vector<1x1x128xf32>
    %68 = vector.shape_cast %67 : vector<1x1x128xf32> to vector<1x128xf32>
    %69 = vector.broadcast %68 : vector<1x128xf32> to vector<512x128xf32>
    %70 = arith.addf %66, %69 : vector<512x128xf32>
    %71 = vector.extract_strided_slice %70 {offsets = [0, 0], sizes = [512, 1], strides = [1, 1]} : vector<512x128xf32> to vector<512x1xf32>
    %cst_47 = arith.constant -6.000000e+01 : f32
    %cst_48 = arith.constant 6.000000e+01 : f32
    %72 = vector.broadcast %cst_47 : f32 to vector<512x1xf32>
    %73 = arith.maximumf %72, %71 : vector<512x1xf32>
    %74 = vector.broadcast %cst_48 : f32 to vector<512x1xf32>
    %75 = arith.minimumf %74, %73 : vector<512x1xf32>
    %cst_49 = arith.constant 0.000000e+00 : f32
    %76 = vector.broadcast %cst_49 : f32 to vector<512x1xf32>
    %77 = arith.subf %76, %75 : vector<512x1xf32>
    %78 = math.exp %77 : vector<512x1xf32>
    %cst_50 = arith.constant 1.000000e+00 : f32
    %79 = vector.broadcast %cst_50 : f32 to vector<512x1xf32>
    %80 = arith.addf %79, %78 : vector<512x1xf32>
    %81 = tpu.reciprocal %80 {approx = true} : vector<512x1xf32> -> vector<512x1xf32>
    %82 = tpu.iota {dimensions = array<i32: 1>} : vector<512x2xi32>
    %c0_i32_51 = arith.constant 0 : i32
    %83 = vector.broadcast %c0_i32_51 : i32 to vector<512x2xi32>
    %84 = arith.cmpi eq, %82, %83 : vector<512x2xi32>
    %cst_52 = arith.constant 1.000000e+00 : f32
    %85 = vector.broadcast %cst_52 : f32 to vector<512x1xf32>
    %86 = arith.subf %85, %81 : vector<512x1xf32>
    %87 = vector.shape_cast %81 : vector<512x1xf32> to vector<512x1xf32>
    %88 = vector.broadcast %87 : vector<512x1xf32> to vector<512x2xf32>
    %89 = vector.shape_cast %86 : vector<512x1xf32> to vector<512x1xf32>
    %90 = vector.broadcast %89 : vector<512x1xf32> to vector<512x2xf32>
    %91 = arith.select %84, %88, %90 : vector<512x2xi1>, vector<512x2xf32>
    %92 = arith.index_cast %2 : i32 to index
    %c0_53 = arith.constant 0 : index
    %93 = vector.load %arg5[%92, %c0_53] : memref<512x2xf32, #tpu.memory_space<vmem>>, vector<512x2xf32>
    tpu.vector_store %arg5[%92, %c0_53], %91 {strides = array<i32>} : memref<512x2xf32, #tpu.memory_space<vmem>>, vector<512x2xf32>,
    %c1_i32 = arith.constant 1 : i32
    return
  }
  func.func @transform_0(%arg0: i32) -> (i32, i32) {
    %c0_i32 = arith.constant 0 : i32
    %c0_i32_0 = arith.constant 0 : i32
    return %arg0, %c0_i32 : i32, i32
  }
  func.func @transform_1(%arg0: i32) -> (i32, i32) {
    %c0_i32 = arith.constant 0 : i32
    %c0_i32_0 = arith.constant 0 : i32
    %c0_i32_1 = arith.constant 0 : i32
    return %c0_i32, %c0_i32_0 : i32, i32
  }
  func.func @transform_2(%arg0: i32) -> (i32, i32, i32) {
    %c0_i32 = arith.constant 0 : i32
    %c0_i32_0 = arith.constant 0 : i32
    %c0_i32_1 = arith.constant 0 : i32
    %c0_i32_2 = arith.constant 0 : i32
    return %c0_i32, %c0_i32_0, %c0_i32_1 : i32, i32, i32
  }
  func.func @transform_3(%arg0: i32) -> (i32, i32, i32) {
    %c0_i32 = arith.constant 0 : i32
    %c0_i32_0 = arith.constant 0 : i32
    %c0_i32_1 = arith.constant 0 : i32
    %c0_i32_2 = arith.constant 0 : i32
    return %c0_i32, %c0_i32_0, %c0_i32_1 : i32, i32, i32
  }
  func.func @transform_4(%arg0: i32) -> (i32, i32) {
    %c0_i32 = arith.constant 0 : i32
    %c0_i32_0 = arith.constant 0 : i32
    return %arg0, %c0_i32 : i32, i32
  }
}

</mosaic_0001>

<bundles_post_ra>
// kernel: mlp_forward.1
= control target key start
LH: loop header
LB: loop body
LE: loop exit
PB: predicated region body
PF: predicated region fallthrough
CT: control target
= control target key end

     0   :  { %9 = vsyncpa [#allocation3], 0  ;;  %s5192_s0 = inlined_call_operand.hbm [shape: f32[8,16], index: 0, kind: input, shape index: {}]   ;;  %s5193_s1 = inlined_call_operand.hbm [shape: bf16[16,128], index: 1, kind: input, shape index: {}]   ;;  %s5194_s2 = inlined_call_operand.hbm [shape: bf16[6,128,128], index: 2, kind: input, shape index: {}]   ;;  %s5195_s3 = inlined_call_operand.hbm [shape: f32[7,1,128], index: 3, kind: input, shape index: {}]   ;;  %s5196_s4 = inlined_call_operand.vmem [shape: f32[8,2], index: 4, kind: output, shape index: {}]  }
   0x1   :  { %10 = vsyncpa [#allocation5], 0 }
   0x2   :  { %11 = vsyncpa [#allocation8], 0  ;;  %s29_s17 = sshll.u32 %s5193_s1, 4  ;;  %s30_s17 = int_to_ptr.hbm [resolvable:$true] %s29_s17 }
   0x3   :  { %15 = vsyncadd [#allocation3], 8064  ;;  %s4539_s18 = smov [#allocation4]   ;;  %s16_s22 = sshll.u32 %s5192_s0, 4  ;;  %s17_s22 = int_to_ptr.hbm [resolvable:$true] %s16_s22 }
   0x4   :  { %s31_s19 = sshll.u32 %s4539_s18, 4  ;;  %s4540_s23 = smov 64   ;;  %s32_s19 = int_to_ptr.vmem [resolvable:$true] %s31_s19 }
   0x5   :  { %s4541_s24 = smov 4   ;;  %s4542_s25 = smov [#allocation2]  }
   0x6   :  { %37 = dma.hbm_to_vmem [thread:$0]  %s30_s17, 128, %s32_s19, [#allocation5], %s4540_s23, %s4540_s23, %s4541_s24  }
   0x7   :  { %s18_s26 = sshll.u32 %s4542_s25, 4  ;;  %s4543_s27 = smov 128   ;;  %s19_s26 = int_to_ptr.vmem [resolvable:$true] %s18_s26 }
   0x8   :  { %s4544_s28 = smov 8   ;;  %s42_s30 = sshll.u32 %s5194_s2, 4  ;;  %s43_s30 = int_to_ptr.hbm [resolvable:$true] %s42_s30 }
   0x9   :  { %24 = dma.hbm_to_vmem [thread:$0]  %s17_s22, 128, %s19_s26, [#allocation3], %s4543_s27, %s4543_s27, %s4544_s28  }
   0xa   :  { %s4545_s5 = smov [#allocation6]   ;;  %s55_s8 = sshll.u32 %s5195_s3, 4  ;;  %s56_s8 = int_to_ptr.hbm [resolvable:$true] %s55_s8 }
   0xb   :  { %s44_s6 = sshll.u32 %s4545_s5, 4  ;;  %s4546_s9 = smov [#allocation7]   ;;  %s45_s6 = int_to_ptr.vmem [resolvable:$true] %s44_s6 }
   0xc   :  { %50 = dma.hbm_to_vmem [thread:$0]  %s43_s30, 6144, %s45_s6, [#allocation5], %s4540_s23, %s4540_s23, %s4541_s24  }
   0xd   :  { %s57_s10 = sshll.u32 %s4546_s9, 4  ;;  %s4547_s11 = smov 16   ;;  %s58_s10 = int_to_ptr.vmem [resolvable:$true] %s57_s10 }
   0xe   :  { %s4548_s12 = smov 1  }
   0xf   :  { %63 = dma.hbm_to_vmem [thread:$0]  %s56_s8, 112, %s58_s10, [#allocation8], %s4547_s11, %s4547_s11, %s4548_s12  }
  0x10   :  { %4533 = dma.done.wait [#allocation3], 8192  }
  0x11   :  { %4534 = vsyncadd [#allocation3], 4294959104 }
  0x12   :  { %4535 = dma.done.wait [#allocation5], 6272  }
  0x13   :  { %4536 = vsyncadd [#allocation5], 4294961024 }
  0x14   :  { %4537 = dma.done.wait [#allocation8], 112  }
  0x15   :  { %4538 = vsyncadd [#allocation8], 4294967184  ;;  %v4084_v0 = vld [vmem:[#allocation4] sm:$0xff]  ;;  %v84_v2 = vld [vmem:[#allocation2 + $0x8] sm:$0xff]  ;;  %vm189_vm0 = vcmask 130048   ;;  %vm3683_vm2 = vcmask 15360  }
  0x16   :  { %v83_v1 = vld [vmem:[#allocation2] sm:$0xff]  ;;  %293 = vmatpush.bf16.msra.mxu0 %v4084_v0  ;;  %4133 = vmatpush.bf16.msra.mxu3 %v4084_v0  ;;  %v85_v4 = vld [vmem:[#allocation2 + $0x10] sm:$0xff]  ;;  %v86_v5 = vld [vmem:[#allocation2 + $0x18] sm:$0xff] }
  0x17   :  { %v147_v3 = vpack.c.bf16 %v84_v2, %v83_v1  ;;  %v148_v6 = vpack.c.bf16 %v86_v5, %v85_v4  ;;  %v87_v7 = vld [vmem:[#allocation2 + $0x20] sm:$0xff]  ;;  %v88_v8 = vld [vmem:[#allocation2 + $0x28] sm:$0xff]  ;;  %v89_v10 = vld [vmem:[#allocation2 + $0x30] sm:$0xff] }
  0x18   :  { %v149_v9 = vpack.c.bf16 %v88_v8, %v87_v7  ;;  %v90_v11 = vld [vmem:[#allocation2 + $0x38] sm:$0xff]  ;;  %v91_v13 = vld [vmem:[#allocation2 + $0x40] sm:$0xff]  ;;  %v92_v14 = vld [vmem:[#allocation2 + $0x48] sm:$0xff] }
  0x19   :  { %3796 = vmatmul.msk.bf16.vlgmr.msra.gmra.mxu0 %vm189_vm0, %v147_v3  ;;  %v150_v12 = vpack.c.bf16 %v90_v11, %v89_v10  ;;  %v151_v15 = vpack.c.bf16 %v92_v14, %v91_v13  ;;  %v4092_v16 = vld [vmem:[#allocation6 + $0x38] sm:$0xff]  ;;  %v93_v17 = vld [vmem:[#allocation2 + $0x50] sm:$0xff]  ;;  %v94_v18 = vld [vmem:[#allocation2 + $0x58] sm:$0xff] }
  0x1a   :  { %620 = vmatpush.bf16.msra.mxu1 %v4092_v16  ;;  %4134 = vmatpush.bf16.msrb.mxu3 %v4092_v16  ;;  %v152_v19 = vpack.c.bf16 %v94_v18, %v93_v17  ;;  %v4091_v20 = vld [vmem:[#allocation6 + $0x30] sm:$0xff]  ;;  %v4090_v21 = vld [vmem:[#allocation6 + $0x28] sm:$0xff]  ;;  %v4089_v22 = vld [vmem:[#allocation6 + $0x20] sm:$0xff] }
  0x1b   :  { %v95_v23 = vld [vmem:[#allocation2 + $0x60] sm:$0xff]  ;;  %v96_v24 = vld [vmem:[#allocation2 + $0x68] sm:$0xff]  ;;  %v4087_v27 = vld [vmem:[#allocation6 + $0x10] sm:$0xff] }
  0x1c   :  { %v4088_v25 = vld [vmem:[#allocation6 + $0x18] sm:$0xff]  ;;  %v153_v26 = vpack.c.bf16 %v96_v24, %v95_v23  ;;  %v4086_v28 = vld [vmem:[#allocation6 + $0x8] sm:$0xff]  ;;  %v4085_v29 = vld [vmem:[#allocation6] sm:$0xff] }
  0x1d   :  { %v97_v30 = vld [vmem:[#allocation2 + $0x70] sm:$0xff]  ;;  %v98_v31 = vld [vmem:[#allocation2 + $0x78] sm:$0xff]  ;;  %v99_v33 = vld [vmem:[#allocation2 + $0x80] sm:$0xff] }
  0x1e   :  { %621 = vmatpush.bf16.msra.mxu1 %v4091_v20  ;;  %4135 = vmatpush.bf16.msrb.mxu3 %v4091_v20  ;;  %v154_v32 = vpack.c.bf16 %v98_v31, %v97_v30  ;;  %v100_v34 = vld [vmem:[#allocation2 + $0x88] sm:$0xff]  ;;  %v101_v43 = vld [vmem:[#allocation2 + $0x90] sm:$0xff]  ;;  %v102_v44 = vld [vmem:[#allocation2 + $0x98] sm:$0xff] }
  0x1f   :  { %v155_v35 = vpack.c.bf16 %v100_v34, %v99_v33  ;;  %v4595_v37 = vld [vmem:[#allocation7] ss:$0 sm:$0xff]  ;;  %v156_v46 = vpack.c.bf16 %v102_v44, %v101_v43  ;;  %v103_v53 = vld [vmem:[#allocation2 + $0xa0] sm:$0xff]  ;;  %v105_v63 = vld [vmem:[#allocation2 + $0xb0] sm:$0xff] }
  0x20   :  { %v104_v54 = vld [vmem:[#allocation2 + $0xa8] sm:$0xff]  ;;  %v106_v0 = vld [vmem:[#allocation2 + $0xb8] sm:$0xff]  ;;  %v111_v30 = vld [vmem:[#allocation2 + $0xe0] sm:$0xff] }
  0x21   :  { %v157_v56 = vpack.c.bf16 %v104_v54, %v103_v53  ;;  %v158_v2 = vpack.c.bf16 %v106_v0, %v105_v63  ;;  %v108_v10 = vld [vmem:[#allocation2 + $0xc8] sm:$0xff]  ;;  %v110_v20 = vld [vmem:[#allocation2 + $0xd8] sm:$0xff] }
  0x22   :  { %622 = vmatpush.bf16.msra.mxu1 %v4090_v21  ;;  %4136 = vmatpush.bf16.msrb.mxu3 %v4090_v21  ;;  %v112_v31 = vld [vmem:[#allocation2 + $0xe8] sm:$0xff]  ;;  %v4618_v33 = vld [vmem:[#allocation6 + $0x70] sm:$0xff] }
  0x23   :  { %v161_v34 = vpack.c.bf16 %v112_v31, %v111_v30 }
  0x26   :  { %623 = vmatpush.bf16.msra.mxu1 %v4089_v22  ;;  %4137 = vmatpush.bf16.msrb.mxu3 %v4089_v22 }
  0x29   :  { %3797 = vmatmul.msk.bf16.gmra.mxu0 %vm189_vm0, %v148_v6 }
  0x2a   :  { %624 = vmatpush.bf16.msra.mxu1 %v4088_v25  ;;  %4138 = vmatpush.bf16.msrb.mxu3 %v4088_v25 }
  0x2e   :  { %625 = vmatpush.bf16.msra.mxu1 %v4087_v27  ;;  %4139 = vmatpush.bf16.msrb.mxu3 %v4087_v27  ;;  %v4615_v27 = vld [vmem:[#allocation6 + $0x78] sm:$0xff] }
  0x2f   :  { %955 = vmatpush.bf16.msra.mxu2 %v4615_v27 }
  0x32   :  { %626 = vmatpush.bf16.msra.mxu1 %v4086_v28  ;;  %4140 = vmatpush.bf16.msrb.mxu3 %v4086_v28 }
  0x33   :  { %956 = vmatpush.bf16.msra.mxu2 %v4618_v33 }
  0x36   :  { %627 = vmatpush.bf16.msra.mxu1 %v4085_v29  ;;  %4141 = vmatpush.bf16.msrb.mxu3 %v4085_v29 }
  0x39   :  { %3798 = vmatmul.msk.bf16.gmra.mxu0 %vm189_vm0, %v149_v9  ;;  %v107_v9 = vld [vmem:[#allocation2 + $0xc0] sm:$0xff] }
  0x49   :  { %3799 = vmatmul.msk.bf16.gmra.mxu0 %vm189_vm0, %v150_v12  ;;  %v159_v12 = vpack.c.bf16 %v108_v10, %v107_v9 }
  0x59   :  { %3800 = vmatmul.msk.bf16.gmra.mxu0 %vm189_vm0, %v151_v15 }
  0x69   :  { %3801 = vmatmul.msk.bf16.gmra.mxu0 %vm189_vm0, %v152_v19  ;;  %v109_v19 = vld [vmem:[#allocation2 + $0xd0] sm:$0xff] }
  0x6a   :  { %v160_v22 = vpack.c.bf16 %v110_v20, %v109_v19 }
  0x79   :  { %3802 = vmatmul.msk.bf16.gmra.mxu0 %vm189_vm0, %v153_v26 }
  0x89   :  { %3803 = vmatmul.msk.bf16.gmra.mxu0 %vm189_vm0, %v154_v32 }
  0x96   :  { %v295_v36 = vpop.f32.mrf.mxu0 }
  0x97   :  { %v296_v38 = vadd.f32 %v4595_v37, %v295_v36  ;;  %v4621_v36 = vld [vmem:[#allocation6 + $0x68] sm:$0xff] }
  0x98   :  { %957 = vmatpush.bf16.msra.mxu2 %v4621_v36 }
  0x99   :  { %3804 = vmatmul.msk.bf16.gmra.mxu0 %vm189_vm0, %v155_v35  ;;  %v455_v41 = vmax.f32 %v296_v38, 0.0  ;;  %v4625_v38 = vld [vmem:[#allocation6 + $0x60] sm:$0xff] }
  0x9c   :  { %958 = vmatpush.bf16.msra.mxu2 %v4625_v38 }
  0x9e   :  { %v297_v39 = vpop.f32.mrf.mxu0 }
  0x9f   :  { %v298_v40 = vadd.f32 %v4595_v37, %v297_v39 }
  0xa1   :  { %v456_v42 = vmax.f32 %v298_v40, 0.0 }
  0xa3   :  { %v519_v45 = vpack.c.bf16 %v456_v42, %v455_v41  ;;  %v4630_v42 = vld [vmem:[#allocation6 + $0x58] sm:$0xff] }
  0xa4   :  { %959 = vmatpush.bf16.msra.mxu2 %v4630_v42 }
  0xa5   :  { %628 = vmatmul.bf16.vlgmr.msra.gmra.mxu1 %v519_v45  ;;  %v113_v45 = vld [vmem:[#allocation2 + $0xf0] sm:$0xff] }
  0xa6   :  { %v300_v47 = vpop.f32.mrf.mxu0 }
  0xa7   :  { %v301_v48 = vadd.f32 %v4595_v37, %v300_v47 }
  0xa9   :  { %3805 = vmatmul.msk.bf16.gmra.mxu0 %vm189_vm0, %v156_v46  ;;  %v457_v51 = vmax.f32 %v301_v48, 0.0  ;;  %v114_v46 = vld [vmem:[#allocation2 + $0xf8] sm:$0xff] }
  0xaa   :  { %v4633_v48 = vld [vmem:[#allocation6 + $0x50] sm:$0xff] }
  0xab   :  { %960 = vmatpush.bf16.msra.mxu2 %v4633_v48 }
  0xae   :  { %v302_v49 = vpop.f32.mrf.mxu0 }
  0xaf   :  { %v303_v50 = vadd.f32 %v4595_v37, %v302_v49  ;;  %v162_v49 = vpack.c.bf16 %v114_v46, %v113_v45  ;;  %v121_v46 = vld [vmem:[#allocation2 + $0x130] sm:$0xff] }
  0xb1   :  { %v458_v52 = vmax.f32 %v303_v50, 0.0 }
  0xb3   :  { %v520_v55 = vpack.c.bf16 %v458_v52, %v457_v51  ;;  %v4636_v51 = vld [vmem:[#allocation6 + $0x48] sm:$0xff]  ;;  %v4640_v52 = vld [vmem:[#allocation6 + $0x40] sm:$0xff] }
  0xb4   :  { %961 = vmatpush.bf16.msra.mxu2 %v4636_v51 }
  0xb5   :  { %633 = vmatmul.bf16.gmra.mxu1 %v520_v55 }
  0xb6   :  { %v305_v57 = vpop.f32.mrf.mxu0 }
  0xb7   :  { %v306_v58 = vadd.f32 %v4595_v37, %v305_v57 }
  0xb8   :  { %962 = vmatpush.bf16.msra.mxu2 %v4640_v52 }
  0xb9   :  { %3806 = vmatmul.msk.bf16.gmra.mxu0 %vm189_vm0, %v157_v56  ;;  %v459_v61 = vmax.f32 %v306_v58, 0.0  ;;  %v115_v58 = vld [vmem:[#allocation2 + $0x100] sm:$0xff] }
  0xbe   :  { %v307_v59 = vpop.f32.mrf.mxu0 }
  0xbf   :  { %v308_v60 = vadd.f32 %v4595_v37, %v307_v59  ;;  %v116_v59 = vld [vmem:[#allocation2 + $0x108] sm:$0xff] }
  0xc1   :  { %v460_v62 = vmax.f32 %v308_v60, 0.0 }
  0xc3   :  { %v521_v1 = vpack.c.bf16 %v460_v62, %v459_v61  ;;  %v163_v61 = vpack.c.bf16 %v116_v59, %v115_v58 }
  0xc5   :  { %638 = vmatmul.bf16.gmra.mxu1 %v521_v1 }
  0xc6   :  { %v310_v3 = vpop.f32.mrf.mxu0 }
  0xc7   :  { %v311_v4 = vadd.f32 %v4595_v37, %v310_v3 }
  0xc9   :  { %3807 = vmatmul.msk.bf16.gmra.mxu0 %vm189_vm0, %v158_v2  ;;  %v461_v7 = vmax.f32 %v311_v4, 0.0 }
  0xce   :  { %v312_v5 = vpop.f32.mrf.mxu0 }
  0xcf   :  { %v313_v6 = vadd.f32 %v4595_v37, %v312_v5  ;;  %v117_v5 = vld [vmem:[#allocation2 + $0x110] sm:$0xff] }
  0xd1   :  { %v462_v8 = vmax.f32 %v313_v6, 0.0  ;;  %v118_v6 = vld [vmem:[#allocation2 + $0x118] sm:$0xff] }
  0xd2   :  { %v164_v9 = vpack.c.bf16 %v118_v6, %v117_v5 }
  0xd3   :  { %v522_v11 = vpack.c.bf16 %v462_v8, %v461_v7  ;;  %v4648_v8 = vld [vmem:[#allocation7 + $0x1] ss:$0 sm:$0xff] }
  0xd5   :  { %643 = vmatmul.bf16.gmra.mxu1 %v522_v11 }
  0xd6   :  { %v315_v13 = vpop.f32.mrf.mxu0 }
  0xd7   :  { %v316_v14 = vadd.f32 %v4595_v37, %v315_v13 }
  0xd9   :  { %3808 = vmatmul.msk.bf16.gmra.mxu0 %vm189_vm0, %v159_v12  ;;  %v463_v17 = vmax.f32 %v316_v14, 0.0 }
  0xde   :  { %v317_v15 = vpop.f32.mrf.mxu0 }
  0xdf   :  { %v318_v16 = vadd.f32 %v4595_v37, %v317_v15 }
  0xe1   :  { %v464_v18 = vmax.f32 %v318_v16, 0.0 }
  0xe3   :  { %v523_v21 = vpack.c.bf16 %v464_v18, %v463_v17 }
  0xe5   :  { %648 = vmatmul.bf16.gmra.mxu1 %v523_v21 }
  0xe6   :  { %v320_v23 = vpop.f32.mrf.mxu0 }
  0xe7   :  { %v321_v24 = vadd.f32 %v4595_v37, %v320_v23  ;;  %v119_v23 = vld [vmem:[#allocation2 + $0x120] sm:$0xff] }
  0xe9   :  { %3809 = vmatmul.msk.bf16.gmra.mxu0 %vm189_vm0, %v160_v22  ;;  %v465_v28 = vmax.f32 %v321_v24, 0.0  ;;  %v120_v24 = vld [vmem:[#allocation2 + $0x128] sm:$0xff] }
  0xee   :  { %v322_v25 = vpop.f32.mrf.mxu0 }
  0xef   :  { %v323_v26 = vadd.f32 %v4595_v37, %v322_v25 }
  0xf1   :  { %v466_v29 = vmax.f32 %v323_v26, 0.0  ;;  %v165_v26 = vpack.c.bf16 %v120_v24, %v119_v23 }
  0xf3   :  { %v524_v32 = vpack.c.bf16 %v466_v29, %v465_v28 }
  0xf5   :  { %653 = vmatmul.bf16.gmra.mxu1 %v524_v32 }
  0xf6   :  { %v325_v35 = vpop.f32.mrf.mxu0 }
  0xf7   :  { %v326_v39 = vadd.f32 %v4595_v37, %v325_v35 }
  0xf9   :  { %3810 = vmatmul.msk.bf16.gmra.mxu0 %vm189_vm0, %v161_v34  ;;  %v467_v43 = vmax.f32 %v326_v39, 0.0 }
  0xfe   :  { %v327_v40 = vpop.f32.mrf.mxu0 }
  0xff   :  { %v328_v41 = vadd.f32 %v4595_v37, %v327_v40 }
 0x101   :  { %v468_v44 = vmax.f32 %v328_v41, 0.0 }
 0x103   :  { %v525_v47 = vpack.c.bf16 %v468_v44, %v467_v43 }
 0x105   :  { %658 = vmatmul.bf16.gmra.mxu1 %v525_v47  ;;  %v122_v47 = vld [vmem:[#allocation2 + $0x138] sm:$0xff] }
 0x106   :  { %v330_v50 = vpop.f32.mrf.mxu0 }
 0x107   :  { %v331_v53 = vadd.f32 %v4595_v37, %v330_v50  ;;  %v166_v50 = vpack.c.bf16 %v122_v47, %v121_v46 }
 0x109   :  { %3811 = vmatmul.msk.bf16.gmra.mxu0 %vm189_vm0, %v162_v49  ;;  %v469_v56 = vmax.f32 %v331_v53, 0.0 }
 0x10e   :  { %v332_v54 = vpop.f32.mrf.mxu0 }
 0x10f   :  { %v333_v55 = vadd.f32 %v4595_v37, %v332_v54 }
 0x111   :  { %v470_v57 = vmax.f32 %v333_v55, 0.0 }
 0x113   :  { %v526_v60 = vpack.c.bf16 %v470_v57, %v469_v56 }
 0x115   :  { %663 = vmatmul.bf16.gmra.mxu1 %v526_v60 }
 0x116   :  { %v335_v62 = vpop.f32.mrf.mxu0 }
 0x117   :  { %v336_v63 = vadd.f32 %v4595_v37, %v335_v62 }
 0x119   :  { %3812 = vmatmul.msk.bf16.gmra.mxu0 %vm189_vm0, %v163_v61  ;;  %v471_v2 = vmax.f32 %v336_v63, 0.0 }
 0x11e   :  { %v337_v0 = vpop.f32.mrf.mxu0 }
 0x11f   :  { %v338_v1 = vadd.f32 %v4595_v37, %v337_v0 }
 0x121   :  { %v472_v3 = vmax.f32 %v338_v1, 0.0 }
 0x122   :  { %v629_v4 = vpop.f32.mrf.mxu1 }
 0x123   :  { %v527_v7 = vpack.c.bf16 %v472_v3, %v471_v2  ;;  %v630_v11 = vadd.f32 %v4648_v8, %v629_v4  ;;  %v123_v2 = vld [vmem:[#allocation2 + $0x140] sm:$0xff]  ;;  %v124_v3 = vld [vmem:[#allocation2 + $0x148] sm:$0xff] }
 0x124   :  { %v167_v5 = vpack.c.bf16 %v124_v3, %v123_v2  ;;  %v129_v2 = vld [vmem:[#allocation2 + $0x170] sm:$0xff]  ;;  %v130_v3 = vld [vmem:[#allocation2 + $0x178] sm:$0xff] }
 0x125   :  { %668 = vmatmul.bf16.gmra.mxu1 %v527_v7  ;;  %v789_v14 = vmax.f32 %v630_v11, 0.0 }
 0x126   :  { %v340_v10 = vpop.f32.mrf.mxu0 }
 0x127   :  { %v341_v15 = vadd.f32 %v4595_v37, %v340_v10 }
 0x129   :  { %3813 = vmatmul.msk.bf16.gmra.mxu0 %vm189_vm0, %v164_v9  ;;  %v473_v20 = vmax.f32 %v341_v15, 0.0 }
 0x12a   :  { %v631_v12 = vpop.f32.mrf.mxu1 }
 0x12b   :  { %v632_v13 = vadd.f32 %v4648_v8, %v631_v12 }
 0x12d   :  { %v790_v16 = vmax.f32 %v632_v13, 0.0 }
 0x12e   :  { %v342_v17 = vpop.f32.mrf.mxu0 }
 0x12f   :  { %v343_v18 = vadd.f32 %v4595_v37, %v342_v17  ;;  %v853_v19 = vpack.c.bf16 %v790_v16, %v789_v14 }
 0x131   :  { %v474_v21 = vmax.f32 %v343_v18, 0.0  ;;  %963 = vmatmul.bf16.vlgmr.msra.gmra.mxu2 %v853_v19 }
 0x132   :  { %v634_v22 = vpop.f32.mrf.mxu1 }
 0x133   :  { %v528_v25 = vpack.c.bf16 %v474_v21, %v473_v20  ;;  %v635_v29 = vadd.f32 %v4648_v8, %v634_v22  ;;  %v125_v20 = vld [vmem:[#allocation2 + $0x150] sm:$0xff]  ;;  %v126_v21 = vld [vmem:[#allocation2 + $0x158] sm:$0xff] }
 0x134   :  { %v168_v23 = vpack.c.bf16 %v126_v21, %v125_v20  ;;  %v132_v20 = vld [vmem:[#allocation2 + $0x188] sm:$0xff] }
 0x135   :  { %673 = vmatmul.bf16.gmra.mxu1 %v528_v25  ;;  %v791_v32 = vmax.f32 %v635_v29, 0.0 }
 0x136   :  { %v345_v28 = vpop.f32.mrf.mxu0 }
 0x137   :  { %v346_v34 = vadd.f32 %v4595_v37, %v345_v28 }
 0x139   :  { %3814 = vmatmul.msk.bf16.gmra.mxu0 %vm189_vm0, %v165_v26  ;;  %v475_v43 = vmax.f32 %v346_v34, 0.0 }
 0x13a   :  { %v636_v30 = vpop.f32.mrf.mxu1 }
 0x13b   :  { %v637_v31 = vadd.f32 %v4648_v8, %v636_v30 }
 0x13d   :  { %v792_v35 = vmax.f32 %v637_v31, 0.0 }
 0x13e   :  { %v347_v39 = vpop.f32.mrf.mxu0 }
 0x13f   :  { %v348_v40 = vadd.f32 %v4595_v37, %v347_v39  ;;  %v854_v41 = vpack.c.bf16 %v792_v35, %v791_v32 }
 0x141   :  { %v476_v44 = vmax.f32 %v348_v40, 0.0  ;;  %968 = vmatmul.bf16.gmra.mxu2 %v854_v41 }
 0x142   :  { %v639_v45 = vpop.f32.mrf.mxu1 }
 0x143   :  { %v529_v49 = vpack.c.bf16 %v476_v44, %v475_v43  ;;  %v640_v54 = vadd.f32 %v4648_v8, %v639_v45  ;;  %v127_v43 = vld [vmem:[#allocation2 + $0x160] sm:$0xff]  ;;  %v128_v44 = vld [vmem:[#allocation2 + $0x168] sm:$0xff] }
 0x144   :  { %v169_v46 = vpack.c.bf16 %v128_v44, %v127_v43  ;;  %v139_v43 = vld [vmem:[#allocation2 + $0x1c0] sm:$0xff]  ;;  %v140_v44 = vld [vmem:[#allocation2 + $0x1c8] sm:$0xff] }
 0x145   :  { %678 = vmatmul.bf16.gmra.mxu1 %v529_v49  ;;  %v793_v57 = vmax.f32 %v640_v54, 0.0  ;;  %v133_v49 = vld [vmem:[#allocation2 + $0x190] sm:$0xff] }
 0x146   :  { %v350_v53 = vpop.f32.mrf.mxu0 }
 0x147   :  { %v351_v58 = vadd.f32 %v4595_v37, %v350_v53 }
 0x149   :  { %3815 = vmatmul.msk.bf16.gmra.mxu0 %vm189_vm0, %v166_v50  ;;  %v477_v63 = vmax.f32 %v351_v58, 0.0  ;;  %v134_v50 = vld [vmem:[#allocation2 + $0x198] sm:$0xff] }
 0x14a   :  { %v641_v55 = vpop.f32.mrf.mxu1  ;;  %v172_v54 = vpack.c.bf16 %v134_v50, %v133_v49 }
 0x14b   :  { %v642_v56 = vadd.f32 %v4648_v8, %v641_v55 }
 0x14c   :  { %3821 = vmatmul.msk.bf16.vlgmr.msra.gmra.mxu3 %vm189_vm0, %v172_v54 }
 0x14d   :  { %v794_v59 = vmax.f32 %v642_v56, 0.0  ;;  %4142 = vmatpush.bf16.msra.mxu3 %v4615_v27  ;;  %v170_v27 = vpack.c.bf16 %v130_v3, %v129_v2  ;;  %v142_v2 = vld [vmem:[#allocation2 + $0x1d8] sm:$0xff] }
 0x14e   :  { %v352_v60 = vpop.f32.mrf.mxu0 }
 0x14f   :  { %v353_v61 = vadd.f32 %v4595_v37, %v352_v60  ;;  %v855_v62 = vpack.c.bf16 %v794_v59, %v793_v57 }
 0x151   :  { %v478_v0 = vmax.f32 %v353_v61, 0.0  ;;  %973 = vmatmul.bf16.gmra.mxu2 %v855_v62  ;;  %4143 = vmatpush.bf16.msra.mxu3 %v4618_v33 }
 0x152   :  { %v644_v1 = vpop.f32.mrf.mxu1 }
 0x153   :  { %v530_v4 = vpack.c.bf16 %v478_v0, %v477_v63  ;;  %v645_v7 = vadd.f32 %v4648_v8, %v644_v1 }
 0x155   :  { %683 = vmatmul.bf16.gmra.mxu1 %v530_v4  ;;  %v795_v11 = vmax.f32 %v645_v7, 0.0  ;;  %4144 = vmatpush.bf16.msra.mxu3 %v4621_v36  ;;  %v136_v7 = vld [vmem:[#allocation2 + $0x1a8] sm:$0xff] }
 0x156   :  { %v355_v6 = vpop.f32.mrf.mxu0 }
 0x157   :  { %v356_v12 = vadd.f32 %v4595_v37, %v355_v6  ;;  %v135_v6 = vld [vmem:[#allocation2 + $0x1a0] sm:$0xff] }
 0x158   :  { %v173_v33 = vpack.c.bf16 %v136_v7, %v135_v6 }
 0x159   :  { %3816 = vmatmul.msk.bf16.gmra.mxu0 %vm189_vm0, %v167_v5  ;;  %v479_v17 = vmax.f32 %v356_v12, 0.0  ;;  %4145 = vmatpush.bf16.msra.mxu3 %v4625_v38 }
 0x15a   :  { %v646_v9 = vpop.f32.mrf.mxu1 }
 0x15b   :  { %v647_v10 = vadd.f32 %v4648_v8, %v646_v9 }
 0x15c   :  { %3822 = vmatmul.msk.bf16.gmra.mxu3 %vm189_vm0, %v173_v33 }
 0x15d   :  { %v796_v13 = vmax.f32 %v647_v10, 0.0  ;;  %4146 = vmatpush.bf16.msra.mxu3 %v4630_v42 }
 0x15e   :  { %v357_v14 = vpop.f32.mrf.mxu0 }
 0x15f   :  { %v358_v15 = vadd.f32 %v4595_v37, %v357_v14  ;;  %v856_v16 = vpack.c.bf16 %v796_v13, %v795_v11 }
 0x161   :  { %v480_v18 = vmax.f32 %v358_v15, 0.0  ;;  %978 = vmatmul.bf16.gmra.mxu2 %v856_v16  ;;  %4147 = vmatpush.bf16.msra.mxu3 %v4633_v48 }
 0x162   :  { %v649_v19 = vpop.f32.mrf.mxu1 }
 0x163   :  { %v531_v22 = vpack.c.bf16 %v480_v18, %v479_v17  ;;  %v650_v25 = vadd.f32 %v4648_v8, %v649_v19  ;;  %v131_v19 = vld [vmem:[#allocation2 + $0x180] sm:$0xff] }
 0x164   :  { %v171_v42 = vpack.c.bf16 %v132_v20, %v131_v19 }
 0x165   :  { %688 = vmatmul.bf16.gmra.mxu1 %v531_v22  ;;  %v797_v29 = vmax.f32 %v650_v25, 0.0  ;;  %4148 = vmatpush.bf16.msra.mxu3 %v4636_v51 }
 0x166   :  { %v360_v24 = vpop.f32.mrf.mxu0 }
 0x167   :  { %v361_v30 = vadd.f32 %v4595_v37, %v360_v24  ;;  %v138_v24 = vld [vmem:[#allocation2 + $0x1b8] sm:$0xff] }
 0x169   :  { %3817 = vmatmul.msk.bf16.gmra.mxu0 %vm189_vm0, %v168_v23  ;;  %v481_v39 = vmax.f32 %v361_v30, 0.0  ;;  %v137_v23 = vld [vmem:[#allocation2 + $0x1b0] sm:$0xff]  ;;  %4149 = vmatpush.bf16.msra.mxu3 %v4640_v52 }
 0x16a   :  { %v651_v26 = vpop.f32.mrf.mxu1  ;;  %v174_v48 = vpack.c.bf16 %v138_v24, %v137_v23 }
 0x16b   :  { %v652_v28 = vadd.f32 %v4648_v8, %v651_v26 }
 0x16c   :  { %3823 = vmatmul.msk.bf16.gmra.mxu3 %vm189_vm0, %v174_v48 }
 0x16d   :  { %v798_v31 = vmax.f32 %v652_v28, 0.0 }
 0x16e   :  { %v362_v32 = vpop.f32.mrf.mxu0 }
 0x16f   :  { %v363_v34 = vadd.f32 %v4595_v37, %v362_v32  ;;  %v857_v35 = vpack.c.bf16 %v798_v31, %v797_v29 }
 0x171   :  { %v482_v40 = vmax.f32 %v363_v34, 0.0  ;;  %983 = vmatmul.bf16.gmra.mxu2 %v857_v35 }
 0x172   :  { %v654_v41 = vpop.f32.mrf.mxu1 }
 0x173   :  { %v532_v45 = vpack.c.bf16 %v482_v40, %v481_v39  ;;  %v655_v53 = vadd.f32 %v4648_v8, %v654_v41 }
 0x175   :  { %693 = vmatmul.bf16.gmra.mxu1 %v532_v45  ;;  %v799_v57 = vmax.f32 %v655_v53, 0.0 }
 0x176   :  { %v365_v47 = vpop.f32.mrf.mxu0 }
 0x177   :  { %v366_v58 = vadd.f32 %v4595_v37, %v365_v47 }
 0x179   :  { %3818 = vmatmul.msk.bf16.gmra.mxu0 %vm189_vm0, %v169_v46  ;;  %v483_v63 = vmax.f32 %v366_v58, 0.0  ;;  %v175_v46 = vpack.c.bf16 %v140_v44, %v139_v43 }
 0x17a   :  { %v656_v55 = vpop.f32.mrf.mxu1 }
 0x17b   :  { %v657_v56 = vadd.f32 %v4648_v8, %v656_v55 }
 0x17c   :  { %3824 = vmatmul.msk.bf16.gmra.mxu3 %vm189_vm0, %v175_v46 }
 0x17d   :  { %v800_v59 = vmax.f32 %v657_v56, 0.0 }
 0x17e   :  { %v367_v60 = vpop.f32.mrf.mxu0 }
 0x17f   :  { %v368_v61 = vadd.f32 %v4595_v37, %v367_v60  ;;  %v858_v62 = vpack.c.bf16 %v800_v59, %v799_v57 }
 0x181   :  { %v484_v0 = vmax.f32 %v368_v61, 0.0  ;;  %988 = vmatmul.bf16.gmra.mxu2 %v858_v62 }
 0x182   :  { %v659_v1 = vpop.f32.mrf.mxu1 }
 0x183   :  { %v533_v4 = vpack.c.bf16 %v484_v0, %v483_v63  ;;  %v660_v9 = vadd.f32 %v4648_v8, %v659_v1  ;;  %v4706_v0 = vld [vmem:[#allocation7 + $0x2] ss:$0 sm:$0xff]  ;;  %v141_v1 = vld [vmem:[#allocation2 + $0x1d0] sm:$0xff] }
 0x185   :  { %698 = vmatmul.bf16.gmra.mxu1 %v533_v4  ;;  %v801_v36 = vmax.f32 %v660_v9, 0.0  ;;  %v176_v4 = vpack.c.bf16 %v142_v2, %v141_v1 }
 0x186   :  { %v370_v5 = vpop.f32.mrf.mxu0 }
 0x187   :  { %v371_v12 = vadd.f32 %v4595_v37, %v370_v5 }
 0x189   :  { %3819 = vmatmul.msk.bf16.gmra.mxu0 %vm189_vm0, %v170_v27  ;;  %v485_v16 = vmax.f32 %v371_v12, 0.0 }
 0x18a   :  { %v661_v10 = vpop.f32.mrf.mxu1 }
 0x18b   :  { %v662_v11 = vadd.f32 %v4648_v8, %v661_v10 }
 0x18c   :  { %3825 = vmatmul.msk.bf16.gmra.mxu3 %vm189_vm0, %v176_v4 }
 0x18d   :  { %v802_v13 = vmax.f32 %v662_v11, 0.0 }
 0x18e   :  { %v372_v14 = vpop.f32.mrf.mxu0 }
 0x18f   :  { %v373_v15 = vadd.f32 %v4595_v37, %v372_v14  ;;  %v859_v38 = vpack.c.bf16 %v802_v13, %v801_v36 }
 0x191   :  { %v486_v17 = vmax.f32 %v373_v15, 0.0  ;;  %993 = vmatmul.bf16.gmra.mxu2 %v859_v38 }
 0x192   :  { %v664_v18 = vpop.f32.mrf.mxu1 }
 0x193   :  { %v534_v21 = vpack.c.bf16 %v486_v17, %v485_v16  ;;  %v665_v25 = vadd.f32 %v4648_v8, %v664_v18 }
 0x195   :  { %703 = vmatmul.bf16.gmra.mxu1 %v534_v21  ;;  %v803_v29 = vmax.f32 %v665_v25, 0.0 }
 0x196   :  { %v375_v22 = vpop.f32.mrf.mxu0 }
 0x197   :  { %v376_v51 = vadd.f32 %v4595_v37, %v375_v22  ;;  %v144_v22 = vld [vmem:[#allocation2 + $0x1e8] sm:$0xff] }
 0x199   :  { %3820 = vmatmul.msk.bf16.gmra.mxu0 %vm189_vm0, %v171_v42  ;;  %v487_v35 = vmax.f32 %v376_v51, 0.0  ;;  %v143_v42 = vld [vmem:[#allocation2 + $0x1e0] sm:$0xff] }
 0x19a   :  { %v666_v26 = vpop.f32.mrf.mxu1  ;;  %v177_v24 = vpack.c.bf16 %v144_v22, %v143_v42 }
 0x19b   :  { %v667_v28 = vadd.f32 %v4648_v8, %v666_v26 }
 0x19c   :  { %3826 = vmatmul.msk.bf16.gmra.mxu3 %vm189_vm0, %v177_v24 }
 0x19d   :  { %v804_v30 = vmax.f32 %v667_v28, 0.0 }
 0x19e   :  { %v377_v31 = vpop.f32.mrf.mxu0 }
 0x19f   :  { %v378_v32 = vadd.f32 %v4595_v37, %v377_v31  ;;  %v860_v34 = vpack.c.bf16 %v804_v30, %v803_v29 }
 0x1a1   :  { %v488_v52 = vmax.f32 %v378_v32, 0.0  ;;  %998 = vmatmul.bf16.gmra.mxu2 %v860_v34 }
 0x1a2   :  { %v669_v39 = vpop.f32.mrf.mxu1 }
 0x1a3   :  { %v535_v40 = vpack.c.bf16 %v488_v52, %v487_v35  ;;  %v670_v45 = vadd.f32 %v4648_v8, %v669_v39 }
 0x1a5   :  { %708 = vmatmul.bf16.gmra.mxu1 %v535_v40  ;;  %v805_v50 = vmax.f32 %v670_v45, 0.0 }
 0x1a6   :  { %v380_v41 = vpop.f32.mrf.mxu0 }
 0x1a7   :  { %v381_v53 = vadd.f32 %v4595_v37, %v380_v41 }
 0x1a9   :  { %v489_v58 = vmax.f32 %v381_v53, 0.0 }
 0x1aa   :  { %v671_v47 = vpop.f32.mrf.mxu1 }
 0x1ab   :  { %v672_v49 = vadd.f32 %v4648_v8, %v671_v47 }
 0x1ad   :  { %v806_v54 = vmax.f32 %v672_v49, 0.0  ;;  %v145_v49 = vld [vmem:[#allocation2 + $0x1f0] sm:$0xff] }
 0x1ae   :  { %v382_v55 = vpop.f32.mrf.mxu0 }
 0x1af   :  { %v383_v56 = vadd.f32 %v4595_v37, %v382_v55  ;;  %v861_v57 = vpack.c.bf16 %v806_v54, %v805_v50  ;;  %v146_v50 = vld [vmem:[#allocation2 + $0x1f8] sm:$0xff] }
 0x1b0   :  { %v178_v54 = vpack.c.bf16 %v146_v50, %v145_v49 }
 0x1b1   :  { %v490_v59 = vmax.f32 %v383_v56, 0.0  ;;  %1003 = vmatmul.bf16.gmra.mxu2 %v861_v57 }
 0x1b2   :  { %v674_v60 = vpop.f32.mrf.mxu1  ;;  %3827 = vmatmul.msk.bf16.gmra.mxu3 %vm189_vm0, %v178_v54 }
 0x1b3   :  { %v536_v61 = vpack.c.bf16 %v490_v59, %v489_v58  ;;  %v675_v3 = vadd.f32 %v4648_v8, %v674_v60 }
 0x1b4   :  { %v964_v62 = vpop.f32.mrf.mxu2 }
 0x1b5   :  { %713 = vmatmul.bf16.gmra.mxu1 %v536_v61  ;;  %v965_v5 = vadd.f32 %v4706_v0, %v964_v62  ;;  %v807_v9 = vmax.f32 %v675_v3, 0.0 }
 0x1b6   :  { %v385_v63 = vpop.f32.mrf.mxu0 }
 0x1b7   :  { %v386_v33 = vadd.f32 %v4595_v37, %v385_v63  ;;  %v1124_v12 = vmax.f32 %v965_v5, 0.0 }
 0x1b9   :  { %v491_v38 = vmax.f32 %v386_v33, 0.0 }
 0x1ba   :  { %v676_v27 = vpop.f32.mrf.mxu1 }
 0x1bb   :  { %v677_v6 = vadd.f32 %v4648_v8, %v676_v27 }
 0x1bc   :  { %v966_v7 = vpop.f32.mrf.mxu2 }
 0x1bd   :  { %v808_v10 = vmax.f32 %v677_v6, 0.0  ;;  %v967_v11 = vadd.f32 %v4706_v0, %v966_v7 }
 0x1be   :  { %v387_v36 = vpop.f32.mrf.mxu0 }
 0x1bf   :  { %v1125_v13 = vmax.f32 %v967_v11, 0.0  ;;  %v388_v14 = vadd.f32 %v4595_v37, %v387_v36  ;;  %v862_v15 = vpack.c.bf16 %v808_v10, %v807_v9 }
 0x1c1   :  { %v4715_v16 = vpack.c.bf16 %v1125_v13, %v1124_v12  ;;  %v492_v17 = vmax.f32 %v388_v14, 0.0  ;;  %1008 = vmatmul.bf16.gmra.mxu2 %v862_v15 }
 0x1c2   :  { %v679_v18 = vpop.f32.mrf.mxu1 }
 0x1c3   :  { %v537_v19 = vpack.c.bf16 %v492_v17, %v491_v38  ;;  %v680_v23 = vadd.f32 %v4648_v8, %v679_v18 }
 0x1c4   :  { %v969_v20 = vpop.f32.mrf.mxu2 }
 0x1c5   :  { %718 = vmatmul.bf16.gmra.mxu1 %v537_v19  ;;  %v970_v48 = vadd.f32 %v4706_v0, %v969_v20  ;;  %v809_v29 = vmax.f32 %v680_v23, 0.0 }
 0x1c6   :  { %v390_v21 = vpop.f32.mrf.mxu0 }
 0x1c7   :  { %v391_v51 = vadd.f32 %v4595_v37, %v390_v21  ;;  %v1126_v34 = vmax.f32 %v970_v48, 0.0 }
 0x1c9   :  { %v493_v40 = vmax.f32 %v391_v51, 0.0 }
 0x1ca   :  { %v681_v25 = vpop.f32.mrf.mxu1 }
 0x1cb   :  { %v682_v26 = vadd.f32 %v4648_v8, %v681_v25 }
 0x1cc   :  { %v971_v28 = vpop.f32.mrf.mxu2 }
 0x1cd   :  { %v810_v30 = vmax.f32 %v682_v26, 0.0  ;;  %v972_v31 = vadd.f32 %v4706_v0, %v971_v28 }
 0x1ce   :  { %v392_v32 = vpop.f32.mrf.mxu0 }
 0x1cf   :  { %v1127_v35 = vmax.f32 %v972_v31, 0.0  ;;  %v393_v52 = vadd.f32 %v4595_v37, %v392_v32  ;;  %v863_v39 = vpack.c.bf16 %v810_v30, %v809_v29 }
 0x1d1   :  { %v494_v41 = vmax.f32 %v393_v52, 0.0  ;;  %1013 = vmatmul.bf16.gmra.mxu2 %v863_v39  ;;  %v4724_v43 = vpack.c.bf16 %v1127_v35, %v1126_v34 }
 0x1d2   :  { %v684_v44 = vpop.f32.mrf.mxu1 }
 0x1d3   :  { %v538_v45 = vpack.c.bf16 %v494_v41, %v493_v40  ;;  %v685_v53 = vadd.f32 %v4648_v8, %v684_v44 }
 0x1d4   :  { %v974_v46 = vpop.f32.mrf.mxu2 }
 0x1d5   :  { %723 = vmatmul.bf16.gmra.mxu1 %v538_v45  ;;  %v975_v56 = vadd.f32 %v4706_v0, %v974_v46  ;;  %v811_v59 = vmax.f32 %v685_v53, 0.0 }
 0x1d6   :  { %v395_v47 = vpop.f32.mrf.mxu0 }
 0x1d7   :  { %v396_v60 = vadd.f32 %v4595_v37, %v395_v47  ;;  %v1128_v1 = vmax.f32 %v975_v56, 0.0 }
 0x1d9   :  { %v495_v27 = vmax.f32 %v396_v60, 0.0 }
 0x1da   :  { %v686_v55 = vpop.f32.mrf.mxu1 }
 0x1db   :  { %v687_v57 = vadd.f32 %v4648_v8, %v686_v55 }
 0x1dc   :  { %v976_v58 = vpop.f32.mrf.mxu2 }
 0x1dd   :  { %v812_v61 = vmax.f32 %v687_v57, 0.0  ;;  %v977_v62 = vadd.f32 %v4706_v0, %v976_v58  ;;  %v420_v58 = vpop.f32.mrf.mxu3 }
 0x1de   :  { %v397_v63 = vpop.f32.mrf.mxu0 }
 0x1df   :  { %v1129_v2 = vmax.f32 %v977_v62, 0.0  ;;  %v398_v3 = vadd.f32 %v4595_v37, %v397_v63  ;;  %v864_v4 = vpack.c.bf16 %v812_v61, %v811_v59 }
 0x1e1   :  { %v496_v5 = vmax.f32 %v398_v3, 0.0  ;;  %1018 = vmatmul.bf16.gmra.mxu2 %v864_v4  ;;  %v4733_v6 = vpack.c.bf16 %v1129_v2, %v1128_v1 }
 0x1e2   :  { %v689_v7 = vpop.f32.mrf.mxu1 }
 0x1e3   :  { %v539_v9 = vpack.c.bf16 %v496_v5, %v495_v27  ;;  %v690_v11 = vadd.f32 %v4648_v8, %v689_v7 }
 0x1e4   :  { %v979_v33 = vpop.f32.mrf.mxu2 }
 0x1e5   :  { %728 = vmatmul.bf16.gmra.mxu1 %v539_v9  ;;  %v980_v12 = vadd.f32 %v4706_v0, %v979_v33  ;;  %v813_v15 = vmax.f32 %v690_v11, 0.0 }
 0x1e6   :  { %v400_v10 = vpop.f32.mrf.mxu0 }
 0x1e7   :  { %v401_v38 = vadd.f32 %v4595_v37, %v400_v10  ;;  %v1130_v20 = vmax.f32 %v980_v12, 0.0  ;;  %v422_v10 = vpop.f32.mrf.mxu3 }
 0x1e9   :  { %v497_v23 = vmax.f32 %v401_v38, 0.0 }
 0x1ea   :  { %v691_v36 = vpop.f32.mrf.mxu1 }
 0x1eb   :  { %v692_v13 = vadd.f32 %v4648_v8, %v691_v36 }
 0x1ec   :  { %v981_v14 = vpop.f32.mrf.mxu2 }
 0x1ed   :  { %v814_v17 = vmax.f32 %v692_v13, 0.0  ;;  %v982_v18 = vadd.f32 %v4706_v0, %v981_v14 }
 0x1ee   :  { %v402_v19 = vpop.f32.mrf.mxu0 }
 0x1ef   :  { %v1131_v21 = vmax.f32 %v982_v18, 0.0  ;;  %v403_v42 = vadd.f32 %v4595_v37, %v402_v19  ;;  %v865_v22 = vpack.c.bf16 %v814_v17, %v813_v15  ;;  %v4116_v17 = vld [vmem:[#allocation6 + $0xf8] sm:$0xff] }
 0x1f0   :  { %1625 = vmatpush.bf16.msrb.mxu0 %v4116_v17 }
 0x1f1   :  { %v498_v24 = vmax.f32 %v403_v42, 0.0  ;;  %1023 = vmatmul.bf16.gmra.mxu2 %v865_v22  ;;  %v4741_v25 = vpack.c.bf16 %v1131_v21, %v1130_v20  ;;  %v425_v20 = vpop.f32.mrf.mxu3 }
 0x1f2   :  { %v694_v48 = vpop.f32.mrf.mxu1 }
 0x1f3   :  { %v540_v26 = vpack.c.bf16 %v498_v24, %v497_v23  ;;  %v695_v51 = vadd.f32 %v4648_v8, %v694_v48 }
 0x1f4   :  { %v984_v28 = vpop.f32.mrf.mxu2 }
 0x1f5   :  { %733 = vmatmul.bf16.gmra.mxu1 %v540_v26  ;;  %v985_v31 = vadd.f32 %v4706_v0, %v984_v28  ;;  %v815_v35 = vmax.f32 %v695_v51, 0.0 }
 0x1f6   :  { %v405_v29 = vpop.f32.mrf.mxu0 }
 0x1f7   :  { %v406_v52 = vadd.f32 %v4595_v37, %v405_v29  ;;  %v1132_v44 = vmax.f32 %v985_v31, 0.0 }
 0x1f9   :  { %v499_v49 = vmax.f32 %v406_v52, 0.0 }
 0x1fa   :  { %v696_v30 = vpop.f32.mrf.mxu1 }
 0x1fb   :  { %v697_v32 = vadd.f32 %v4648_v8, %v696_v30 }
 0x1fc   :  { %v986_v34 = vpop.f32.mrf.mxu2 }
 0x1fd   :  { %v816_v39 = vmax.f32 %v697_v32, 0.0  ;;  %v987_v40 = vadd.f32 %v4706_v0, %v986_v34 }
 0x1fe   :  { %v407_v41 = vpop.f32.mrf.mxu0 }
 0x1ff   :  { %v1133_v45 = vmax.f32 %v987_v40, 0.0  ;;  %v408_v46 = vadd.f32 %v4595_v37, %v407_v41  ;;  %v866_v47 = vpack.c.bf16 %v816_v39, %v815_v35  ;;  %v427_v41 = vpop.f32.mrf.mxu3 }
 0x201   :  { %v500_v50 = vmax.f32 %v408_v46, 0.0  ;;  %1028 = vmatmul.bf16.gmra.mxu2 %v866_v47  ;;  %v4749_v53 = vpack.c.bf16 %v1133_v45, %v1132_v44  ;;  %v421_v45 = vadd.f32 %v4595_v37, %v420_v58 }
 0x202   :  { %v699_v54 = vpop.f32.mrf.mxu1 }
 0x203   :  { %v541_v55 = vpack.c.bf16 %v500_v50, %v499_v49  ;;  %v700_v59 = vadd.f32 %v4648_v8, %v699_v54  ;;  %v423_v49 = vadd.f32 %v4595_v37, %v422_v10 }
 0x204   :  { %v989_v56 = vpop.f32.mrf.mxu2 }
 0x205   :  { %738 = vmatmul.bf16.gmra.mxu1 %v541_v55  ;;  %v990_v61 = vadd.f32 %v4706_v0, %v989_v56  ;;  %v817_v1 = vmax.f32 %v700_v59, 0.0  ;;  %v505_v59 = vmax.f32 %v421_v45, 0.0 }
 0x206   :  { %v410_v57 = vpop.f32.mrf.mxu0 }
 0x207   :  { %v411_v2 = vadd.f32 %v4595_v37, %v410_v57  ;;  %v1134_v5 = vmax.f32 %v990_v61, 0.0 }
 0x209   :  { %v501_v11 = vmax.f32 %v411_v2, 0.0 }
 0x20a   :  { %v701_v60 = vpop.f32.mrf.mxu1 }
 0x20b   :  { %v702_v62 = vadd.f32 %v4648_v8, %v701_v60  ;;  %v430_v60 = vpop.f32.mrf.mxu3 }
 0x20c   :  { %v991_v63 = vpop.f32.mrf.mxu2 }
 0x20d   :  { %v818_v3 = vmax.f32 %v702_v62, 0.0  ;;  %v992_v4 = vadd.f32 %v4706_v0, %v991_v63  ;;  %v506_v62 = vmax.f32 %v423_v49, 0.0 }
 0x20e   :  { %v412_v27 = vpop.f32.mrf.mxu0 }
 0x20f   :  { %v1135_v7 = vmax.f32 %v992_v4, 0.0  ;;  %v413_v9 = vadd.f32 %v4595_v37, %v412_v27  ;;  %v867_v33 = vpack.c.bf16 %v818_v3, %v817_v1  ;;  %v544_v3 = vpack.c.bf16 %v506_v62, %v505_v59 }
 0x211   :  { %v502_v36 = vmax.f32 %v413_v9, 0.0  ;;  %1033 = vmatmul.bf16.gmra.mxu2 %v867_v33  ;;  %v4757_v12 = vpack.c.bf16 %v1135_v7, %v1134_v5  ;;  %v4776_v5 = vld [vmem:[#allocation7] ss:$0 sm:$0xff] }
 0x212   :  { %v704_v13 = vpop.f32.mrf.mxu1  ;;  %v426_v7 = vadd.f32 %v4776_v5, %v425_v20  ;;  %v428_v10 = vadd.f32 %v4776_v5, %v427_v41 }
 0x213   :  { %v542_v14 = vpack.c.bf16 %v502_v36, %v501_v11  ;;  %v705_v18 = vadd.f32 %v4648_v8, %v704_v13 }
 0x214   :  { %v994_v15 = vpop.f32.mrf.mxu2 }
 0x215   :  { %743 = vmatmul.bf16.gmra.mxu1 %v542_v14  ;;  %v995_v21 = vadd.f32 %v4706_v0, %v994_v15  ;;  %v819_v23 = vmax.f32 %v705_v18, 0.0  ;;  %v508_v18 = vmax.f32 %v428_v10, 0.0 }
 0x216   :  { %v415_v38 = vpop.f32.mrf.mxu0 }
 0x217   :  { %v416_v24 = vadd.f32 %v4595_v37, %v415_v38  ;;  %v1136_v29 = vmax.f32 %v995_v21, 0.0  ;;  %v507_v38 = vmax.f32 %v426_v7, 0.0 }
 0x219   :  { %v503_v32 = vmax.f32 %v416_v24, 0.0 }
 0x21a   :  { %v706_v19 = vpop.f32.mrf.mxu1 }
 0x21b   :  { %v707_v42 = vadd.f32 %v4648_v8, %v706_v19 }
 0x21c   :  { %v996_v22 = vpop.f32.mrf.mxu2 }
 0x21d   :  { %v820_v48 = vmax.f32 %v707_v42, 0.0  ;;  %v997_v26 = vadd.f32 %v4706_v0, %v996_v22 }
 0x21e   :  { %v417_v28 = vpop.f32.mrf.mxu0 }
 0x21f   :  { %v1137_v51 = vmax.f32 %v997_v26, 0.0  ;;  %v418_v30 = vadd.f32 %v4595_v37, %v417_v28  ;;  %v868_v31 = vpack.c.bf16 %v820_v48, %v819_v23  ;;  %v432_v37 = vpop.f32.mrf.mxu3  ;;  %v545_v23 = vpack.c.bf16 %v508_v18, %v507_v38 }
 0x220   :  { %v431_v26 = vadd.f32 %v4776_v5, %v430_v60 }
 0x221   :  { %v504_v34 = vmax.f32 %v418_v30, 0.0  ;;  %1038 = vmatmul.bf16.gmra.mxu2 %v868_v31  ;;  %v4765_v35 = vpack.c.bf16 %v1137_v51, %v1136_v29  ;;  %v433_v51 = vadd.f32 %v4776_v5, %v432_v37 }
 0x222   :  { %v709_v52 = vpop.f32.mrf.mxu1  ;;  %v509_v41 = vmax.f32 %v431_v26, 0.0 }
 0x223   :  { %v543_v39 = vpack.c.bf16 %v504_v34, %v503_v32  ;;  %v710_v44 = vadd.f32 %v4648_v8, %v709_v52  ;;  %v510_v45 = vmax.f32 %v433_v51, 0.0 }
 0x224   :  { %v999_v40 = vpop.f32.mrf.mxu2 }
 0x225   :  { %748 = vmatmul.bf16.vlgmr.msrb.gmra.mxu3 %v543_v39  ;;  %v1000_v47 = vadd.f32 %v4706_v0, %v999_v40  ;;  %v821_v55 = vmax.f32 %v710_v44, 0.0  ;;  %v4115_v40 = vld [vmem:[#allocation6 + $0xf0] sm:$0xff] }
 0x226   :  { %1626 = vmatpush.bf16.msrb.mxu0 %v4115_v40 }
 0x227   :  { %v1138_v61 = vmax.f32 %v1000_v47, 0.0  ;;  %v435_v22 = vpop.f32.mrf.mxu3 }
 0x228   :  { %v436_v59 = vadd.f32 %v4776_v5, %v435_v22 }
 0x22a   :  { %v711_v46 = vpop.f32.mrf.mxu1  ;;  %v511_v37 = vmax.f32 %v436_v59, 0.0 }
 0x22b   :  { %v712_v50 = vadd.f32 %v4648_v8, %v711_v46 }
 0x22c   :  { %v1001_v54 = vpop.f32.mrf.mxu2 }
 0x22d   :  { %v822_v56 = vmax.f32 %v712_v50, 0.0  ;;  %v1002_v57 = vadd.f32 %v4706_v0, %v1001_v54  ;;  %v546_v54 = vpack.c.bf16 %v510_v45, %v509_v41 }
 0x22f   :  { %v1139_v63 = vmax.f32 %v1002_v57, 0.0  ;;  %v869_v1 = vpack.c.bf16 %v822_v56, %v821_v55  ;;  %v437_v32 = vpop.f32.mrf.mxu3 }
 0x230   :  { %v438_v62 = vadd.f32 %v4776_v5, %v437_v32 }
 0x231   :  { %1043 = vmatmul.bf16.gmra.mxu2 %v869_v1  ;;  %v4773_v58 = vpack.c.bf16 %v1139_v63, %v1138_v61 }
 0x232   :  { %v714_v2 = vpop.f32.mrf.mxu1  ;;  %v512_v7 = vmax.f32 %v438_v62, 0.0  ;;  %v4813_v62 = vld [vmem:[#allocation7 + $0x1] ss:$0 sm:$0xff] }
 0x233   :  { %v715_v27 = vadd.f32 %v4648_v8, %v714_v2 }
 0x234   :  { %v1004_v4 = vpop.f32.mrf.mxu2 }
 0x235   :  { %753 = vmatmul.bf16.gmra.mxu3 %v544_v3  ;;  %v1005_v33 = vadd.f32 %v4706_v0, %v1004_v4  ;;  %v823_v13 = vmax.f32 %v715_v27, 0.0 }
 0x237   :  { %v1140_v17 = vmax.f32 %v1005_v33, 0.0  ;;  %v440_v56 = vpop.f32.mrf.mxu3 }
 0x238   :  { %v441_v38 = vadd.f32 %v4776_v5, %v440_v56 }
 0x23a   :  { %v716_v9 = vpop.f32.mrf.mxu1  ;;  %v513_v26 = vmax.f32 %v441_v38, 0.0 }
 0x23b   :  { %v717_v11 = vadd.f32 %v4648_v8, %v716_v9 }
 0x23c   :  { %v1006_v36 = vpop.f32.mrf.mxu2 }
 0x23d   :  { %v824_v14 = vmax.f32 %v717_v11, 0.0  ;;  %v1007_v15 = vadd.f32 %v4706_v0, %v1006_v36 }
 0x23f   :  { %v1141_v19 = vmax.f32 %v1007_v15, 0.0  ;;  %v870_v21 = vpack.c.bf16 %v824_v14, %v823_v13  ;;  %v442_v10 = vpop.f32.mrf.mxu3  ;;  %v547_v13 = vpack.c.bf16 %v512_v7, %v511_v37 }
 0x241   :  { %1048 = vmatmul.bf16.gmra.mxu2 %v870_v21  ;;  %v4783_v42 = vpack.c.bf16 %v1141_v19, %v1140_v17  ;;  %v443_v21 = vadd.f32 %v4776_v5, %v442_v10 }
 0x242   :  { %v719_v20 = vpop.f32.mrf.mxu1 }
 0x243   :  { %v720_v48 = vadd.f32 %v4648_v8, %v719_v20 }
 0x244   :  { %v1009_v24 = vpop.f32.mrf.mxu2 }
 0x245   :  { %758 = vmatmul.bf16.gmra.mxu3 %v545_v23  ;;  %v1010_v29 = vadd.f32 %v4706_v0, %v1009_v24  ;;  %v825_v34 = vmax.f32 %v720_v48, 0.0 }
 0x247   :  { %v1142_v44 = vmax.f32 %v1010_v29, 0.0  ;;  %v445_v18 = vpop.f32.mrf.mxu3  ;;  %v514_v29 = vmax.f32 %v443_v21, 0.0 }
 0x248   :  { %v446_v41 = vadd.f32 %v4776_v5, %v445_v18  ;;  %v4107_v18 = vld [vmem:[#allocation6 + $0xb0] sm:$0xff] }
 0x24a   :  { %v721_v28 = vpop.f32.mrf.mxu1 }
 0x24b   :  { %v722_v30 = vadd.f32 %v4648_v8, %v721_v28 }
 0x24c   :  { %v1011_v31 = vpop.f32.mrf.mxu2 }
 0x24d   :  { %v826_v52 = vmax.f32 %v722_v30, 0.0  ;;  %v1012_v39 = vadd.f32 %v4706_v0, %v1011_v31 }
 0x24f   :  { %v1143_v46 = vmax.f32 %v1012_v39, 0.0  ;;  %v871_v47 = vpack.c.bf16 %v826_v52, %v825_v34  ;;  %v548_v34 = vpack.c.bf16 %v514_v29, %v513_v26  ;;  %v447_v52 = vpop.f32.mrf.mxu3  ;;  %v4106_v29 = vld [vmem:[#allocation6 + $0xa8] sm:$0xff] }
 0x251   :  { %1053 = vmatmul.bf16.gmra.mxu2 %v871_v47  ;;  %v4791_v49 = vpack.c.bf16 %v1143_v46, %v1142_v44  ;;  %v448_v44 = vadd.f32 %v4776_v5, %v447_v52 }
 0x252   :  { %v724_v50 = vpop.f32.mrf.mxu1 }
 0x253   :  { %v725_v57 = vadd.f32 %v4648_v8, %v724_v50 }
 0x254   :  { %v1014_v55 = vpop.f32.mrf.mxu2 }
 0x255   :  { %763 = vmatmul.bf16.gmra.mxu3 %v546_v54  ;;  %v1015_v61 = vadd.f32 %v4706_v0, %v1014_v55  ;;  %v827_v2 = vmax.f32 %v725_v57, 0.0  ;;  %v515_v54 = vmax.f32 %v446_v41, 0.0  ;;  %v516_v55 = vmax.f32 %v448_v44, 0.0  ;;  %v4114_v57 = vld [vmem:[#allocation6 + $0xe8] sm:$0xff]  ;;  %v4105_v41 = vld [vmem:[#allocation6 + $0xa0] sm:$0xff] }
 0x256   :  { %1627 = vmatpush.bf16.msrb.mxu0 %v4114_v57 }
 0x257   :  { %v1144_v27 = vmax.f32 %v1015_v61, 0.0  ;;  %v450_v50 = vpop.f32.mrf.mxu3 }
 0x25a   :  { %v726_v60 = vpop.f32.mrf.mxu1 }
 0x25b   :  { %v727_v63 = vadd.f32 %v4648_v8, %v726_v60  ;;  %v549_v60 = vpack.c.bf16 %v516_v55, %v515_v54 }
 0x25c   :  { %v1016_v1 = vpop.f32.mrf.mxu2 }
 0x25d   :  { %v828_v3 = vmax.f32 %v727_v63, 0.0  ;;  %v1017_v4 = vadd.f32 %v4706_v0, %v1016_v1 }
 0x25f   :  { %v1145_v9 = vmax.f32 %v1017_v4, 0.0  ;;  %v872_v33 = vpack.c.bf16 %v828_v3, %v827_v2  ;;  %v452_v61 = vpop.f32.mrf.mxu3 }
 0x260   :  { %v453_v2 = vadd.f32 %v4776_v5, %v452_v61 }
 0x261   :  { %1058 = vmatmul.bf16.gmra.mxu2 %v872_v33  ;;  %v4799_v11 = vpack.c.bf16 %v1145_v9, %v1144_v27 }
 0x262   :  { %v729_v36 = vpop.f32.mrf.mxu1  ;;  %v518_v7 = vmax.f32 %v453_v2, 0.0 }
 0x263   :  { %v730_v15 = vadd.f32 %v4648_v8, %v729_v36  ;;  %v4108_v36 = vld [vmem:[#allocation6 + $0xb8] sm:$0xff] }
 0x264   :  { %v1019_v14 = vpop.f32.mrf.mxu2  ;;  %1290 = vmatpush.bf16.msrb.mxu3 %v4108_v36 }
 0x265   :  { %768 = vmatmul.bf16.gmra.mxu3 %v547_v13  ;;  %v1020_v19 = vadd.f32 %v4706_v0, %v1019_v14  ;;  %v829_v23 = vmax.f32 %v730_v15, 0.0 }
 0x267   :  { %v1146_v28 = vmax.f32 %v1020_v19, 0.0 }
 0x268   :  { %1291 = vmatpush.bf16.msrb.mxu3 %v4107_v18 }
 0x26a   :  { %v731_v17 = vpop.f32.mrf.mxu1 }
 0x26b   :  { %v732_v20 = vadd.f32 %v4648_v8, %v731_v17 }
 0x26c   :  { %v1021_v22 = vpop.f32.mrf.mxu2  ;;  %1292 = vmatpush.bf16.msrb.mxu3 %v4106_v29 }
 0x26d   :  { %v830_v24 = vmax.f32 %v732_v20, 0.0  ;;  %v1022_v48 = vadd.f32 %v4706_v0, %v1021_v22  ;;  %v4113_v20 = vld [vmem:[#allocation6 + $0xe0] sm:$0xff] }
 0x26e   :  { %1628 = vmatpush.bf16.msrb.mxu0 %v4113_v20 }
 0x26f   :  { %v1147_v51 = vmax.f32 %v1022_v48, 0.0  ;;  %v873_v30 = vpack.c.bf16 %v830_v24, %v829_v23 }
 0x270   :  { %1293 = vmatpush.bf16.msrb.mxu3 %v4105_v41 }
 0x271   :  { %1063 = vmatmul.bf16.gmra.mxu2 %v873_v30  ;;  %v4807_v31 = vpack.c.bf16 %v1147_v51, %v1146_v28  ;;  %v4124_v28 = vld [vmem:[#allocation6 + $0x138] sm:$0xff] }
 0x272   :  { %v734_v32 = vpop.f32.mrf.mxu1  ;;  %1960 = vmatpush.bf16.msrb.mxu1 %v4124_v28 }
 0x273   :  { %v735_v39 = vadd.f32 %v4648_v8, %v734_v32 }
 0x275   :  { %773 = vmatmul.bf16.gmra.mxu3 %v548_v34  ;;  %v831_v46 = vmax.f32 %v735_v39, 0.0 }
 0x27a   :  { %v736_v40 = vpop.f32.mrf.mxu1 }
 0x27b   :  { %v737_v45 = vadd.f32 %v4648_v8, %v736_v40  ;;  %v451_v8 = vadd.f32 %v4776_v5, %v450_v50 }
 0x27d   :  { %v832_v47 = vmax.f32 %v737_v45, 0.0  ;;  %v517_v27 = vmax.f32 %v451_v8, 0.0  ;;  %v4112_v8 = vld [vmem:[#allocation6 + $0xd8] sm:$0xff] }
 0x27e   :  { %1629 = vmatpush.bf16.msrb.mxu0 %v4112_v8 }
 0x27f   :  { %v874_v56 = vpack.c.bf16 %v832_v47, %v831_v46  ;;  %v550_v10 = vpack.c.bf16 %v518_v7, %v517_v27 }
 0x281   :  { %1068 = vmatmul.bf16.gmra.mxu2 %v874_v56  ;;  %v4104_v56 = vld [vmem:[#allocation6 + $0x98] sm:$0xff] }
 0x282   :  { %v739_v59 = vpop.f32.mrf.mxu1  ;;  %1294 = vmatpush.bf16.msrb.mxu3 %v4104_v56  ;;  %v4110_v56 = vld [vmem:[#allocation6 + $0xc8] sm:$0xff] }
 0x283   :  { %v740_v63 = vadd.f32 %v4813_v62, %v739_v59 }
 0x285   :  { %778 = vmatmul.bf16.gmra.mxu3 %v549_v60  ;;  %v833_v4 = vmax.f32 %v740_v63, 0.0 }
 0x28a   :  { %v741_v1 = vpop.f32.mrf.mxu1 }
 0x28b   :  { %v742_v3 = vadd.f32 %v4813_v62, %v741_v1 }
 0x28d   :  { %v834_v37 = vmax.f32 %v742_v3, 0.0  ;;  %v4123_v3 = vld [vmem:[#allocation6 + $0x130] sm:$0xff] }
 0x28e   :  { %1961 = vmatpush.bf16.msrb.mxu1 %v4123_v3 }
 0x28f   :  { %v875_v9 = vpack.c.bf16 %v834_v37, %v833_v4  ;;  %v4103_v4 = vld [vmem:[#allocation6 + $0x90] sm:$0xff] }
 0x290   :  { %1295 = vmatpush.bf16.msrb.mxu3 %v4103_v4 }
 0x291   :  { %1073 = vmatmul.bf16.gmra.mxu2 %v875_v9 }
 0x292   :  { %v744_v33 = vpop.f32.mrf.mxu1 }
 0x293   :  { %v745_v13 = vadd.f32 %v4813_v62, %v744_v33 }
 0x295   :  { %783 = vmatmul.bf16.gmra.mxu3 %v550_v10  ;;  %v835_v38 = vmax.f32 %v745_v13, 0.0  ;;  %v4102_v13 = vld [vmem:[#allocation6 + $0x88] sm:$0xff] }
 0x296   :  { %1296 = vmatpush.bf16.msrb.mxu3 %v4102_v13 }
 0x29a   :  { %v746_v14 = vpop.f32.mrf.mxu1 }
 0x29b   :  { %v747_v15 = vadd.f32 %v4813_v62, %v746_v14 }
 0x29d   :  { %v836_v5 = vmax.f32 %v747_v15, 0.0 }
 0x29f   :  { %v876_v17 = vpack.c.bf16 %v836_v5, %v835_v38 }
 0x2a1   :  { %1078 = vmatmul.bf16.gmra.mxu2 %v876_v17 }
 0x2a8   :  { %v749_v19 = vpop.f32.mrf.mxu3 }
 0x2a9   :  { %v750_v21 = vadd.f32 %v4813_v62, %v749_v19 }
 0x2ab   :  { %v837_v24 = vmax.f32 %v750_v21, 0.0  ;;  %v4101_v21 = vld [vmem:[#allocation6 + $0x80] sm:$0xff] }
 0x2ac   :  { %1297 = vmatpush.bf16.msrb.mxu3 %v4101_v21 }
 0x2b0   :  { %v751_v22 = vpop.f32.mrf.mxu3 }
 0x2b1   :  { %v752_v23 = vadd.f32 %v4813_v62, %v751_v22 }
 0x2b3   :  { %v838_v48 = vmax.f32 %v752_v23, 0.0  ;;  %v4111_v23 = vld [vmem:[#allocation6 + $0xd0] sm:$0xff] }
 0x2b4   :  { %1630 = vmatpush.bf16.msrb.mxu0 %v4111_v23 }
 0x2b5   :  { %v877_v26 = vpack.c.bf16 %v838_v48, %v837_v24  ;;  %v4122_v24 = vld [vmem:[#allocation6 + $0x128] sm:$0xff] }
 0x2b6   :  { %1962 = vmatpush.bf16.msrb.mxu1 %v4122_v24 }
 0x2b7   :  { %1083 = vmatmul.bf16.vlgmr.msra.gmra.mxu3 %v877_v26 }
 0x2b8   :  { %v754_v51 = vpop.f32.mrf.mxu3  ;;  %1631 = vmatpush.bf16.msrb.mxu0 %v4110_v56 }
 0x2b9   :  { %v755_v30 = vadd.f32 %v4813_v62, %v754_v51 }
 0x2bb   :  { %v839_v52 = vmax.f32 %v755_v30, 0.0 }
 0x2c0   :  { %v756_v32 = vpop.f32.mrf.mxu3 }
 0x2c1   :  { %v757_v34 = vadd.f32 %v4813_v62, %v756_v32 }
 0x2c3   :  { %v840_v39 = vmax.f32 %v757_v34, 0.0 }
 0x2c5   :  { %v878_v40 = vpack.c.bf16 %v840_v39, %v839_v52 }
 0x2c7   :  { %1088 = vmatmul.bf16.gmra.mxu3 %v878_v40 }
 0x2c8   :  { %v759_v44 = vpop.f32.mrf.mxu3 }
 0x2c9   :  { %v760_v45 = vadd.f32 %v4813_v62, %v759_v44 }
 0x2cb   :  { %v841_v50 = vmax.f32 %v760_v45, 0.0  ;;  %v4132_v45 = vld [vmem:[#allocation6 + $0x178] sm:$0xff] }
 0x2cc   :  { %2295 = vmatpush.bf16.msrb.mxu2 %v4132_v45 }
 0x2d0   :  { %v761_v46 = vpop.f32.mrf.mxu3 }
 0x2d1   :  { %v762_v47 = vadd.f32 %v4813_v62, %v761_v46 }
 0x2d3   :  { %v842_v54 = vmax.f32 %v762_v47, 0.0 }
 0x2d5   :  { %v879_v55 = vpack.c.bf16 %v842_v54, %v841_v50 }
 0x2d7   :  { %1093 = vmatmul.bf16.gmra.mxu3 %v879_v55 }
 0x2d8   :  { %v764_v57 = vpop.f32.mrf.mxu3 }
 0x2d9   :  { %v765_v59 = vadd.f32 %v4813_v62, %v764_v57  ;;  %v4121_v57 = vld [vmem:[#allocation6 + $0x120] sm:$0xff] }
 0x2da   :  { %1963 = vmatpush.bf16.msrb.mxu1 %v4121_v57  ;;  %v4878_v57 = vld [vmem:[#allocation7 + $0x3] ss:$0 sm:$0xff] }
 0x2db   :  { %v843_v63 = vmax.f32 %v765_v59, 0.0 }
 0x2e0   :  { %v766_v60 = vpop.f32.mrf.mxu3 }
 0x2e1   :  { %v767_v61 = vadd.f32 %v4813_v62, %v766_v60 }
 0x2e3   :  { %v844_v1 = vmax.f32 %v767_v61, 0.0 }
 0x2e5   :  { %v880_v2 = vpack.c.bf16 %v844_v1, %v843_v63 }
 0x2e7   :  { %1098 = vmatmul.bf16.gmra.mxu3 %v880_v2 }
 0x2e8   :  { %v769_v37 = vpop.f32.mrf.mxu3 }
 0x2e9   :  { %v770_v27 = vadd.f32 %v4813_v62, %v769_v37 }
 0x2eb   :  { %v845_v33 = vmax.f32 %v770_v27, 0.0 }
 0x2f0   :  { %v771_v7 = vpop.f32.mrf.mxu3 }
 0x2f1   :  { %v772_v9 = vadd.f32 %v4813_v62, %v771_v7 }
 0x2f3   :  { %v846_v10 = vmax.f32 %v772_v9, 0.0 }
 0x2f5   :  { %v881_v36 = vpack.c.bf16 %v846_v10, %v845_v33  ;;  %v4131_v33 = vld [vmem:[#allocation6 + $0x170] sm:$0xff] }
 0x2f6   :  { %2296 = vmatpush.bf16.msrb.mxu2 %v4131_v33  ;;  %v4118_v33 = vld [vmem:[#allocation6 + $0x108] sm:$0xff] }
 0x2f7   :  { %1103 = vmatmul.bf16.gmra.mxu3 %v881_v36 }
 0x2f8   :  { %v774_v14 = vpop.f32.mrf.mxu3 }
 0x2f9   :  { %v775_v15 = vadd.f32 %v4813_v62, %v774_v14 }
 0x2fb   :  { %v847_v17 = vmax.f32 %v775_v15, 0.0  ;;  %v4120_v15 = vld [vmem:[#allocation6 + $0x118] sm:$0xff] }
 0x2fc   :  { %1964 = vmatpush.bf16.msrb.mxu1 %v4120_v15 }
 0x300   :  { %v776_v38 = vpop.f32.mrf.mxu3 }
 0x301   :  { %v777_v5 = vadd.f32 %v4813_v62, %v776_v38  ;;  %v4109_v38 = vld [vmem:[#allocation6 + $0xc0] sm:$0xff] }
 0x302   :  { %1632 = vmatpush.bf16.msrb.mxu0 %v4109_v38 }
 0x303   :  { %v848_v18 = vmax.f32 %v777_v5, 0.0 }
 0x305   :  { %v882_v19 = vpack.c.bf16 %v848_v18, %v847_v17 }
 0x307   :  { %1108 = vmatmul.bf16.gmra.mxu3 %v882_v19 }
 0x308   :  { %v779_v20 = vpop.f32.mrf.mxu3 }
 0x309   :  { %v780_v22 = vadd.f32 %v4813_v62, %v779_v20 }
 0x30b   :  { %v849_v28 = vmax.f32 %v780_v22, 0.0 }
 0x310   :  { %v781_v48 = vpop.f32.mrf.mxu3 }
 0x311   :  { %v782_v26 = vadd.f32 %v4813_v62, %v781_v48 }
 0x313   :  { %v850_v29 = vmax.f32 %v782_v26, 0.0 }
 0x315   :  { %v883_v51 = vpack.c.bf16 %v850_v29, %v849_v28 }
 0x317   :  { %1113 = vmatmul.bf16.gmra.mxu3 %v883_v51 }
 0x318   :  { %v784_v30 = vpop.f32.mrf.mxu3 }
 0x319   :  { %v785_v32 = vadd.f32 %v4813_v62, %v784_v30  ;;  %v4130_v30 = vld [vmem:[#allocation6 + $0x168] sm:$0xff] }
 0x31a   :  { %2297 = vmatpush.bf16.msrb.mxu2 %v4130_v30 }
 0x31b   :  { %v851_v39 = vmax.f32 %v785_v32, 0.0 }
 0x320   :  { %v786_v34 = vpop.f32.mrf.mxu3 }
 0x321   :  { %v787_v52 = vadd.f32 %v4813_v62, %v786_v34 }
 0x323   :  { %v852_v40 = vmax.f32 %v787_v52, 0.0 }
 0x325   :  { %v884_v41 = vpack.c.bf16 %v852_v40, %v851_v39  ;;  %v4119_v40 = vld [vmem:[#allocation6 + $0x110] sm:$0xff] }
 0x326   :  { %1965 = vmatpush.bf16.msrb.mxu1 %v4119_v40 }
 0x327   :  { %1118 = vmatmul.bf16.gmra.mxu3 %v884_v41 }
 0x32a   :  { %1966 = vmatpush.bf16.msrb.mxu1 %v4118_v33 }
 0x337   :  { %1298 = vmatmul.bf16.vlgmr.msrb.gmra.mxu3 %v4715_v16 }
 0x33a   :  { %v1084_v44 = vpop.f32.mrf.mxu3 }
 0x33b   :  { %v1085_v46 = vadd.f32 %v4706_v0, %v1084_v44 }
 0x33d   :  { %v1172_v54 = vmax.f32 %v1085_v46, 0.0 }
 0x342   :  { %v1086_v47 = vpop.f32.mrf.mxu3 }
 0x343   :  { %v1087_v50 = vadd.f32 %v4706_v0, %v1086_v47  ;;  %v1024_v47 = vpop.f32.mrf.mxu2 }
 0x345   :  { %v1173_v55 = vmax.f32 %v1087_v50, 0.0 }
 0x347   :  { %1303 = vmatmul.bf16.gmra.mxu3 %v4724_v43  ;;  %v4841_v62 = vpack.c.bf16 %v1173_v55, %v1172_v54 }
 0x34a   :  { %v1089_v59 = vpop.f32.mrf.mxu3 }
 0x34b   :  { %v1090_v16 = vadd.f32 %v4706_v0, %v1089_v59 }
 0x34d   :  { %v1174_v63 = vmax.f32 %v1090_v16, 0.0 }
 0x352   :  { %v1091_v60 = vpop.f32.mrf.mxu3 }
 0x353   :  { %v1092_v61 = vadd.f32 %v4706_v0, %v1091_v60 }
 0x355   :  { %v1175_v1 = vmax.f32 %v1092_v61, 0.0 }
 0x357   :  { %1308 = vmatmul.bf16.gmra.mxu3 %v4733_v6  ;;  %v4846_v8 = vpack.c.bf16 %v1175_v1, %v1174_v63 }
 0x35a   :  { %v1094_v2 = vpop.f32.mrf.mxu3 }
 0x35b   :  { %v1095_v3 = vadd.f32 %v4706_v0, %v1094_v2 }
 0x35d   :  { %v1176_v37 = vmax.f32 %v1095_v3, 0.0 }
 0x362   :  { %v1096_v43 = vpop.f32.mrf.mxu3 }
 0x363   :  { %v1097_v4 = vadd.f32 %v4706_v0, %v1096_v43 }
 0x365   :  { %v1177_v27 = vmax.f32 %v1097_v4, 0.0 }
 0x367   :  { %1313 = vmatmul.bf16.gmra.mxu3 %v4741_v25  ;;  %v4851_v7 = vpack.c.bf16 %v1177_v27, %v1176_v37 }
 0x36a   :  { %v1099_v9 = vpop.f32.mrf.mxu3 }
 0x36b   :  { %v1100_v10 = vadd.f32 %v4706_v0, %v1099_v9 }
 0x36d   :  { %v1178_v13 = vmax.f32 %v1100_v10, 0.0 }
 0x372   :  { %v1101_v6 = vpop.f32.mrf.mxu3 }
 0x373   :  { %v1102_v36 = vadd.f32 %v4706_v0, %v1101_v6 }
 0x375   :  { %v1179_v14 = vmax.f32 %v1102_v36, 0.0 }
 0x377   :  { %1318 = vmatmul.bf16.gmra.mxu3 %v4749_v53  ;;  %v4856_v5 = vpack.c.bf16 %v1179_v14, %v1178_v13 }
 0x37a   :  { %v1104_v25 = vpop.f32.mrf.mxu3 }
 0x37b   :  { %v1105_v17 = vadd.f32 %v4706_v0, %v1104_v25 }
 0x37d   :  { %v1180_v21 = vmax.f32 %v1105_v17, 0.0 }
 0x382   :  { %v1106_v18 = vpop.f32.mrf.mxu3 }
 0x383   :  { %v1107_v19 = vadd.f32 %v4706_v0, %v1106_v18 }
 0x385   :  { %v1181_v20 = vmax.f32 %v1107_v19, 0.0  ;;  %v4889_v19 = vld [vmem:[#allocation7 + $0x2] ss:$0 sm:$0xff] }
 0x387   :  { %1323 = vmatmul.bf16.gmra.mxu3 %v4757_v12  ;;  %v4861_v22 = vpack.c.bf16 %v1181_v20, %v1180_v21  ;;  %v1025_v21 = vadd.f32 %v4889_v19, %v1024_v47 }
 0x38a   :  { %v1109_v23 = vpop.f32.mrf.mxu3 }
 0x38b   :  { %v1110_v53 = vadd.f32 %v4706_v0, %v1109_v23 }
 0x38d   :  { %v1182_v26 = vmax.f32 %v1110_v53, 0.0 }
 0x392   :  { %v1111_v24 = vpop.f32.mrf.mxu3 }
 0x393   :  { %v1112_v48 = vadd.f32 %v4706_v0, %v1111_v24 }
 0x395   :  { %v1183_v28 = vmax.f32 %v1112_v48, 0.0  ;;  %v1148_v48 = vmax.f32 %v1025_v21, 0.0 }
 0x397   :  { %1328 = vmatmul.bf16.gmra.mxu3 %v4765_v35  ;;  %v4866_v29 = vpack.c.bf16 %v1183_v28, %v1182_v26 }
 0x39a   :  { %v1114_v51 = vpop.f32.mrf.mxu3 }
 0x39b   :  { %v1115_v32 = vadd.f32 %v4706_v0, %v1114_v51 }
 0x39d   :  { %v1184_v52 = vmax.f32 %v1115_v32, 0.0 }
 0x3a2   :  { %v1116_v12 = vpop.f32.mrf.mxu3 }
 0x3a3   :  { %v1117_v34 = vadd.f32 %v4706_v0, %v1116_v12 }
 0x3a5   :  { %v1185_v39 = vmax.f32 %v1117_v34, 0.0 }
 0x3a7   :  { %1333 = vmatmul.bf16.gmra.mxu3 %v4773_v58  ;;  %v4871_v41 = vpack.c.bf16 %v1185_v39, %v1184_v52  ;;  %v1026_v58 = vpop.f32.mrf.mxu2  ;;  %v4128_v52 = vld [vmem:[#allocation6 + $0x158] sm:$0xff] }
 0x3aa   :  { %v1119_v44 = vpop.f32.mrf.mxu3 }
 0x3ab   :  { %v1120_v35 = vadd.f32 %v4706_v0, %v1119_v44 }
 0x3ad   :  { %v1186_v50 = vmax.f32 %v1120_v35, 0.0 }
 0x3b2   :  { %v1121_v45 = vpop.f32.mrf.mxu3 }
 0x3b3   :  { %v1122_v46 = vadd.f32 %v4706_v0, %v1121_v45  ;;  %v1029_v0 = vpop.f32.mrf.mxu2 }
 0x3b4   :  { %v1030_v39 = vadd.f32 %v4889_v19, %v1029_v0 }
 0x3b5   :  { %v1187_v54 = vmax.f32 %v1122_v46, 0.0 }
 0x3b6   :  { %v1150_v45 = vmax.f32 %v1030_v39, 0.0 }
 0x3b7   :  { %1338 = vmatmul.bf16.gmra.mxu3 %v4783_v42  ;;  %v4876_v55 = vpack.c.bf16 %v1187_v54, %v1186_v50  ;;  %v4129_v42 = vld [vmem:[#allocation6 + $0x160] sm:$0xff] }
 0x3b8   :  { %2298 = vmatpush.bf16.msrb.mxu2 %v4129_v42 }
 0x3ba   :  { %v1299_v56 = vpop.f32.mrf.mxu3 }
 0x3bb   :  { %v1300_v59 = vadd.f32 %v4878_v57, %v1299_v56  ;;  %v1031_v43 = vpop.f32.mrf.mxu2 }
 0x3bc   :  { %v1032_v34 = vadd.f32 %v4889_v19, %v1031_v43  ;;  %2299 = vmatpush.bf16.msrb.mxu2 %v4128_v52 }
 0x3bd   :  { %v1459_v61 = vmax.f32 %v1300_v59, 0.0 }
 0x3be   :  { %v1151_v40 = vmax.f32 %v1032_v34, 0.0 }
 0x3c0   :  { %v1201_v56 = vpack.c.bf16 %v1151_v40, %v1150_v45 }
 0x3c2   :  { %v1301_v16 = vpop.f32.mrf.mxu3 }
 0x3c3   :  { %v1302_v60 = vadd.f32 %v4878_v57, %v1301_v16  ;;  %v1034_v6 = vpop.f32.mrf.mxu2 }
 0x3c5   :  { %v1460_v63 = vmax.f32 %v1302_v60, 0.0 }
 0x3c7   :  { %v1523_v1 = vpack.c.bf16 %v1460_v63, %v1459_v61  ;;  %1343 = vmatmul.bf16.gmra.mxu3 %v4791_v49  ;;  %v1035_v63 = vadd.f32 %v4889_v19, %v1034_v6 }
 0x3c9   :  { %1633 = vmatmul.bf16.vlgmr.msrb.gmra.mxu0 %v1523_v1  ;;  %v1152_v42 = vmax.f32 %v1035_v63, 0.0 }
 0x3ca   :  { %v1304_v2 = vpop.f32.mrf.mxu3 }
 0x3cb   :  { %v1305_v3 = vadd.f32 %v4878_v57, %v1304_v2  ;;  %v1036_v25 = vpop.f32.mrf.mxu2 }
 0x3cc   :  { %v1037_v60 = vadd.f32 %v4889_v19, %v1036_v25 }
 0x3cd   :  { %v1461_v27 = vmax.f32 %v1305_v3, 0.0 }
 0x3ce   :  { %v1153_v1 = vmax.f32 %v1037_v60, 0.0 }
 0x3d2   :  { %v1306_v4 = vpop.f32.mrf.mxu3 }
 0x3d3   :  { %v1307_v37 = vadd.f32 %v4878_v57, %v1306_v4  ;;  %v1039_v20 = vpop.f32.mrf.mxu2 }
 0x3d5   :  { %v1462_v9 = vmax.f32 %v1307_v37, 0.0  ;;  %v1202_v37 = vpack.c.bf16 %v1153_v1, %v1152_v42 }
 0x3d7   :  { %1348 = vmatmul.bf16.gmra.mxu3 %v4799_v11  ;;  %v1524_v10 = vpack.c.bf16 %v1462_v9, %v1461_v27  ;;  %v1027_v11 = vadd.f32 %v4889_v19, %v1026_v58  ;;  %v4117_v58 = vld [vmem:[#allocation6 + $0x100] sm:$0xff] }
 0x3d8   :  { %1967 = vmatpush.bf16.msrb.mxu1 %v4117_v58 }
 0x3d9   :  { %1638 = vmatmul.bf16.gmra.mxu0 %v1524_v10  ;;  %v1149_v23 = vmax.f32 %v1027_v11, 0.0 }
 0x3da   :  { %v1309_v49 = vpop.f32.mrf.mxu3 }
 0x3db   :  { %v1310_v36 = vadd.f32 %v4878_v57, %v1309_v49  ;;  %v1041_v32 = vpop.f32.mrf.mxu2  ;;  %v1040_v49 = vadd.f32 %v4889_v19, %v1039_v20 }
 0x3dc   :  { %v1042_v10 = vadd.f32 %v4889_v19, %v1041_v32 }
 0x3dd   :  { %v1463_v15 = vmax.f32 %v1310_v36, 0.0 }
 0x3de   :  { %v1155_v6 = vmax.f32 %v1042_v10, 0.0 }
 0x3e2   :  { %v1311_v13 = vpop.f32.mrf.mxu3 }
 0x3e3   :  { %v1312_v14 = vadd.f32 %v4878_v57, %v1311_v13  ;;  %v1044_v47 = vpop.f32.mrf.mxu2 }
 0x3e4   :  { %v1045_v20 = vadd.f32 %v4889_v19, %v1044_v47 }
 0x3e5   :  { %v1464_v38 = vmax.f32 %v1312_v14, 0.0 }
 0x3e7   :  { %1353 = vmatmul.bf16.gmra.mxu3 %v4807_v31  ;;  %v1525_v17 = vpack.c.bf16 %v1464_v38, %v1463_v15  ;;  %v1200_v31 = vpack.c.bf16 %v1149_v23, %v1148_v48  ;;  %v1154_v15 = vmax.f32 %v1040_v49, 0.0 }
 0x3e9   :  { %1643 = vmatmul.bf16.gmra.mxu0 %v1525_v17 }
 0x3ea   :  { %v1314_v18 = vpop.f32.mrf.mxu3 }
 0x3eb   :  { %v1315_v53 = vadd.f32 %v4878_v57, %v1314_v18  ;;  %v1046_v61 = vpop.f32.mrf.mxu2  ;;  %v1203_v18 = vpack.c.bf16 %v1155_v6, %v1154_v15 }
 0x3ed   :  { %v1465_v28 = vmax.f32 %v1315_v53, 0.0  ;;  %v1047_v53 = vadd.f32 %v4889_v19, %v1046_v61  ;;  %v4915_v61 = vld [vmem:[#allocation7 + $0x4] ss:$0 sm:$0xff] }
 0x3f2   :  { %v1316_v24 = vpop.f32.mrf.mxu3 }
 0x3f3   :  { %v1317_v26 = vadd.f32 %v4878_v57, %v1316_v24  ;;  %v1049_v9 = vpop.f32.mrf.mxu2  ;;  %v1157_v24 = vmax.f32 %v1047_v53, 0.0 }
 0x3f5   :  { %v1466_v51 = vmax.f32 %v1317_v26, 0.0 }
 0x3f7   :  { %1358 = vmatmul.bf16.gmra.mxu3 %v1200_v31  ;;  %v1526_v30 = vpack.c.bf16 %v1466_v51, %v1465_v28  ;;  %v1156_v28 = vmax.f32 %v1045_v20, 0.0  ;;  %v4127_v31 = vld [vmem:[#allocation6 + $0x150] sm:$0xff] }
 0x3f8   :  { %2300 = vmatpush.bf16.msrb.mxu2 %v4127_v31 }
 0x3f9   :  { %1648 = vmatmul.bf16.gmra.mxu0 %v1526_v30 }
 0x3fa   :  { %v1319_v12 = vpop.f32.mrf.mxu3 }
 0x3fb   :  { %v1320_v44 = vadd.f32 %v4878_v57, %v1319_v12  ;;  %v1051_v13 = vpop.f32.mrf.mxu2  ;;  %v1204_v12 = vpack.c.bf16 %v1157_v24, %v1156_v28 }
 0x3fc   :  { %v1052_v40 = vadd.f32 %v4889_v19, %v1051_v13 }
 0x3fd   :  { %v1467_v50 = vmax.f32 %v1320_v44, 0.0  ;;  %v1050_v44 = vadd.f32 %v4889_v19, %v1049_v9 }
 0x3fe   :  { %v1159_v45 = vmax.f32 %v1052_v40, 0.0 }
 0x402   :  { %v1321_v35 = vpop.f32.mrf.mxu3 }
 0x403   :  { %v1322_v46 = vadd.f32 %v4878_v57, %v1321_v35  ;;  %v1054_v23 = vpop.f32.mrf.mxu2 }
 0x405   :  { %v1468_v54 = vmax.f32 %v1322_v46, 0.0 }
 0x407   :  { %1363 = vmatmul.bf16.gmra.mxu3 %v1201_v56  ;;  %v1527_v59 = vpack.c.bf16 %v1468_v54, %v1467_v50  ;;  %v1158_v50 = vmax.f32 %v1050_v44, 0.0 }
 0x409   :  { %1653 = vmatmul.bf16.gmra.mxu0 %v1527_v59  ;;  %v1205_v59 = vpack.c.bf16 %v1159_v45, %v1158_v50 }
 0x40a   :  { %v1324_v16 = vpop.f32.mrf.mxu3 }
 0x40b   :  { %v1325_v0 = vadd.f32 %v4878_v57, %v1324_v16  ;;  %v1056_v34 = vpop.f32.mrf.mxu2 }
 0x40d   :  { %v1469_v43 = vmax.f32 %v1325_v0, 0.0  ;;  %v1057_v0 = vadd.f32 %v4889_v19, %v1056_v34 }
 0x412   :  { %v1326_v2 = vpop.f32.mrf.mxu3 }
 0x413   :  { %v1327_v3 = vadd.f32 %v4878_v57, %v1326_v2  ;;  %v1059_v35 = vpop.f32.mrf.mxu2 }
 0x414   :  { %v1060_v53 = vadd.f32 %v4889_v19, %v1059_v35 }
 0x415   :  { %v1470_v4 = vmax.f32 %v1327_v3, 0.0  ;;  %v1055_v3 = vadd.f32 %v4889_v19, %v1054_v23 }
 0x417   :  { %1368 = vmatmul.bf16.gmra.mxu3 %v1202_v37  ;;  %v1528_v27 = vpack.c.bf16 %v1470_v4, %v1469_v43  ;;  %v1161_v4 = vmax.f32 %v1057_v0, 0.0  ;;  %v1160_v10 = vmax.f32 %v1055_v3, 0.0 }
 0x419   :  { %1658 = vmatmul.bf16.gmra.mxu0 %v1528_v27  ;;  %v1206_v15 = vpack.c.bf16 %v1161_v4, %v1160_v10 }
 0x41a   :  { %v1329_v33 = vpop.f32.mrf.mxu3 }
 0x41b   :  { %v1330_v36 = vadd.f32 %v4878_v57, %v1329_v33  ;;  %v1061_v63 = vpop.f32.mrf.mxu2 }
 0x41d   :  { %v1471_v25 = vmax.f32 %v1330_v36, 0.0 }
 0x422   :  { %v1331_v14 = vpop.f32.mrf.mxu3 }
 0x423   :  { %v1332_v38 = vadd.f32 %v4878_v57, %v1331_v14  ;;  %v1064_v36 = vpop.f32.mrf.mxu2 }
 0x425   :  { %v1472_v17 = vmax.f32 %v1332_v38, 0.0 }
 0x427   :  { %1373 = vmatmul.bf16.gmra.mxu3 %v1203_v18  ;;  %v1529_v11 = vpack.c.bf16 %v1472_v17, %v1471_v25  ;;  %v1062_v18 = vadd.f32 %v4889_v19, %v1061_v63 }
 0x429   :  { %1663 = vmatmul.bf16.gmra.mxu0 %v1529_v11  ;;  %v1163_v24 = vmax.f32 %v1062_v18, 0.0 }
 0x42a   :  { %v1334_v21 = vpop.f32.mrf.mxu3 }
 0x42b   :  { %v1335_v48 = vadd.f32 %v4878_v57, %v1334_v21  ;;  %v1066_v21 = vpop.f32.mrf.mxu2 }
 0x42d   :  { %v1473_v30 = vmax.f32 %v1335_v48, 0.0 }
 0x432   :  { %v1336_v26 = vpop.f32.mrf.mxu3 }
 0x433   :  { %v1337_v51 = vadd.f32 %v4878_v57, %v1336_v26  ;;  %v1069_v35 = vpop.f32.mrf.mxu2 }
 0x435   :  { %v1474_v32 = vmax.f32 %v1337_v51, 0.0  ;;  %v4126_v51 = vld [vmem:[#allocation6 + $0x148] sm:$0xff] }
 0x436   :  { %2301 = vmatpush.bf16.msrb.mxu2 %v4126_v51 }
 0x437   :  { %1378 = vmatmul.bf16.gmra.mxu3 %v1204_v12  ;;  %v1530_v52 = vpack.c.bf16 %v1474_v32, %v1473_v30  ;;  %v1162_v30 = vmax.f32 %v1060_v53, 0.0 }
 0x439   :  { %1668 = vmatmul.bf16.gmra.mxu0 %v1530_v52 }
 0x43a   :  { %v1339_v39 = vpop.f32.mrf.mxu3 }
 0x43b   :  { %v1340_v46 = vadd.f32 %v4878_v57, %v1339_v39  ;;  %v1207_v39 = vpack.c.bf16 %v1163_v24, %v1162_v30  ;;  %v1071_v63 = vpop.f32.mrf.mxu2 }
 0x43c   :  { %v1072_v10 = vadd.f32 %v4889_v19, %v1071_v63 }
 0x43d   :  { %v1475_v56 = vmax.f32 %v1340_v46, 0.0  ;;  %v1067_v46 = vadd.f32 %v4889_v19, %v1066_v21 }
 0x442   :  { %v1341_v47 = vpop.f32.mrf.mxu3 }
 0x443   :  { %v1342_v54 = vadd.f32 %v4878_v57, %v1341_v47 }
 0x445   :  { %v1476_v58 = vmax.f32 %v1342_v54, 0.0  ;;  %v1065_v54 = vadd.f32 %v4889_v19, %v1064_v36  ;;  %v1070_v36 = vadd.f32 %v4889_v19, %v1069_v35  ;;  %v4125_v35 = vld [vmem:[#allocation6 + $0x140] sm:$0xff] }
 0x446   :  { %v1634_v16 = vpop.f32.mrf.mxu0  ;;  %2302 = vmatpush.bf16.msrb.mxu2 %v4125_v35 }
 0x447   :  { %1383 = vmatmul.bf16.gmra.mxu3 %v1205_v59  ;;  %v1531_v60 = vpack.c.bf16 %v1476_v58, %v1475_v56  ;;  %v1635_v2 = vadd.f32 %v4915_v61, %v1634_v16  ;;  %v1165_v58 = vmax.f32 %v1067_v46, 0.0  ;;  %v1164_v0 = vmax.f32 %v1065_v54, 0.0 }
 0x448   :  { %v1166_v18 = vmax.f32 %v1070_v36, 0.0 }
 0x449   :  { %1673 = vmatmul.bf16.gmra.mxu0 %v1531_v60  ;;  %v1794_v37 = vmax.f32 %v1635_v2, 0.0  ;;  %v1208_v4 = vpack.c.bf16 %v1165_v58, %v1164_v0 }
 0x44a   :  { %v1344_v1 = vpop.f32.mrf.mxu3 }
 0x44b   :  { %v1345_v27 = vadd.f32 %v4878_v57, %v1344_v1 }
 0x44d   :  { %v1477_v13 = vmax.f32 %v1345_v27, 0.0 }
 0x44e   :  { %v1636_v42 = vpop.f32.mrf.mxu0 }
 0x44f   :  { %v1637_v43 = vadd.f32 %v4915_v61, %v1636_v42 }
 0x451   :  { %v1795_v9 = vmax.f32 %v1637_v43, 0.0 }
 0x452   :  { %v1346_v33 = vpop.f32.mrf.mxu3 }
 0x453   :  { %v1858_v49 = vpack.c.bf16 %v1795_v9, %v1794_v37  ;;  %v1347_v6 = vadd.f32 %v4878_v57, %v1346_v33  ;;  %v1074_v33 = vpop.f32.mrf.mxu2 }
 0x455   :  { %v1478_v14 = vmax.f32 %v1347_v6, 0.0  ;;  %1968 = vmatmul.bf16.vlgmr.msrb.gmra.mxu1 %v1858_v49 }
 0x456   :  { %v1639_v38 = vpop.f32.mrf.mxu0 }
 0x457   :  { %1388 = vmatmul.bf16.gmra.mxu3 %v1206_v15  ;;  %v1532_v25 = vpack.c.bf16 %v1478_v14, %v1477_v13  ;;  %v1640_v11 = vadd.f32 %v4915_v61, %v1639_v38  ;;  %v1167_v14 = vmax.f32 %v1072_v10, 0.0 }
 0x459   :  { %1678 = vmatmul.bf16.gmra.mxu0 %v1532_v25  ;;  %v1796_v48 = vmax.f32 %v1640_v11, 0.0 }
 0x45a   :  { %v1349_v17 = vpop.f32.mrf.mxu3 }
 0x45b   :  { %v1350_v26 = vadd.f32 %v4878_v57, %v1349_v17  ;;  %v1076_v24 = vpop.f32.mrf.mxu2 }
 0x45c   :  { %v1077_v51 = vadd.f32 %v4889_v19, %v1076_v24 }
 0x45d   :  { %v1479_v34 = vmax.f32 %v1350_v26, 0.0 }
 0x45e   :  { %v1641_v23 = vpop.f32.mrf.mxu0 }
 0x45f   :  { %v1642_v20 = vadd.f32 %v4915_v61, %v1641_v23 }
 0x461   :  { %v1797_v28 = vmax.f32 %v1642_v20, 0.0  ;;  %v1209_v20 = vpack.c.bf16 %v1167_v14, %v1166_v18 }
 0x462   :  { %v1351_v31 = vpop.f32.mrf.mxu3 }
 0x463   :  { %v1352_v32 = vadd.f32 %v4878_v57, %v1351_v31  ;;  %v1859_v12 = vpack.c.bf16 %v1797_v28, %v1796_v48 }
 0x465   :  { %v1480_v52 = vmax.f32 %v1352_v32, 0.0  ;;  %1973 = vmatmul.bf16.gmra.mxu1 %v1859_v12  ;;  %v1075_v32 = vadd.f32 %v4889_v19, %v1074_v33 }
 0x466   :  { %v1644_v40 = vpop.f32.mrf.mxu0 }
 0x467   :  { %1393 = vmatmul.bf16.gmra.mxu3 %v1207_v39  ;;  %v1533_v44 = vpack.c.bf16 %v1480_v52, %v1479_v34  ;;  %v1645_v47 = vadd.f32 %v4915_v61, %v1644_v40  ;;  %v1079_v34 = vpop.f32.mrf.mxu2  ;;  %v1169_v52 = vmax.f32 %v1077_v51, 0.0  ;;  %v1168_v46 = vmax.f32 %v1075_v32, 0.0 }
 0x469   :  { %1683 = vmatmul.bf16.gmra.mxu0 %v1533_v44  ;;  %v1798_v59 = vmax.f32 %v1645_v47, 0.0  ;;  %v1210_v58 = vpack.c.bf16 %v1169_v52, %v1168_v46 }
 0x46a   :  { %v1354_v45 = vpop.f32.mrf.mxu3 }
 0x46b   :  { %v1355_v16 = vadd.f32 %v4878_v57, %v1354_v45 }
 0x46d   :  { %v1481_v3 = vmax.f32 %v1355_v16, 0.0 }
 0x46e   :  { %v1646_v50 = vpop.f32.mrf.mxu0 }
 0x46f   :  { %v1647_v56 = vadd.f32 %v4915_v61, %v1646_v50 }
 0x471   :  { %v1799_v60 = vmax.f32 %v1647_v56, 0.0 }
 0x472   :  { %v1356_v1 = vpop.f32.mrf.mxu3 }
 0x473   :  { %v1357_v2 = vadd.f32 %v4878_v57, %v1356_v1  ;;  %v1860_v42 = vpack.c.bf16 %v1799_v60, %v1798_v59  ;;  %v1081_v60 = vpop.f32.mrf.mxu2 }
 0x474   :  { %v1082_v1 = vadd.f32 %v4889_v19, %v1081_v60 }
 0x475   :  { %v1482_v43 = vmax.f32 %v1357_v2, 0.0  ;;  %1978 = vmatmul.bf16.gmra.mxu1 %v1860_v42  ;;  %v1080_v42 = vadd.f32 %v4889_v19, %v1079_v34 }
 0x476   :  { %v1649_v37 = vpop.f32.mrf.mxu0 }
 0x477   :  { %1398 = vmatmul.bf16.gmra.mxu3 %v1208_v4  ;;  %v1534_v27 = vpack.c.bf16 %v1482_v43, %v1481_v3  ;;  %v1650_v49 = vadd.f32 %v4915_v61, %v1649_v37  ;;  %v1171_v43 = vmax.f32 %v1082_v1, 0.0  ;;  %v1170_v33 = vmax.f32 %v1080_v42, 0.0 }
 0x479   :  { %1688 = vmatmul.bf16.gmra.mxu0 %v1534_v27  ;;  %v1800_v15 = vmax.f32 %v1650_v49, 0.0 }
 0x47a   :  { %v1359_v9 = vpop.f32.mrf.mxu3 }
 0x47b   :  { %v1360_v38 = vadd.f32 %v4878_v57, %v1359_v9 }
 0x47d   :  { %v1483_v23 = vmax.f32 %v1360_v38, 0.0 }
 0x47e   :  { %v1651_v6 = vpop.f32.mrf.mxu0 }
 0x47f   :  { %v1652_v13 = vadd.f32 %v4915_v61, %v1651_v6 }
 0x481   :  { %v1801_v25 = vmax.f32 %v1652_v13, 0.0  ;;  %v1211_v13 = vpack.c.bf16 %v1171_v43, %v1170_v33 }
 0x482   :  { %v1361_v17 = vpop.f32.mrf.mxu3 }
 0x483   :  { %v1362_v11 = vadd.f32 %v4878_v57, %v1361_v17  ;;  %v1861_v21 = vpack.c.bf16 %v1801_v25, %v1800_v15 }
 0x485   :  { %v1484_v53 = vmax.f32 %v1362_v11, 0.0  ;;  %1983 = vmatmul.bf16.gmra.mxu1 %v1861_v21 }
 0x486   :  { %v1654_v48 = vpop.f32.mrf.mxu0 }
 0x487   :  { %1403 = vmatmul.bf16.gmra.mxu3 %v1209_v20  ;;  %v1535_v26 = vpack.c.bf16 %v1484_v53, %v1483_v23  ;;  %v1655_v31 = vadd.f32 %v4915_v61, %v1654_v48 }
 0x489   :  { %1693 = vmatmul.bf16.gmra.mxu0 %v1535_v26  ;;  %v1802_v39 = vmax.f32 %v1655_v31, 0.0 }
 0x48a   :  { %v1364_v28 = vpop.f32.mrf.mxu3 }
 0x48b   :  { %v1365_v40 = vadd.f32 %v4878_v57, %v1364_v28 }
 0x48d   :  { %v1485_v54 = vmax.f32 %v1365_v40, 0.0 }
 0x48e   :  { %v1656_v30 = vpop.f32.mrf.mxu0 }
 0x48f   :  { %v1657_v12 = vadd.f32 %v4915_v61, %v1656_v30 }
 0x491   :  { %v1803_v44 = vmax.f32 %v1657_v12, 0.0 }
 0x492   :  { %v1366_v45 = vpop.f32.mrf.mxu3 }
 0x493   :  { %v1367_v47 = vadd.f32 %v4878_v57, %v1366_v45  ;;  %v1862_v50 = vpack.c.bf16 %v1803_v44, %v1802_v39 }
 0x495   :  { %v1486_v56 = vmax.f32 %v1367_v47, 0.0  ;;  %1988 = vmatmul.bf16.gmra.mxu1 %v1862_v50 }
 0x496   :  { %v1659_v59 = vpop.f32.mrf.mxu0 }
 0x497   :  { %1408 = vmatmul.bf16.gmra.mxu3 %v1210_v58  ;;  %v1536_v16 = vpack.c.bf16 %v1486_v56, %v1485_v54  ;;  %v1660_v0 = vadd.f32 %v4915_v61, %v1659_v59 }
 0x499   :  { %1698 = vmatmul.bf16.gmra.mxu0 %v1536_v16  ;;  %v1804_v4 = vmax.f32 %v1660_v0, 0.0 }
 0x49a   :  { %v1369_v63 = vpop.f32.mrf.mxu3 }
 0x49b   :  { %v1370_v37 = vadd.f32 %v4878_v57, %v1369_v63 }
 0x49d   :  { %v1487_v6 = vmax.f32 %v1370_v37, 0.0 }
 0x49e   :  { %v1661_v2 = vpop.f32.mrf.mxu0 }
 0x49f   :  { %v1662_v3 = vadd.f32 %v4915_v61, %v1661_v2 }
 0x4a1   :  { %v1805_v27 = vmax.f32 %v1662_v3, 0.0 }
 0x4a2   :  { %v1371_v9 = vpop.f32.mrf.mxu3 }
 0x4a3   :  { %v1372_v10 = vadd.f32 %v4878_v57, %v1371_v9  ;;  %v1863_v49 = vpack.c.bf16 %v1805_v27, %v1804_v4 }
 0x4a5   :  { %v1488_v36 = vmax.f32 %v1372_v10, 0.0  ;;  %1993 = vmatmul.bf16.gmra.mxu1 %v1863_v49 }
 0x4a6   :  { %v1664_v14 = vpop.f32.mrf.mxu0 }
 0x4a7   :  { %1413 = vmatmul.bf16.gmra.mxu3 %v1211_v13  ;;  %v1537_v15 = vpack.c.bf16 %v1488_v36, %v1487_v6  ;;  %v1665_v38 = vadd.f32 %v4915_v61, %v1664_v14 }
 0x4a9   :  { %1703 = vmatmul.bf16.gmra.mxu0 %v1537_v15  ;;  %v1806_v18 = vmax.f32 %v1665_v38, 0.0 }
 0x4aa   :  { %v1374_v19 = vpop.f32.mrf.mxu3 }
 0x4ab   :  { %v1375_v11 = vadd.f32 %v4878_v57, %v1374_v19 }
 0x4ad   :  { %v1489_v24 = vmax.f32 %v1375_v11, 0.0 }
 0x4ae   :  { %v1666_v25 = vpop.f32.mrf.mxu0 }
 0x4af   :  { %v1667_v17 = vadd.f32 %v4915_v61, %v1666_v25 }
 0x4b1   :  { %v1807_v21 = vmax.f32 %v1667_v17, 0.0 }
 0x4b2   :  { %v1376_v23 = vpop.f32.mrf.mxu3 }
 0x4b3   :  { %v1377_v53 = vadd.f32 %v4878_v57, %v1376_v23  ;;  %v1864_v20 = vpack.c.bf16 %v1807_v21, %v1806_v18 }
 0x4b5   :  { %v1490_v48 = vmax.f32 %v1377_v53, 0.0  ;;  %1998 = vmatmul.bf16.gmra.mxu1 %v1864_v20 }
 0x4b6   :  { %v1669_v26 = vpop.f32.mrf.mxu0 }
 0x4b7   :  { %1418 = vmatmul.bf16.gmra.mxu3 %v4841_v62  ;;  %v1538_v28 = vpack.c.bf16 %v1490_v48, %v1489_v24  ;;  %v1670_v31 = vadd.f32 %v4915_v61, %v1669_v26 }
 0x4b9   :  { %1708 = vmatmul.bf16.gmra.mxu0 %v1538_v28  ;;  %v1808_v12 = vmax.f32 %v1670_v31, 0.0 }
 0x4ba   :  { %v1379_v51 = vpop.f32.mrf.mxu3 }
 0x4bb   :  { %v1380_v34 = vadd.f32 %v4878_v57, %v1379_v51 }
 0x4bd   :  { %v1491_v35 = vmax.f32 %v1380_v34, 0.0 }
 0x4be   :  { %v1671_v30 = vpop.f32.mrf.mxu0 }
 0x4bf   :  { %v1672_v32 = vadd.f32 %v4915_v61, %v1671_v30 }
 0x4c1   :  { %v1809_v52 = vmax.f32 %v1672_v32, 0.0 }
 0x4c2   :  { %v1381_v39 = vpop.f32.mrf.mxu3 }
 0x4c3   :  { %v1382_v40 = vadd.f32 %v4878_v57, %v1381_v39  ;;  %v1865_v44 = vpack.c.bf16 %v1809_v52, %v1808_v12 }
 0x4c5   :  { %v1492_v45 = vmax.f32 %v1382_v40, 0.0  ;;  %2003 = vmatmul.bf16.gmra.mxu1 %v1865_v44 }
 0x4c6   :  { %v1674_v62 = vpop.f32.mrf.mxu0 }
 0x4c7   :  { %1423 = vmatmul.bf16.gmra.mxu3 %v4846_v8  ;;  %v1539_v46 = vpack.c.bf16 %v1492_v45, %v1491_v35  ;;  %v1675_v50 = vadd.f32 %v4915_v61, %v1674_v62  ;;  %v4967_v8 = vld [vmem:[#allocation7 + $0x5] ss:$0 sm:$0xff] }
 0x4c9   :  { %1713 = vmatmul.bf16.gmra.mxu0 %v1539_v46  ;;  %v1810_v58 = vmax.f32 %v1675_v50, 0.0 }
 0x4ca   :  { %v1384_v47 = vpop.f32.mrf.mxu3 }
 0x4cb   :  { %v1385_v59 = vadd.f32 %v4878_v57, %v1384_v47 }
 0x4cd   :  { %v1493_v2 = vmax.f32 %v1385_v59, 0.0 }
 0x4ce   :  { %v1676_v54 = vpop.f32.mrf.mxu0 }
 0x4cf   :  { %v1677_v56 = vadd.f32 %v4915_v61, %v1676_v54 }
 0x4d1   :  { %v1811_v16 = vmax.f32 %v1677_v56, 0.0 }
 0x4d2   :  { %v1386_v60 = vpop.f32.mrf.mxu3  ;;  %v1969_v63 = vpop.f32.mrf.mxu1 }
 0x4d3   :  { %v1387_v1 = vadd.f32 %v4878_v57, %v1386_v60  ;;  %v1866_v0 = vpack.c.bf16 %v1811_v16, %v1810_v58  ;;  %v1970_v4 = vadd.f32 %v4967_v8, %v1969_v63 }
 0x4d5   :  { %v1494_v42 = vmax.f32 %v1387_v1, 0.0  ;;  %2008 = vmatmul.bf16.gmra.mxu1 %v1866_v0  ;;  %v2129_v33 = vmax.f32 %v1970_v4, 0.0 }
 0x4d6   :  { %v1679_v3 = vpop.f32.mrf.mxu0 }
 0x4d7   :  { %1428 = vmatmul.bf16.gmra.mxu3 %v4851_v7  ;;  %v1540_v43 = vpack.c.bf16 %v1494_v42, %v1493_v2  ;;  %v1680_v10 = vadd.f32 %v4915_v61, %v1679_v3 }
 0x4d9   :  { %1718 = vmatmul.bf16.gmra.mxu0 %v1540_v43  ;;  %v1812_v14 = vmax.f32 %v1680_v10, 0.0 }
 0x4da   :  { %v1389_v37 = vpop.f32.mrf.mxu3  ;;  %v1971_v27 = vpop.f32.mrf.mxu1 }
 0x4db   :  { %v1972_v9 = vadd.f32 %v4967_v8, %v1971_v27  ;;  %v1390_v15 = vadd.f32 %v4878_v57, %v1389_v37 }
 0x4dd   :  { %v2130_v49 = vmax.f32 %v1972_v9, 0.0  ;;  %v1495_v18 = vmax.f32 %v1390_v15, 0.0 }
 0x4de   :  { %v1681_v6 = vpop.f32.mrf.mxu0 }
 0x4df   :  { %v2193_v36 = vpack.c.bf16 %v2130_v49, %v2129_v33  ;;  %v1682_v13 = vadd.f32 %v4915_v61, %v1681_v6 }
 0x4e1   :  { %v1813_v7 = vmax.f32 %v1682_v13, 0.0  ;;  %2303 = vmatmul.bf16.vlgmr.msrb.gmra.mxu2 %v2193_v36 }
 0x4e2   :  { %v1391_v19 = vpop.f32.mrf.mxu3  ;;  %v1974_v38 = vpop.f32.mrf.mxu1 }
 0x4e3   :  { %v1392_v25 = vadd.f32 %v4878_v57, %v1391_v19  ;;  %v1867_v17 = vpack.c.bf16 %v1813_v7, %v1812_v14  ;;  %v1975_v53 = vadd.f32 %v4967_v8, %v1974_v38 }
 0x4e5   :  { %v1496_v11 = vmax.f32 %v1392_v25, 0.0  ;;  %2013 = vmatmul.bf16.gmra.mxu1 %v1867_v17  ;;  %v2131_v26 = vmax.f32 %v1975_v53, 0.0 }
 0x4e6   :  { %v1684_v21 = vpop.f32.mrf.mxu0 }
 0x4e7   :  { %1433 = vmatmul.bf16.gmra.mxu3 %v4856_v5  ;;  %v1541_v23 = vpack.c.bf16 %v1496_v11, %v1495_v18  ;;  %v1685_v28 = vadd.f32 %v4915_v61, %v1684_v21 }
 0x4e9   :  { %1723 = vmatmul.bf16.gmra.mxu0 %v1541_v23  ;;  %v1814_v12 = vmax.f32 %v1685_v28, 0.0 }
 0x4ea   :  { %v1394_v20 = vpop.f32.mrf.mxu3  ;;  %v1976_v24 = vpop.f32.mrf.mxu1 }
 0x4eb   :  { %v1977_v48 = vadd.f32 %v4967_v8, %v1976_v24  ;;  %v1395_v34 = vadd.f32 %v4878_v57, %v1394_v20 }
 0x4ed   :  { %v2132_v51 = vmax.f32 %v1977_v48, 0.0  ;;  %v1497_v35 = vmax.f32 %v1395_v34, 0.0 }
 0x4ee   :  { %v1686_v31 = vpop.f32.mrf.mxu0 }
 0x4ef   :  { %v1687_v30 = vadd.f32 %v4915_v61, %v1686_v31  ;;  %v2194_v32 = vpack.c.bf16 %v2132_v51, %v2131_v26 }
 0x4f1   :  { %v1815_v5 = vmax.f32 %v1687_v30, 0.0  ;;  %2308 = vmatmul.bf16.gmra.mxu2 %v2194_v32 }
 0x4f2   :  { %v1396_v52 = vpop.f32.mrf.mxu3  ;;  %v1979_v39 = vpop.f32.mrf.mxu1 }
 0x4f3   :  { %v1397_v40 = vadd.f32 %v4878_v57, %v1396_v52  ;;  %v1868_v44 = vpack.c.bf16 %v1815_v5, %v1814_v12  ;;  %v1980_v47 = vadd.f32 %v4967_v8, %v1979_v39 }
 0x4f5   :  { %v1498_v45 = vmax.f32 %v1397_v40, 0.0  ;;  %2018 = vmatmul.bf16.gmra.mxu1 %v1868_v44  ;;  %v2133_v58 = vmax.f32 %v1980_v47, 0.0 }
 0x4f6   :  { %v1689_v62 = vpop.f32.mrf.mxu0 }
 0x4f7   :  { %1438 = vmatmul.bf16.gmra.mxu3 %v4861_v22  ;;  %v1542_v46 = vpack.c.bf16 %v1498_v45, %v1497_v35  ;;  %v1690_v59 = vadd.f32 %v4915_v61, %v1689_v62 }
 0x4f9   :  { %1728 = vmatmul.bf16.gmra.mxu0 %v1542_v46  ;;  %v1816_v0 = vmax.f32 %v1690_v59, 0.0 }
 0x4fa   :  { %v1399_v50 = vpop.f32.mrf.mxu3  ;;  %v1981_v54 = vpop.f32.mrf.mxu1 }
 0x4fb   :  { %v1982_v56 = vadd.f32 %v4967_v8, %v1981_v54  ;;  %v1400_v2 = vadd.f32 %v4878_v57, %v1399_v50 }
 0x4fd   :  { %v2134_v16 = vmax.f32 %v1982_v56, 0.0  ;;  %v1499_v37 = vmax.f32 %v1400_v2, 0.0 }
 0x4fe   :  { %v1691_v60 = vpop.f32.mrf.mxu0 }
 0x4ff   :  { %v1692_v63 = vadd.f32 %v4915_v61, %v1691_v60  ;;  %v2195_v1 = vpack.c.bf16 %v2134_v16, %v2133_v58 }
 0x501   :  { %v1817_v22 = vmax.f32 %v1692_v63, 0.0  ;;  %2313 = vmatmul.bf16.gmra.mxu2 %v2195_v1 }
 0x502   :  { %v1401_v42 = vpop.f32.mrf.mxu3  ;;  %v1984_v3 = vpop.f32.mrf.mxu1 }
 0x503   :  { %v1402_v43 = vadd.f32 %v4878_v57, %v1401_v42  ;;  %v1869_v4 = vpack.c.bf16 %v1817_v22, %v1816_v0  ;;  %v1985_v10 = vadd.f32 %v4967_v8, %v1984_v3 }
 0x505   :  { %v1500_v27 = vmax.f32 %v1402_v43, 0.0  ;;  %2023 = vmatmul.bf16.gmra.mxu1 %v1869_v4  ;;  %v2135_v13 = vmax.f32 %v1985_v10, 0.0 }
 0x506   :  { %v1694_v9 = vpop.f32.mrf.mxu0 }
 0x507   :  { %v1543_v33 = vpack.c.bf16 %v1500_v27, %v1499_v37  ;;  %1443 = vmatmul.bf16.gmra.mxu3 %v4866_v29  ;;  %v1695_v14 = vadd.f32 %v4915_v61, %v1694_v9 }
 0x509   :  { %1733 = vmatmul.bf16.gmra.mxu0 %v1543_v33  ;;  %v1818_v25 = vmax.f32 %v1695_v14, 0.0 }
 0x50a   :  { %v1404_v49 = vpop.f32.mrf.mxu3  ;;  %v1986_v6 = vpop.f32.mrf.mxu1 }
 0x50b   :  { %v1987_v36 = vadd.f32 %v4967_v8, %v1986_v6  ;;  %v1405_v17 = vadd.f32 %v4878_v57, %v1404_v49 }
 0x50d   :  { %v2136_v15 = vmax.f32 %v1987_v36, 0.0  ;;  %v1501_v53 = vmax.f32 %v1405_v17, 0.0 }
 0x50e   :  { %v1696_v7 = vpop.f32.mrf.mxu0 }
 0x50f   :  { %v1697_v19 = vadd.f32 %v4915_v61, %v1696_v7  ;;  %v2196_v38 = vpack.c.bf16 %v2136_v15, %v2135_v13 }
 0x511   :  { %v1819_v18 = vmax.f32 %v1697_v19, 0.0  ;;  %2318 = vmatmul.bf16.gmra.mxu2 %v2196_v38 }
 0x512   :  { %v1406_v29 = vpop.f32.mrf.mxu3  ;;  %v1989_v11 = vpop.f32.mrf.mxu1 }
 0x513   :  { %v1407_v21 = vadd.f32 %v4878_v57, %v1406_v29  ;;  %v1870_v23 = vpack.c.bf16 %v1819_v18, %v1818_v25  ;;  %v1990_v26 = vadd.f32 %v4967_v8, %v1989_v11 }
 0x515   :  { %v1502_v20 = vmax.f32 %v1407_v21, 0.0  ;;  %2028 = vmatmul.bf16.gmra.mxu1 %v1870_v23  ;;  %v2137_v30 = vmax.f32 %v1990_v26, 0.0 }
 0x516   :  { %v1699_v24 = vpop.f32.mrf.mxu0 }
 0x517   :  { %v1544_v48 = vpack.c.bf16 %v1502_v20, %v1501_v53  ;;  %1448 = vmatmul.bf16.gmra.mxu3 %v4871_v41  ;;  %v1700_v32 = vadd.f32 %v4915_v61, %v1699_v24 }
 0x519   :  { %1738 = vmatmul.bf16.gmra.mxu0 %v1544_v48  ;;  %v1820_v39 = vmax.f32 %v1700_v32, 0.0 }
 0x51a   :  { %v1409_v28 = vpop.f32.mrf.mxu3  ;;  %v1991_v51 = vpop.f32.mrf.mxu1 }
 0x51b   :  { %v1992_v31 = vadd.f32 %v4967_v8, %v1991_v51  ;;  %v1410_v40 = vadd.f32 %v4878_v57, %v1409_v28 }
 0x51d   :  { %v2138_v12 = vmax.f32 %v1992_v31, 0.0  ;;  %v1503_v46 = vmax.f32 %v1410_v40, 0.0 }
 0x51e   :  { %v1701_v34 = vpop.f32.mrf.mxu0 }
 0x51f   :  { %v1702_v5 = vadd.f32 %v4915_v61, %v1701_v34  ;;  %v2197_v52 = vpack.c.bf16 %v2138_v12, %v2137_v30 }
 0x521   :  { %v1821_v44 = vmax.f32 %v1702_v5, 0.0  ;;  %2323 = vmatmul.bf16.gmra.mxu2 %v2197_v52 }
 0x522   :  { %v1411_v41 = vpop.f32.mrf.mxu3  ;;  %v1994_v35 = vpop.f32.mrf.mxu1 }
 0x523   :  { %v1412_v45 = vadd.f32 %v4878_v57, %v1411_v41  ;;  %v1871_v62 = vpack.c.bf16 %v1821_v44, %v1820_v39  ;;  %v1995_v56 = vadd.f32 %v4967_v8, %v1994_v35  ;;  %v5021_v44 = vld [vmem:[#allocation7 + $0x3] ss:$0 sm:$0xff] }
 0x525   :  { %v1504_v47 = vmax.f32 %v1412_v45, 0.0  ;;  %2033 = vmatmul.bf16.gmra.mxu1 %v1871_v62  ;;  %v2139_v60 = vmax.f32 %v1995_v56, 0.0 }
 0x526   :  { %v1704_v50 = vpop.f32.mrf.mxu0 }
 0x527   :  { %v1545_v54 = vpack.c.bf16 %v1504_v47, %v1503_v46  ;;  %1453 = vmatmul.bf16.gmra.mxu3 %v4876_v55  ;;  %v1705_v63 = vadd.f32 %v4915_v61, %v1704_v50 }
 0x529   :  { %1743 = vmatmul.bf16.gmra.mxu0 %v1545_v54  ;;  %v1822_v42 = vmax.f32 %v1705_v63, 0.0 }
 0x52a   :  { %v1414_v58 = vpop.f32.mrf.mxu3  ;;  %v1996_v59 = vpop.f32.mrf.mxu1 }
 0x52b   :  { %v1997_v16 = vadd.f32 %v4967_v8, %v1996_v59  ;;  %v1415_v3 = vadd.f32 %v4878_v57, %v1414_v58 }
 0x52d   :  { %v2140_v1 = vmax.f32 %v1997_v16, 0.0  ;;  %v1505_v9 = vmax.f32 %v1415_v3, 0.0 }
 0x52e   :  { %v1706_v0 = vpop.f32.mrf.mxu0 }
 0x52f   :  { %v1707_v2 = vadd.f32 %v4915_v61, %v1706_v0  ;;  %v2198_v22 = vpack.c.bf16 %v2140_v1, %v2139_v60  ;;  %v4549_v1 = vmov 0  }
 0x530   :  { %4161 = vset.pattern.permute.xlu0 %v4549_v1  ;;  %4162 = vset.pattern.permute.xlu1 %v4549_v1 }
 0x531   :  { %v1823_v43 = vmax.f32 %v1707_v2, 0.0  ;;  %2328 = vmatmul.bf16.gmra.mxu2 %v2198_v22  ;;  %4163 = vset.pattern.permute.xlu2 %v4549_v1 }
 0x532   :  { %v1416_v55 = vpop.f32.mrf.mxu3  ;;  %v1999_v4 = vpop.f32.mrf.mxu1 }
 0x533   :  { %v1417_v37 = vadd.f32 %v4878_v57, %v1416_v55  ;;  %v1872_v27 = vpack.c.bf16 %v1823_v43, %v1822_v42  ;;  %v2000_v6 = vadd.f32 %v4967_v8, %v1999_v4 }
 0x535   :  { %v1506_v33 = vmax.f32 %v1417_v37, 0.0  ;;  %2038 = vmatmul.bf16.gmra.mxu1 %v1872_v27  ;;  %v2141_v15 = vmax.f32 %v2000_v6, 0.0  ;;  %v5030_v27 = vld [vmem:[#allocation7 + $0x6] ss:$0 sm:$0xff] }
 0x536   :  { %v1709_v10 = vpop.f32.mrf.mxu0 }
 0x537   :  { %v1546_v49 = vpack.c.bf16 %v1506_v33, %v1505_v9  ;;  %v1710_v7 = vadd.f32 %v4915_v61, %v1709_v10 }
 0x539   :  { %1748 = vmatmul.bf16.gmra.mxu0 %v1546_v49  ;;  %v1824_v18 = vmax.f32 %v1710_v7, 0.0 }
 0x53a   :  { %v1419_v36 = vpop.f32.mrf.mxu3  ;;  %v2001_v13 = vpop.f32.mrf.mxu1 }
 0x53b   :  { %v2002_v14 = vadd.f32 %v4967_v8, %v2001_v13  ;;  %v1420_v29 = vadd.f32 %v4878_v57, %v1419_v36 }
 0x53d   :  { %v2142_v19 = vmax.f32 %v2002_v14, 0.0  ;;  %v1507_v24 = vmax.f32 %v1420_v29, 0.0 }
 0x53e   :  { %v1711_v38 = vpop.f32.mrf.mxu0 }
 0x53f   :  { %v1712_v25 = vadd.f32 %v4915_v61, %v1711_v38  ;;  %v2199_v17 = vpack.c.bf16 %v2142_v19, %v2141_v15 }
 0x541   :  { %v1825_v11 = vmax.f32 %v1712_v25, 0.0  ;;  %2333 = vmatmul.bf16.gmra.mxu2 %v2199_v17 }
 0x542   :  { %v1421_v21 = vpop.f32.mrf.mxu3  ;;  %v2004_v23 = vpop.f32.mrf.mxu1 }
 0x543   :  { %v1422_v53 = vadd.f32 %v4878_v57, %v1421_v21  ;;  %v1873_v20 = vpack.c.bf16 %v1825_v11, %v1824_v18  ;;  %v2005_v51 = vadd.f32 %v4967_v8, %v2004_v23 }
 0x545   :  { %v1508_v48 = vmax.f32 %v1422_v53, 0.0  ;;  %2043 = vmatmul.bf16.gmra.mxu1 %v1873_v20  ;;  %v2143_v12 = vmax.f32 %v2005_v51, 0.0 }
 0x546   :  { %v1714_v26 = vpop.f32.mrf.mxu0 }
 0x547   :  { %v1547_v28 = vpack.c.bf16 %v1508_v48, %v1507_v24  ;;  %v1715_v34 = vadd.f32 %v4915_v61, %v1714_v26 }
 0x549   :  { %1753 = vmatmul.bf16.gmra.mxu0 %v1547_v28  ;;  %v1826_v40 = vmax.f32 %v1715_v34, 0.0 }
 0x54a   :  { %v1424_v31 = vpop.f32.mrf.mxu3  ;;  %v2006_v30 = vpop.f32.mrf.mxu1 }
 0x54b   :  { %v2007_v32 = vadd.f32 %v4967_v8, %v2006_v30  ;;  %v1425_v41 = vadd.f32 %v5021_v44, %v1424_v31 }
 0x54d   :  { %v2144_v5 = vmax.f32 %v2007_v32, 0.0  ;;  %v1509_v50 = vmax.f32 %v1425_v41, 0.0 }
 0x54e   :  { %v1716_v52 = vpop.f32.mrf.mxu0 }
 0x54f   :  { %v1717_v57 = vadd.f32 %v4915_v61, %v1716_v52  ;;  %v2200_v39 = vpack.c.bf16 %v2144_v5, %v2143_v12 }
 0x551   :  { %v1827_v35 = vmax.f32 %v1717_v57, 0.0  ;;  %2338 = vmatmul.bf16.gmra.mxu2 %v2200_v39 }
 0x552   :  { %v1426_v45 = vpop.f32.mrf.mxu3  ;;  %v2009_v62 = vpop.f32.mrf.mxu1 }
 0x553   :  { %v1427_v46 = vadd.f32 %v5021_v44, %v1426_v45  ;;  %v1874_v47 = vpack.c.bf16 %v1827_v35, %v1826_v40  ;;  %v2010_v59 = vadd.f32 %v4967_v8, %v2009_v62 }
 0x555   :  { %v1510_v54 = vmax.f32 %v1427_v46, 0.0  ;;  %2048 = vmatmul.bf16.gmra.mxu1 %v1874_v47  ;;  %v2145_v0 = vmax.f32 %v2010_v59, 0.0 }
 0x556   :  { %v1719_v56 = vpop.f32.mrf.mxu0 }
 0x557   :  { %v1548_v58 = vpack.c.bf16 %v1510_v54, %v1509_v50  ;;  %v1720_v2 = vadd.f32 %v4915_v61, %v1719_v56 }
 0x559   :  { %1758 = vmatmul.bf16.gmra.mxu0 %v1548_v58  ;;  %v1828_v55 = vmax.f32 %v1720_v2, 0.0 }
 0x55a   :  { %v1429_v16 = vpop.f32.mrf.mxu3  ;;  %v2011_v60 = vpop.f32.mrf.mxu1 }
 0x55b   :  { %v2012_v63 = vadd.f32 %v4967_v8, %v2011_v60  ;;  %v1430_v4 = vadd.f32 %v5021_v44, %v1429_v16 }
 0x55d   :  { %v2146_v22 = vmax.f32 %v2012_v63, 0.0  ;;  %v1511_v36 = vmax.f32 %v1430_v4, 0.0 }
 0x55e   :  { %v1721_v42 = vpop.f32.mrf.mxu0 }
 0x55f   :  { %v1722_v3 = vadd.f32 %v4915_v61, %v1721_v42  ;;  %v2201_v43 = vpack.c.bf16 %v2146_v22, %v2145_v0 }
 0x561   :  { %v1829_v37 = vmax.f32 %v1722_v3, 0.0  ;;  %2343 = vmatmul.bf16.gmra.mxu2 %v2201_v43 }
 0x562   :  { %v1431_v9 = vpop.f32.mrf.mxu3  ;;  %v2014_v33 = vpop.f32.mrf.mxu1 }
 0x563   :  { %v1432_v10 = vadd.f32 %v5021_v44, %v1431_v9  ;;  %v1875_v49 = vpack.c.bf16 %v1829_v37, %v1828_v55  ;;  %v2015_v38 = vadd.f32 %v4967_v8, %v2014_v33 }
 0x564   :  { %v2304_v6 = vpop.f32.mrf.mxu2 }
 0x565   :  { %v1512_v13 = vmax.f32 %v1432_v10, 0.0  ;;  %v2305_v14 = vadd.f32 %v5030_v27, %v2304_v6  ;;  %2053 = vmatmul.bf16.gmra.mxu1 %v1875_v49  ;;  %v2147_v21 = vmax.f32 %v2015_v38, 0.0 }
 0x566   :  { %v1724_v15 = vpop.f32.mrf.mxu0 }
 0x567   :  { %v1549_v7 = vpack.c.bf16 %v1512_v13, %v1511_v36  ;;  %v4020_v19 = vclamps-f32 %v2305_v14, 60.0  ;;  %v1725_v53 = vadd.f32 %v4915_v61, %v1724_v15 }
 0x569   :  { %v2592_v25 = vsub.f32 0.0, %v4020_v19  ;;  %1763 = vmatmul.bf16.gmra.mxu0 %v1549_v7  ;;  %v1830_v31 = vmax.f32 %v1725_v53, 0.0 }
 0x56a   :  { %v1434_v17 = vpop.f32.mrf.mxu3  ;;  %v2016_v18 = vpop.f32.mrf.mxu1 }
 0x56b   :  { %v2656_v29 = vmul.f32 1.442695, %v2592_v25  ;;  %v2017_v11 = vadd.f32 %v4967_v8, %v2016_v18  ;;  %v1435_v30 = vadd.f32 %v5021_v44, %v1434_v17 }
 0x56c   :  { %v2306_v23 = vpop.f32.mrf.mxu2 }
 0x56d   :  { %4171 = vpow2.f32 %v2656_v29  ;;  %v2148_v20 = vmax.f32 %v2017_v11, 0.0  ;;  %v2307_v24 = vadd.f32 %v5030_v27, %v2306_v23  ;;  %v1513_v45 = vmax.f32 %v1435_v30, 0.0 }
 0x56e   :  { %v1726_v48 = vpop.f32.mrf.mxu0 }
 0x56f   :  { %v4021_v26 = vclamps-f32 %v2307_v24, 60.0  ;;  %v1727_v28 = vadd.f32 %v4915_v61, %v1726_v48  ;;  %v2202_v51 = vpack.c.bf16 %v2148_v20, %v2147_v21 }
 0x571   :  { %v2593_v32 = vsub.f32 0.0, %v4021_v26  ;;  %v1831_v12 = vmax.f32 %v1727_v28, 0.0  ;;  %2348 = vmatmul.bf16.gmra.mxu2 %v2202_v51 }
 0x572   :  { %v1436_v34 = vpop.f32.mrf.mxu3  ;;  %v2019_v5 = vpop.f32.mrf.mxu1 }
 0x573   :  { %v4172_v52 = vpop.eup %4171  ;;  %v2658_v57 = vmul.f32 1.442695, %v2593_v32  ;;  %v1437_v39 = vadd.f32 %v5021_v44, %v1436_v34  ;;  %v1876_v40 = vpack.c.bf16 %v1831_v12, %v1830_v31  ;;  %v2020_v56 = vadd.f32 %v4967_v8, %v2019_v5 }
 0x574   :  { %v2784_v41 = vadd.f32 1.0, %v4172_v52  ;;  %v2309_v35 = vpop.f32.mrf.mxu2 }
 0x575   :  { %4173 = vpow2.f32 %v2658_v57  ;;  %v1514_v62 = vmax.f32 %v1437_v39, 0.0  ;;  %v2310_v46 = vadd.f32 %v5030_v27, %v2309_v35  ;;  %2058 = vmatmul.bf16.gmra.mxu1 %v1876_v40  ;;  %v2149_v22 = vmax.f32 %v2020_v56, 0.0  ;;  %v5052_v57 = vld [vmem:[#allocation7 + $0x4] ss:$0 sm:$0xff] }
 0x576   :  { %4175 = vrcp.f32 %v2784_v41  ;;  %v1729_v47 = vpop.f32.mrf.mxu0 }
 0x577   :  { %v1550_v50 = vpack.c.bf16 %v1514_v62, %v1513_v45  ;;  %v4022_v54 = vclamps-f32 %v2310_v46, 60.0  ;;  %v1730_v3 = vadd.f32 %v4915_v61, %v1729_v47 }
 0x579   :  { %v2594_v58 = vsub.f32 0.0, %v4022_v54  ;;  %1768 = vmatmul.bf16.gmra.mxu0 %v1550_v50  ;;  %v1832_v49 = vmax.f32 %v1730_v3, 0.0 }
 0x57a   :  { %v1439_v59 = vpop.f32.mrf.mxu3  ;;  %v2021_v16 = vpop.f32.mrf.mxu1 }
 0x57b   :  { %v4174_v60 = vpop.eup %4173  ;;  %v2660_v63 = vmul.f32 1.442695, %v2594_v58  ;;  %v2022_v1 = vadd.f32 %v4967_v8, %v2021_v16  ;;  %v1440_v6 = vadd.f32 %v5021_v44, %v1439_v59 }
 0x57c   :  { %v4176_v0 = vpop.eup %4175  ;;  %v2785_v2 = vadd.f32 1.0, %v4174_v60  ;;  %v2311_v42 = vpop.f32.mrf.mxu2 }
 0x57d   :  { %4177 = vpow2.f32 %v2660_v63  ;;  %v2150_v43 = vmax.f32 %v2022_v1, 0.0  ;;  %v2312_v55 = vadd.f32 %v5030_v27, %v2311_v42  ;;  %2981 = vperm.xlu0 %4161, %v4176_v0   ;;  %v2915_v37 = vsub.f32 1.0, %v4176_v0 }
 0x57e   :  { %4179 = vrcp.f32 %v2785_v2  ;;  %v1731_v4 = vpop.f32.mrf.mxu0  ;;  %v1515_v11 = vmax.f32 %v1440_v6, 0.0 }
 0x57f   :  { %v4023_v9 = vclamps-f32 %v2312_v55, 60.0  ;;  %v1732_v33 = vadd.f32 %v4915_v61, %v1731_v4  ;;  %v2203_v10 = vpack.c.bf16 %v2150_v43, %v2149_v22  ;;  %3301 = vperm.xlu1 %4162, %v2915_v37  }
 0x581   :  { %v2595_v36 = vsub.f32 0.0, %v4023_v9  ;;  %v1833_v13 = vmax.f32 %v1732_v33, 0.0  ;;  %2353 = vmatmul.bf16.gmra.mxu2 %v2203_v10 }
 0x582   :  { %v1441_v14 = vpop.f32.mrf.mxu3  ;;  %v2024_v15 = vpop.f32.mrf.mxu1 }
 0x583   :  { %v4178_v7 = vpop.eup %4177  ;;  %v2662_v19 = vmul.f32 1.442695, %v2595_v36  ;;  %v1442_v38 = vadd.f32 %v5021_v44, %v1441_v14  ;;  %v1877_v25 = vpack.c.bf16 %v1833_v13, %v1832_v49  ;;  %v2025_v48 = vadd.f32 %v4967_v8, %v2024_v15 }
 0x584   :  { %v4180_v17 = vpop.eup %4179  ;;  %v2786_v18 = vadd.f32 1.0, %v4178_v7  ;;  %v2314_v29 = vpop.f32.mrf.mxu2 }
 0x585   :  { %4181 = vpow2.f32 %v2662_v19  ;;  %v1516_v61 = vmax.f32 %v1442_v38, 0.0  ;;  %v2315_v21 = vadd.f32 %v5030_v27, %v2314_v29  ;;  %2063 = vmatmul.bf16.gmra.mxu1 %v1877_v25  ;;  %2986 = vperm.xlu0 %4161, %v4180_v17   ;;  %v2916_v53 = vsub.f32 1.0, %v4180_v17 }
 0x586   :  { %4183 = vrcp.f32 %v2786_v18  ;;  %v1734_v23 = vpop.f32.mrf.mxu0  ;;  %v2151_v5 = vmax.f32 %v2025_v48, 0.0 }
 0x587   :  { %v1551_v20 = vpack.c.bf16 %v1516_v61, %v1515_v11  ;;  %v4024_v24 = vclamps-f32 %v2315_v21, 60.0  ;;  %3306 = vperm.xlu2 %4163, %v2916_v53   ;;  %v1735_v39 = vadd.f32 %v5052_v57, %v1734_v23 }
 0x589   :  { %v2596_v26 = vsub.f32 0.0, %v4024_v24  ;;  %1773 = vmatmul.bf16.gmra.mxu0 %v1551_v20  ;;  %v1834_v50 = vmax.f32 %v1735_v39, 0.0 }
 0x58a   :  { %v1444_v28 = vpop.f32.mrf.mxu3  ;;  %v2026_v51 = vpop.f32.mrf.mxu1 }
 0x58b   :  { %v4182_v31 = vpop.eup %4181  ;;  %v2664_v30 = vmul.f32 1.442695, %v2596_v26  ;;  %v2027_v32 = vadd.f32 %v4967_v8, %v2026_v51  ;;  %v1445_v54 = vadd.f32 %v5021_v44, %v1444_v28 }
 0x58c   :  { %v4184_v12 = vpop.eup %4183  ;;  %v2787_v34 = vadd.f32 1.0, %v4182_v31  ;;  %v2316_v52 = vpop.f32.mrf.mxu2 }
 0x58d   :  { %4185 = vpow2.f32 %v2664_v30  ;;  %v2152_v40 = vmax.f32 %v2027_v32, 0.0  ;;  %v2317_v41 = vadd.f32 %v5030_v27, %v2316_v52  ;;  %2991 = vperm.xlu1 %4162, %v4184_v12   ;;  %v2917_v45 = vsub.f32 1.0, %v4184_v12 }
 0x58e   :  { %4187 = vrcp.f32 %v2787_v34  ;;  %v1736_v35 = vpop.f32.mrf.mxu0  ;;  %v1517_v3 = vmax.f32 %v1445_v54, 0.0 }
 0x58f   :  { %v4025_v62 = vclamps-f32 %v2317_v41, 60.0  ;;  %v1737_v46 = vadd.f32 %v5052_v57, %v1736_v35  ;;  %v2204_v47 = vpack.c.bf16 %v2152_v40, %v2151_v5  ;;  %3311 = vperm.xlu0 %4161, %v2917_v45  }
 0x591   :  { %v2597_v56 = vsub.f32 0.0, %v4025_v62  ;;  %v1835_v58 = vmax.f32 %v1737_v46, 0.0  ;;  %2358 = vmatmul.bf16.gmra.mxu2 %v2204_v47 }
 0x592   :  { %v1446_v59 = vpop.f32.mrf.mxu3  ;;  %v2029_v16 = vpop.f32.mrf.mxu1 }
 0x593   :  { %v4186_v60 = vpop.eup %4185  ;;  %v2666_v63 = vmul.f32 1.442695, %v2597_v56  ;;  %v1878_v1 = vpack.c.bf16 %v1835_v58, %v1834_v50  ;;  %v1447_v0 = vadd.f32 %v5021_v44, %v1446_v59  ;;  %v2030_v33 = vadd.f32 %v4967_v8, %v2029_v16 }
 0x594   :  { %v4188_v2 = vpop.eup %4187  ;;  %v2788_v22 = vadd.f32 1.0, %v4186_v60  ;;  %v2319_v42 = vpop.f32.mrf.mxu2 }
 0x595   :  { %4189 = vpow2.f32 %v2666_v63  ;;  %v1518_v43 = vmax.f32 %v1447_v0, 0.0  ;;  %v2320_v55 = vadd.f32 %v5030_v27, %v2319_v42  ;;  %2068 = vmatmul.bf16.gmra.mxu1 %v1878_v1  ;;  %2996 = vperm.xlu1 %4162, %v4188_v2   ;;  %v2918_v15 = vsub.f32 1.0, %v4188_v2 }
 0x596   :  { %4191 = vrcp.f32 %v2788_v22  ;;  %v1739_v4 = vpop.f32.mrf.mxu0  ;;  %v2153_v38 = vmax.f32 %v2030_v33, 0.0 }
 0x597   :  { %v1552_v37 = vpack.c.bf16 %v1518_v43, %v1517_v3  ;;  %v4026_v9 = vclamps-f32 %v2320_v55, 60.0  ;;  %v1740_v17 = vadd.f32 %v5052_v57, %v1739_v4 }
 0x599   :  { %v2598_v10 = vsub.f32 0.0, %v4026_v9  ;;  %1778 = vmatmul.bf16.gmra.mxu0 %v1552_v37  ;;  %v1836_v53 = vmax.f32 %v1740_v17, 0.0 }
 0x59a   :  { %v1449_v49 = vpop.f32.mrf.mxu3  ;;  %v2031_v6 = vpop.f32.mrf.mxu1 }
 0x59b   :  { %v4190_v36 = vpop.eup %4189  ;;  %v2668_v13 = vmul.f32 1.442695, %v2598_v10  ;;  %v2032_v14 = vadd.f32 %v4967_v8, %v2031_v6  ;;  %v1450_v20 = vadd.f32 %v5021_v44, %v1449_v49 }
 0x59c   :  { %v4192_v7 = vpop.eup %4191  ;;  %v2789_v19 = vadd.f32 1.0, %v4190_v36  ;;  %v2321_v25 = vpop.f32.mrf.mxu2 }
 0x59d   :  { %4193 = vpow2.f32 %v2668_v13  ;;  %v2154_v18 = vmax.f32 %v2032_v14, 0.0  ;;  %v2322_v29 = vadd.f32 %v5030_v27, %v2321_v25  ;;  %3001 = vperm.xlu2 %4163, %v4192_v7   ;;  %3316 = vperm.xlu1 %4162, %v2918_v15   ;;  %v2919_v12 = vsub.f32 1.0, %v4192_v7 }
 0x59e   :  { %4195 = vrcp.f32 %v2789_v19  ;;  %v1741_v11 = vpop.f32.mrf.mxu0  ;;  %v1519_v39 = vmax.f32 %v1450_v20, 0.0 }
 0x59f   :  { %v4027_v61 = vclamps-f32 %v2322_v29, 60.0  ;;  %v1742_v21 = vadd.f32 %v5052_v57, %v1741_v11  ;;  %v2205_v23 = vpack.c.bf16 %v2154_v18, %v2153_v38 }
 0x5a1   :  { %v2599_v24 = vsub.f32 0.0, %v4027_v61  ;;  %v1837_v48 = vmax.f32 %v1742_v21, 0.0  ;;  %2363 = vmatmul.bf16.gmra.mxu2 %v2205_v23 }
 0x5a2   :  { %v1451_v26 = vpop.f32.mrf.mxu3  ;;  %v2034_v28 = vpop.f32.mrf.mxu1 }
 0x5a3   :  { %v4194_v51 = vpop.eup %4193  ;;  %v2670_v31 = vmul.f32 1.442695, %v2599_v24  ;;  %v1879_v30 = vpack.c.bf16 %v1837_v48, %v1836_v53  ;;  %v1452_v32 = vadd.f32 %v5021_v44, %v1451_v26  ;;  %v2035_v47 = vadd.f32 %v4967_v8, %v2034_v28 }
 0x5a4   :  { %v4196_v34 = vpop.eup %4195  ;;  %v2790_v5 = vadd.f32 1.0, %v4194_v51  ;;  %v2324_v52 = vpop.f32.mrf.mxu2 }
 0x5a5   :  { %4197 = vpow2.f32 %v2670_v31  ;;  %v1520_v40 = vmax.f32 %v1452_v32, 0.0  ;;  %v2325_v41 = vadd.f32 %v5030_v27, %v2324_v52  ;;  %2073 = vmatmul.bf16.gmra.mxu1 %v1879_v30  ;;  %3321 = vperm.xlu2 %4163, %v2919_v12   ;;  %v2920_v45 = vsub.f32 1.0, %v4196_v34 }
 0x5a6   :  { %4199 = vrcp.f32 %v2790_v5  ;;  %v1744_v35 = vpop.f32.mrf.mxu0  ;;  %v2155_v1 = vmax.f32 %v2035_v47, 0.0 }
 0x5a7   :  { %v1553_v62 = vpack.c.bf16 %v1520_v40, %v1519_v39  ;;  %v4028_v46 = vclamps-f32 %v2325_v41, 60.0  ;;  %3326 = vperm.xlu0 %4161, %v2920_v45   ;;  %v1745_v2 = vadd.f32 %v5052_v57, %v1744_v35 }
 0x5a9   :  { %v2600_v50 = vsub.f32 0.0, %v4028_v46  ;;  %1783 = vmatmul.bf16.gmra.mxu0 %v1553_v62  ;;  %v1838_v9 = vmax.f32 %v1745_v2, 0.0 }
 0x5aa   :  { %v1454_v54 = vpop.f32.mrf.mxu3  ;;  %v2036_v56 = vpop.f32.mrf.mxu1 }
 0x5ab   :  { %v4198_v58 = vpop.eup %4197  ;;  %v2672_v59 = vmul.f32 1.442695, %v2600_v50  ;;  %v2037_v16 = vadd.f32 %v4967_v8, %v2036_v56  ;;  %v1455_v33 = vadd.f32 %v5021_v44, %v1454_v54 }
 0x5ac   :  { %v4200_v60 = vpop.eup %4199  ;;  %v2791_v63 = vadd.f32 1.0, %v4198_v58  ;;  %v2326_v0 = vpop.f32.mrf.mxu2 }
 0x5ad   :  { %4201 = vpow2.f32 %v2672_v59  ;;  %v2156_v22 = vmax.f32 %v2037_v16, 0.0  ;;  %v2327_v42 = vadd.f32 %v5030_v27, %v2326_v0  ;;  %3006 = vperm.xlu2 %4163, %v4196_v34   ;;  %v2921_v43 = vsub.f32 1.0, %v4200_v60 }
 0x5ae   :  { %4203 = vrcp.f32 %v2791_v63  ;;  %v1746_v3 = vpop.f32.mrf.mxu0  ;;  %v1521_v17 = vmax.f32 %v1455_v33, 0.0 }
 0x5af   :  { %v4029_v55 = vclamps-f32 %v2327_v42, 60.0  ;;  %v1747_v4 = vadd.f32 %v5052_v57, %v1746_v3  ;;  %v2206_v37 = vpack.c.bf16 %v2156_v22, %v2155_v1  ;;  %3011 = vperm.xlu0 %4161, %v4200_v60   ;;  %3331 = vperm.xlu1 %4162, %v2921_v43   ;;  %v5082_v1 = vld [vmem:[#allocation7 + $0x5] ss:$0 sm:$0xff] }
 0x5b1   :  { %v2601_v10 = vsub.f32 0.0, %v4029_v55  ;;  %v1839_v49 = vmax.f32 %v1747_v4, 0.0  ;;  %2368 = vmatmul.bf16.gmra.mxu2 %v2206_v37 }
 0x5b2   :  { %v1456_v6 = vpop.f32.mrf.mxu3  ;;  %v2039_v36 = vpop.f32.mrf.mxu1 }
 0x5b3   :  { %v4202_v13 = vpop.eup %4201  ;;  %v2674_v14 = vmul.f32 1.442695, %v2601_v10  ;;  %v1880_v15 = vpack.c.bf16 %v1839_v49, %v1838_v9  ;;  %v1457_v7 = vadd.f32 %v5021_v44, %v1456_v6  ;;  %v2040_v53 = vadd.f32 %v4967_v8, %v2039_v36 }
 0x5b4   :  { %v4204_v19 = vpop.eup %4203  ;;  %v2792_v38 = vadd.f32 1.0, %v4202_v13  ;;  %v2329_v25 = vpop.f32.mrf.mxu2 }
 0x5b5   :  { %4205 = vpow2.f32 %v2674_v14  ;;  %v1522_v18 = vmax.f32 %v1457_v7, 0.0  ;;  %v2330_v29 = vadd.f32 %v5030_v27, %v2329_v25  ;;  %2078 = vmatmul.bf16.gmra.mxu1 %v1880_v15  ;;  %v2922_v61 = vsub.f32 1.0, %v4204_v19 }
 0x5b6   :  { %4207 = vrcp.f32 %v2792_v38  ;;  %v1749_v11 = vpop.f32.mrf.mxu0  ;;  %v2157_v31 = vmax.f32 %v2040_v53, 0.0 }
 0x5b7   :  { %v1554_v21 = vpack.c.bf16 %v1522_v18, %v1521_v17  ;;  %v4030_v23 = vclamps-f32 %v2330_v29, 60.0  ;;  %3336 = vperm.xlu2 %4163, %v2922_v61   ;;  %3016 = vperm.xlu1 %4162, %v4204_v19   ;;  %v1750_v30 = vadd.f32 %v5052_v57, %v1749_v11 }
 0x5b9   :  { %v2602_v20 = vsub.f32 0.0, %v4030_v23  ;;  %1788 = vmatmul.bf16.gmra.mxu0 %v1554_v21 }
 0x5ba   :  { %v2041_v44 = vpop.f32.mrf.mxu1 }
 0x5bb   :  { %v4206_v24 = vpop.eup %4205  ;;  %v2676_v48 = vmul.f32 1.442695, %v2602_v20  ;;  %v2042_v26 = vadd.f32 %v4967_v8, %v2041_v44  ;;  %v1840_v8 = vmax.f32 %v1750_v30, 0.0 }
 0x5bc   :  { %v4208_v28 = vpop.eup %4207  ;;  %v2793_v51 = vadd.f32 1.0, %v4206_v24  ;;  %v2331_v32 = vpop.f32.mrf.mxu2 }
 0x5bd   :  { %4209 = vpow2.f32 %v2676_v48  ;;  %v2158_v12 = vmax.f32 %v2042_v26, 0.0  ;;  %v2332_v34 = vadd.f32 %v5030_v27, %v2331_v32  ;;  %v2923_v5 = vsub.f32 1.0, %v4208_v28 }
 0x5be   :  { %4211 = vrcp.f32 %v2793_v51  ;;  %v1751_v52 = vpop.f32.mrf.mxu0 }
 0x5bf   :  { %v4031_v39 = vclamps-f32 %v2332_v34, 60.0  ;;  %v1752_v40 = vadd.f32 %v5052_v57, %v1751_v52  ;;  %3341 = vperm.xlu0 %4161, %v2923_v5   ;;  %v2207_v41 = vpack.c.bf16 %v2158_v12, %v2157_v31  ;;  %3021 = vperm.xlu2 %4163, %v4208_v28  }
 0x5c1   :  { %v2603_v35 = vsub.f32 0.0, %v4031_v39  ;;  %v1841_v45 = vmax.f32 %v1752_v40, 0.0  ;;  %2373 = vmatmul.bf16.gmra.mxu2 %v2207_v41 }
 0x5c2   :  { %v2044_v62 = vpop.f32.mrf.mxu1 }
 0x5c3   :  { %v4210_v46 = vpop.eup %4209  ;;  %v2678_v47 = vmul.f32 1.442695, %v2603_v35  ;;  %v1881_v50 = vpack.c.bf16 %v1841_v45, %v1840_v8  ;;  %v2045_v0 = vadd.f32 %v5082_v1, %v2044_v62 }
 0x5c4   :  { %v4212_v54 = vpop.eup %4211  ;;  %v2794_v56 = vadd.f32 1.0, %v4210_v46  ;;  %v2334_v58 = vpop.f32.mrf.mxu2 }
 0x5c5   :  { %4213 = vpow2.f32 %v2678_v47  ;;  %v2335_v59 = vadd.f32 %v5030_v27, %v2334_v58  ;;  %2083 = vmatmul.bf16.gmra.mxu1 %v1881_v50  ;;  %v2924_v16 = vsub.f32 1.0, %v4212_v54  ;;  %v2159_v37 = vmax.f32 %v2045_v0, 0.0 }
 0x5c6   :  { %4215 = vrcp.f32 %v2794_v56  ;;  %v1754_v60 = vpop.f32.mrf.mxu0 }
 0x5c7   :  { %v4032_v63 = vclamps-f32 %v2335_v59, 60.0  ;;  %3026 = vperm.xlu0 %4161, %v4212_v54   ;;  %3346 = vperm.xlu1 %4162, %v2924_v16   ;;  %v1755_v9 = vadd.f32 %v5052_v57, %v1754_v60 }
 0x5c9   :  { %v2604_v2 = vsub.f32 0.0, %v4032_v63  ;;  %v1842_v7 = vmax.f32 %v1755_v9, 0.0 }
 0x5ca   :  { %v2046_v22 = vpop.f32.mrf.mxu1 }
 0x5cb   :  { %v4214_v42 = vpop.eup %4213  ;;  %v2680_v3 = vmul.f32 1.442695, %v2604_v2  ;;  %v2047_v43 = vadd.f32 %v5082_v1, %v2046_v22 }
 0x5cc   :  { %v4216_v55 = vpop.eup %4215  ;;  %v2795_v4 = vadd.f32 1.0, %v4214_v42  ;;  %v2336_v33 = vpop.f32.mrf.mxu2 }
 0x5cd   :  { %4217 = vpow2.f32 %v2680_v3  ;;  %v2160_v10 = vmax.f32 %v2047_v43, 0.0  ;;  %v2337_v49 = vadd.f32 %v5030_v27, %v2336_v33  ;;  %v2925_v6 = vsub.f32 1.0, %v4216_v55 }
 0x5ce   :  { %4219 = vrcp.f32 %v2795_v4  ;;  %v1756_v36 = vpop.f32.mrf.mxu0  ;;  %v2912_v3 = vlaneseq }
 0x5cf   :  { %v4033_v13 = vclamps-f32 %v2337_v49, 60.0  ;;  %v1757_v14 = vadd.f32 %v5052_v57, %v1756_v36  ;;  %3351 = vperm.xlu2 %4163, %v2925_v6   ;;  %3031 = vperm.xlu1 %4162, %v4216_v55   ;;  %v2208_v15 = vpack.c.bf16 %v2160_v10, %v2159_v37 }
 0x5d1   :  { %v2605_v19 = vsub.f32 0.0, %v4033_v13  ;;  %v1843_v38 = vmax.f32 %v1757_v14, 0.0  ;;  %2378 = vmatmul.bf16.gmra.mxu2 %v2208_v15  ;;  %v2913_v13 = vand.u32 127, %v2912_v3 }
 0x5d2   :  { %v2049_v25 = vpop.f32.mrf.mxu1 }
 0x5d3   :  { %v4218_v17 = vpop.eup %4217  ;;  %v2682_v18 = vmul.f32 1.442695, %v2605_v19  ;;  %v1882_v29 = vpack.c.bf16 %v1843_v38, %v1842_v7  ;;  %v2050_v24 = vadd.f32 %v5082_v1, %v2049_v25  ;;  %vm2914_vm1 = vcmp.eq.s32.totalorder %v2913_v13, 0 }
 0x5d4   :  { %v4220_v11 = vpop.eup %4219  ;;  %v2796_v61 = vadd.f32 1.0, %v4218_v17  ;;  %v2339_v21 = vpop.f32.mrf.mxu2 }
 0x5d5   :  { %4221 = vpow2.f32 %v2682_v18  ;;  %v2340_v23 = vadd.f32 %v5030_v27, %v2339_v21  ;;  %2088 = vmatmul.bf16.gmra.mxu1 %v1882_v29  ;;  %v2926_v53 = vsub.f32 1.0, %v4220_v11  ;;  %v2161_v12 = vmax.f32 %v2050_v24, 0.0 }
 0x5d6   :  { %4223 = vrcp.f32 %v2796_v61  ;;  %v1759_v20 = vpop.f32.mrf.mxu0 }
 0x5d7   :  { %v4034_v44 = vclamps-f32 %v2340_v23, 60.0  ;;  %3036 = vperm.xlu2 %4163, %v4220_v11   ;;  %3356 = vperm.xlu0 %4161, %v2926_v53   ;;  %v1760_v34 = vadd.f32 %v5052_v57, %v1759_v20 }
 0x5d9   :  { %v2606_v48 = vsub.f32 0.0, %v4034_v44  ;;  %v1844_v62 = vmax.f32 %v1760_v34, 0.0 }
 0x5da   :  { %v2051_v26 = vpop.f32.mrf.mxu1 }
 0x5db   :  { %v4222_v28 = vpop.eup %4221  ;;  %v2684_v51 = vmul.f32 1.442695, %v2606_v48  ;;  %v2052_v31 = vadd.f32 %v5082_v1, %v2051_v26 }
 0x5dc   :  { %v4224_v30 = vpop.eup %4223  ;;  %v2797_v32 = vadd.f32 1.0, %v4222_v28  ;;  %v2341_v5 = vpop.f32.mrf.mxu2 }
 0x5dd   :  { %4225 = vpow2.f32 %v2684_v51  ;;  %v2162_v52 = vmax.f32 %v2052_v31, 0.0  ;;  %v2342_v39 = vadd.f32 %v5030_v27, %v2341_v5  ;;  %v2927_v40 = vsub.f32 1.0, %v4224_v30 }
 0x5de   :  { %4227 = vrcp.f32 %v2797_v32  ;;  %v1761_v41 = vpop.f32.mrf.mxu0 }
 0x5df   :  { %v4035_v8 = vclamps-f32 %v2342_v39, 60.0  ;;  %v1762_v35 = vadd.f32 %v5052_v57, %v1761_v41  ;;  %3041 = vperm.xlu0 %4161, %v4224_v30   ;;  %3361 = vperm.xlu1 %4162, %v2927_v40   ;;  %v2209_v45 = vpack.c.bf16 %v2162_v52, %v2161_v12 }
 0x5e1   :  { %v2607_v46 = vsub.f32 0.0, %v4035_v8  ;;  %v1845_v47 = vmax.f32 %v1762_v35, 0.0  ;;  %2383 = vmatmul.bf16.gmra.mxu2 %v2209_v45  ;;  %v3307_v38 = vpop.permute.xlu2 %3306 }
 0x5e2   :  { %v2054_v50 = vpop.f32.mrf.mxu1 }
 0x5e3   :  { %v4226_v54 = vpop.eup %4225  ;;  %v2686_v56 = vmul.f32 1.442695, %v2607_v46  ;;  %v1883_v58 = vpack.c.bf16 %v1845_v47, %v1844_v62  ;;  %v2055_v42 = vadd.f32 %v5082_v1, %v2054_v50 }
 0x5e4   :  { %v4228_v59 = vpop.eup %4227  ;;  %v2798_v16 = vadd.f32 1.0, %v4226_v54  ;;  %v2344_v60 = vpop.f32.mrf.mxu2 }
 0x5e5   :  { %4229 = vpow2.f32 %v2686_v56  ;;  %v2345_v63 = vadd.f32 %v5030_v27, %v2344_v60  ;;  %2093 = vmatmul.bf16.gmra.mxu1 %v1883_v58  ;;  %v2928_v0 = vsub.f32 1.0, %v4228_v59  ;;  %v2163_v49 = vmax.f32 %v2055_v42, 0.0 }
 0x5e6   :  { %4231 = vrcp.f32 %v2798_v16  ;;  %v1764_v2 = vpop.f32.mrf.mxu0 }
 0x5e7   :  { %v4036_v22 = vclamps-f32 %v2345_v63, 60.0  ;;  %3366 = vperm.xlu2 %4163, %v2928_v0   ;;  %3046 = vperm.xlu1 %4162, %v4228_v59   ;;  %v1765_v6 = vadd.f32 %v5052_v57, %v1764_v2 }
 0x5e9   :  { %v2608_v43 = vsub.f32 0.0, %v4036_v22  ;;  %v1846_v11 = vmax.f32 %v1765_v6, 0.0 }
 0x5ea   :  { %v2056_v55 = vpop.f32.mrf.mxu1 }
 0x5eb   :  { %v4230_v4 = vpop.eup %4229  ;;  %v2688_v37 = vmul.f32 1.442695, %v2608_v43  ;;  %v2057_v9 = vadd.f32 %v5082_v1, %v2056_v55 }
 0x5ec   :  { %v4232_v33 = vpop.eup %4231  ;;  %v2799_v10 = vadd.f32 1.0, %v4230_v4  ;;  %v2346_v36 = vpop.f32.mrf.mxu2 }
 0x5ed   :  { %4233 = vpow2.f32 %v2688_v37  ;;  %v2164_v14 = vmax.f32 %v2057_v9, 0.0  ;;  %v2347_v15 = vadd.f32 %v5030_v27, %v2346_v36  ;;  %v2929_v7 = vsub.f32 1.0, %v4232_v33 }
 0x5ee   :  { %4235 = vrcp.f32 %v2799_v10  ;;  %v1766_v19 = vpop.f32.mrf.mxu0 }
 0x5ef   :  { %v4037_v25 = vclamps-f32 %v2347_v15, 60.0  ;;  %v1767_v17 = vadd.f32 %v5052_v57, %v1766_v19  ;;  %3051 = vperm.xlu2 %4163, %v4232_v33   ;;  %3371 = vperm.xlu0 %4161, %v2929_v7   ;;  %v2982_v18 = vpop.permute.xlu0 %2981  ;;  %v2210_v29 = vpack.c.bf16 %v2164_v14, %v2163_v49 }
 0x5f1   :  { %v2609_v61 = vsub.f32 0.0, %v4037_v25  ;;  %v1847_v21 = vmax.f32 %v1767_v17, 0.0  ;;  %2388 = vmatmul.bf16.gmra.mxu2 %v2210_v29  ;;  %v3302_v23 = vpop.permute.xlu1 %3301 }
 0x5f2   :  { %v2059_v53 = vpop.f32.mrf.mxu1  ;;  %v3619_v48 = vsel %vm2914_vm1, %v2982_v18, %v3302_v23 }
 0x5f3   :  { %v4234_v20 = vpop.eup %4233  ;;  %v2690_v44 = vmul.f32 1.442695, %v2609_v61  ;;  %v1884_v24 = vpack.c.bf16 %v1847_v21, %v1846_v11  ;;  %3684 = vst.msk [vmem:[#allocation9] sm:$0xff] %vm3683_vm2, %v3619_v48  ;;  %v2060_v52 = vadd.f32 %v5082_v1, %v2059_v53 }
 0x5f4   :  { %v4236_v26 = vpop.eup %4235  ;;  %v2800_v28 = vadd.f32 1.0, %v4234_v20  ;;  %v2349_v51 = vpop.f32.mrf.mxu2 }
 0x5f5   :  { %4237 = vpow2.f32 %v2690_v44  ;;  %v2350_v31 = vadd.f32 %v5030_v27, %v2349_v51  ;;  %2098 = vmatmul.bf16.gmra.mxu1 %v1884_v24  ;;  %v2930_v30 = vsub.f32 1.0, %v4236_v26  ;;  %v2165_v47 = vmax.f32 %v2060_v52, 0.0 }
 0x5f6   :  { %4239 = vrcp.f32 %v2800_v28  ;;  %v1769_v32 = vpop.f32.mrf.mxu0 }
 0x5f7   :  { %v4038_v12 = vclamps-f32 %v2350_v31, 60.0  ;;  %v3002_v34 = vpop.permute.xlu2 %3001  ;;  %3056 = vperm.xlu0 %4161, %v4236_v26   ;;  %v2987_v5 = vpop.permute.xlu0 %2986  ;;  %3376 = vperm.xlu1 %4162, %v2930_v30   ;;  %v1770_v50 = vadd.f32 %v5052_v57, %v1769_v32 }
 0x5f9   :  { %v2610_v39 = vsub.f32 0.0, %v4038_v12  ;;  %v1848_v42 = vmax.f32 %v1770_v50, 0.0 }
 0x5fa   :  { %v2061_v40 = vpop.f32.mrf.mxu1  ;;  %v3778_v8 = vld [vmem:[#allocation9] sm:$0xff] }
 0x5fb   :  { %v4238_v41 = vpop.eup %4237  ;;  %v2692_v35 = vmul.f32 1.442695, %v2610_v39  ;;  %v2062_v45 = vadd.f32 %v5082_v1, %v2061_v40  ;;  %3779 = vst [vmem:[%s5196_s4] sm:$0xff] %v3778_v8  ;;  %v5116_v8 = vld [vmem:[#allocation7 + $0x6] ss:$0 sm:$0xff] }
 0x5fc   :  { %v4240_v62 = vpop.eup %4239  ;;  %v2801_v46 = vadd.f32 1.0, %v4238_v41  ;;  %v2351_v54 = vpop.f32.mrf.mxu2 }
 0x5fd   :  { %4241 = vpow2.f32 %v2692_v35  ;;  %v2166_v56 = vmax.f32 %v2062_v45, 0.0  ;;  %v2352_v58 = vadd.f32 %v5030_v27, %v2351_v54  ;;  %v2931_v59 = vsub.f32 1.0, %v4240_v62 }
 0x5fe   :  { %4243 = vrcp.f32 %v2801_v46  ;;  %v1771_v16 = vpop.f32.mrf.mxu0 }
 0x5ff   :  { %v4039_v60 = vclamps-f32 %v2352_v58, 60.0  ;;  %v1772_v63 = vadd.f32 %v5052_v57, %v1771_v16  ;;  %3381 = vperm.xlu2 %4163, %v2931_v59   ;;  %v3322_v0 = vpop.permute.xlu2 %3321  ;;  %3061 = vperm.xlu1 %4162, %v4240_v62   ;;  %v2992_v2 = vpop.permute.xlu1 %2991  ;;  %v2211_v22 = vpack.c.bf16 %v2166_v56, %v2165_v47 }
 0x601   :  { %v2611_v3 = vsub.f32 0.0, %v4039_v60  ;;  %v1849_v43 = vmax.f32 %v1772_v63, 0.0  ;;  %2393 = vmatmul.bf16.gmra.mxu2 %v2211_v22  ;;  %v3312_v55 = vpop.permute.xlu0 %3311 }
 0x602   :  { %v2064_v4 = vpop.f32.mrf.mxu1 }
 0x603   :  { %v4242_v37 = vpop.eup %4241  ;;  %v2694_v9 = vmul.f32 1.442695, %v2611_v3  ;;  %v1885_v33 = vpack.c.bf16 %v1849_v43, %v1848_v42  ;;  %v2065_v19 = vadd.f32 %v5082_v1, %v2064_v4 }
 0x604   :  { %v4244_v10 = vpop.eup %4243  ;;  %v2802_v49 = vadd.f32 1.0, %v4242_v37  ;;  %v2354_v6 = vpop.f32.mrf.mxu2 }
 0x605   :  { %4245 = vpow2.f32 %v2694_v9  ;;  %v2355_v36 = vadd.f32 %v5030_v27, %v2354_v6  ;;  %2103 = vmatmul.bf16.gmra.mxu1 %v1885_v33  ;;  %v2932_v13 = vsub.f32 1.0, %v4244_v10  ;;  %v2167_v21 = vmax.f32 %v2065_v19, 0.0 }
 0x606   :  { %4247 = vrcp.f32 %v2802_v49  ;;  %v1774_v14 = vpop.f32.mrf.mxu0 }
 0x607   :  { %v4040_v15 = vclamps-f32 %v2355_v36, 60.0  ;;  %3066 = vperm.xlu2 %4163, %v4244_v10   ;;  %3386 = vperm.xlu0 %4161, %v2932_v13   ;;  %v2997_v7 = vpop.permute.xlu1 %2996  ;;  %v1775_v23 = vadd.f32 %v5052_v57, %v1774_v14  ;;  %v3007_v50 = vpop.permute.xlu2 %3006 }
 0x609   :  { %v2612_v38 = vsub.f32 0.0, %v4040_v15  ;;  %v1850_v30 = vmax.f32 %v1775_v23, 0.0 }
 0x60a   :  { %v2066_v25 = vpop.f32.mrf.mxu1 }
 0x60b   :  { %v4246_v17 = vpop.eup %4245  ;;  %v2696_v18 = vmul.f32 1.442695, %v2612_v38  ;;  %v2067_v29 = vadd.f32 %v5082_v1, %v2066_v25 }
 0x60c   :  { %v4248_v11 = vpop.eup %4247  ;;  %v2803_v61 = vadd.f32 1.0, %v4246_v17  ;;  %v2356_v53 = vpop.f32.mrf.mxu2 }
 0x60d   :  { %4249 = vpow2.f32 %v2696_v18  ;;  %v2168_v20 = vmax.f32 %v2067_v29, 0.0  ;;  %v2357_v44 = vadd.f32 %v5030_v27, %v2356_v53  ;;  %v2933_v24 = vsub.f32 1.0, %v4248_v11 }
 0x60e   :  { %4251 = vrcp.f32 %v2803_v61  ;;  %v1776_v48 = vpop.f32.mrf.mxu0 }
 0x60f   :  { %v4041_v26 = vclamps-f32 %v2357_v44, 60.0  ;;  %v1777_v28 = vadd.f32 %v5052_v57, %v1776_v48  ;;  %3071 = vperm.xlu0 %4161, %v4248_v11   ;;  %3391 = vperm.xlu1 %4162, %v2933_v24   ;;  %v3317_v51 = vpop.permute.xlu1 %3316  ;;  %v2212_v31 = vpack.c.bf16 %v2168_v20, %v2167_v21 }
 0x611   :  { %v2613_v32 = vsub.f32 0.0, %v4041_v26  ;;  %v1851_v12 = vmax.f32 %v1777_v28, 0.0  ;;  %2398 = vmatmul.bf16.gmra.mxu2 %v2212_v31  ;;  %v3337_v61 = vpop.permute.xlu2 %3336 }
 0x612   :  { %v2069_v34 = vpop.f32.mrf.mxu1 }
 0x613   :  { %v4250_v5 = vpop.eup %4249  ;;  %v2698_v52 = vmul.f32 1.442695, %v2613_v32  ;;  %v1886_v39 = vpack.c.bf16 %v1851_v12, %v1850_v30  ;;  %v2070_v54 = vadd.f32 %v5082_v1, %v2069_v34 }
 0x614   :  { %v4252_v40 = vpop.eup %4251  ;;  %v2804_v27 = vadd.f32 1.0, %v4250_v5  ;;  %v2359_v41 = vpop.f32.mrf.mxu2 }
 0x615   :  { %4253 = vpow2.f32 %v2698_v52  ;;  %v2360_v35 = vadd.f32 %v5116_v8, %v2359_v41  ;;  %2108 = vmatmul.bf16.gmra.mxu1 %v1886_v39  ;;  %v2934_v45 = vsub.f32 1.0, %v4252_v40  ;;  %v2169_v43 = vmax.f32 %v2070_v54, 0.0 }
 0x616   :  { %4255 = vrcp.f32 %v2804_v27  ;;  %v1779_v62 = vpop.f32.mrf.mxu0 }
 0x617   :  { %v4042_v46 = vclamps-f32 %v2360_v35, 60.0  ;;  %3396 = vperm.xlu2 %4163, %v2934_v45   ;;  %3076 = vperm.xlu1 %4162, %v4252_v40   ;;  %v1780_v22 = vadd.f32 %v5052_v57, %v1779_v62 }
 0x619   :  { %v2614_v47 = vsub.f32 0.0, %v4042_v46  ;;  %v3327_v56 = vpop.permute.xlu0 %3326  ;;  %v1852_v10 = vmax.f32 %v1780_v22, 0.0  ;;  %v3022_v41 = vpop.permute.xlu2 %3021 }
 0x61a   :  { %v2071_v16 = vpop.f32.mrf.mxu1 }
 0x61b   :  { %v4254_v58 = vpop.eup %4253  ;;  %v2700_v59 = vmul.f32 1.442695, %v2614_v47  ;;  %v2072_v0 = vadd.f32 %v5082_v1, %v2071_v16 }
 0x61c   :  { %v4256_v60 = vpop.eup %4255  ;;  %v2805_v63 = vadd.f32 1.0, %v4254_v58  ;;  %v2361_v2 = vpop.f32.mrf.mxu2 }
 0x61d   :  { %4257 = vpow2.f32 %v2700_v59  ;;  %v2362_v42 = vadd.f32 %v5116_v8, %v2361_v2  ;;  %v2935_v3 = vsub.f32 1.0, %v4256_v60  ;;  %v2170_v55 = vmax.f32 %v2072_v0, 0.0 }
 0x61e   :  { %4259 = vrcp.f32 %v2805_v63  ;;  %v1781_v4 = vpop.f32.mrf.mxu0 }
 0x61f   :  { %v4043_v37 = vclamps-f32 %v2362_v42, 60.0  ;;  %v1782_v9 = vadd.f32 %v5052_v57, %v1781_v4  ;;  %3081 = vperm.xlu2 %4163, %v4256_v60   ;;  %3401 = vperm.xlu0 %4161, %v2935_v3   ;;  %v2213_v33 = vpack.c.bf16 %v2170_v55, %v2169_v43 }
 0x621   :  { %v2615_v49 = vsub.f32 0.0, %v4043_v37  ;;  %v1853_v6 = vmax.f32 %v1782_v9, 0.0  ;;  %2403 = vmatmul.bf16.gmra.mxu2 %v2213_v33  ;;  %v3012_v36 = vpop.permute.xlu0 %3011  ;;  %v3332_v13 = vpop.permute.xlu1 %3331 }
 0x622   :  { %v2074_v19 = vpop.f32.mrf.mxu1 }
 0x623   :  { %v4258_v14 = vpop.eup %4257  ;;  %v2702_v15 = vmul.f32 1.442695, %v2615_v49  ;;  %v1887_v7 = vpack.c.bf16 %v1853_v6, %v1852_v10  ;;  %v2075_v53 = vadd.f32 %v5082_v1, %v2074_v19  ;;  %v4434_v49 = vld [vmem:[#allocation7 + $0x4] ss:$0 sm:$0xff] }
 0x624   :  { %v4260_v38 = vpop.eup %4259  ;;  %v2806_v25 = vadd.f32 1.0, %v4258_v14  ;;  %v2364_v17 = vpop.f32.mrf.mxu2 }
 0x625   :  { %4261 = vpow2.f32 %v2702_v15  ;;  %v2365_v18 = vadd.f32 %v5116_v8, %v2364_v17  ;;  %2113 = vmatmul.bf16.gmra.mxu1 %v1887_v7  ;;  %v2936_v29 = vsub.f32 1.0, %v4260_v38  ;;  %v2171_v34 = vmax.f32 %v2075_v53, 0.0 }
 0x626   :  { %4263 = vrcp.f32 %v2806_v25  ;;  %v1784_v11 = vpop.f32.mrf.mxu0 }
 0x627   :  { %v4044_v21 = vclamps-f32 %v2365_v18, 60.0  ;;  %3086 = vperm.xlu0 %4161, %v4260_v38   ;;  %3406 = vperm.xlu1 %4162, %v2936_v29   ;;  %v1785_v30 = vadd.f32 %v5052_v57, %v1784_v11 }
 0x629   :  { %v2616_v23 = vsub.f32 0.0, %v4044_v21  ;;  %v3017_v20 = vpop.permute.xlu1 %3016  ;;  %v1854_v35 = vmax.f32 %v1785_v30, 0.0  ;;  %v3352_v19 = vpop.permute.xlu2 %3351 }
 0x62a   :  { %v2076_v48 = vpop.f32.mrf.mxu1 }
 0x62b   :  { %v4262_v44 = vpop.eup %4261  ;;  %v2704_v24 = vmul.f32 1.442695, %v2616_v23  ;;  %v2077_v51 = vadd.f32 %v5082_v1, %v2076_v48 }
 0x62c   :  { %v4264_v26 = vpop.eup %4263  ;;  %v2807_v28 = vadd.f32 1.0, %v4262_v44  ;;  %v2366_v31 = vpop.f32.mrf.mxu2 }
 0x62d   :  { %4265 = vpow2.f32 %v2704_v24  ;;  %v2367_v32 = vadd.f32 %v5116_v8, %v2366_v31  ;;  %v2937_v12 = vsub.f32 1.0, %v4264_v26  ;;  %v2172_v5 = vmax.f32 %v2077_v51, 0.0 }
 0x62e   :  { %4267 = vrcp.f32 %v2807_v28  ;;  %v1786_v52 = vpop.f32.mrf.mxu0 }
 0x62f   :  { %v4045_v39 = vclamps-f32 %v2367_v32, 60.0  ;;  %v1787_v40 = vadd.f32 %v5052_v57, %v1786_v52  ;;  %3411 = vperm.xlu2 %4163, %v2937_v12   ;;  %3091 = vperm.xlu1 %4162, %v4264_v26   ;;  %v2214_v27 = vpack.c.bf16 %v2172_v5, %v2171_v34 }
 0x631   :  { %v2617_v45 = vsub.f32 0.0, %v4045_v39  ;;  %v1855_v62 = vmax.f32 %v1787_v40, 0.0  ;;  %v3342_v46 = vpop.permute.xlu0 %3341  ;;  %2408 = vmatmul.bf16.gmra.mxu2 %v2214_v27  ;;  %v3037_v31 = vpop.permute.xlu2 %3036 }
 0x632   :  { %v2079_v56 = vpop.f32.mrf.mxu1 }
 0x633   :  { %v4266_v47 = vpop.eup %4265  ;;  %v2706_v50 = vmul.f32 1.442695, %v2617_v45  ;;  %v1888_v54 = vpack.c.bf16 %v1855_v62, %v1854_v35  ;;  %v2080_v3 = vadd.f32 %v5082_v1, %v2079_v56 }
 0x634   :  { %v4268_v58 = vpop.eup %4267  ;;  %v2808_v59 = vadd.f32 1.0, %v4266_v47  ;;  %v2369_v16 = vpop.f32.mrf.mxu2 }
 0x635   :  { %4269 = vpow2.f32 %v2706_v50  ;;  %v2370_v60 = vadd.f32 %v5116_v8, %v2369_v16  ;;  %2118 = vmatmul.bf16.gmra.mxu1 %v1888_v54  ;;  %v2938_v57 = vsub.f32 1.0, %v4268_v58  ;;  %v2173_v14 = vmax.f32 %v2080_v3, 0.0 }
 0x636   :  { %4271 = vrcp.f32 %v2808_v59  ;;  %v1789_v63 = vpop.f32.mrf.mxu0 }
 0x637   :  { %v4046_v0 = vclamps-f32 %v2370_v60, 60.0  ;;  %3096 = vperm.xlu2 %4163, %v4268_v58   ;;  %3416 = vperm.xlu0 %4161, %v2938_v57   ;;  %v1790_v6 = vadd.f32 %v4434_v49, %v1789_v63 }
 0x639   :  { %v2618_v2 = vsub.f32 0.0, %v4046_v0  ;;  %v3027_v22 = vpop.permute.xlu0 %3026  ;;  %v3347_v42 = vpop.permute.xlu1 %3346  ;;  %v1856_v18 = vmax.f32 %v1790_v6, 0.0 }
 0x63a   :  { %v2081_v4 = vpop.f32.mrf.mxu1 }
 0x63b   :  { %v4270_v43 = vpop.eup %4269  ;;  %v2708_v55 = vmul.f32 1.442695, %v2618_v2  ;;  %v2082_v33 = vadd.f32 %v5082_v1, %v2081_v4 }
 0x63c   :  { %v4272_v37 = vpop.eup %4271  ;;  %v2809_v9 = vadd.f32 1.0, %v4270_v43  ;;  %v2371_v10 = vpop.f32.mrf.mxu2 }
 0x63d   :  { %4273 = vpow2.f32 %v2708_v55  ;;  %v2372_v36 = vadd.f32 %v5116_v8, %v2371_v10  ;;  %v2939_v13 = vsub.f32 1.0, %v4272_v37  ;;  %v2174_v15 = vmax.f32 %v2082_v33, 0.0 }
 0x63e   :  { %4275 = vrcp.f32 %v2809_v9  ;;  %v1791_v7 = vpop.f32.mrf.mxu0 }
 0x63f   :  { %v4047_v38 = vclamps-f32 %v2372_v36, 60.0  ;;  %v1792_v25 = vadd.f32 %v4434_v49, %v1791_v7  ;;  %3101 = vperm.xlu0 %4161, %v4272_v37   ;;  %3421 = vperm.xlu1 %4162, %v2939_v13   ;;  %v2215_v17 = vpack.c.bf16 %v2174_v15, %v2173_v14 }
 0x641   :  { %v2619_v29 = vsub.f32 0.0, %v4047_v38  ;;  %v1857_v11 = vmax.f32 %v1792_v25, 0.0  ;;  %v3032_v61 = vpop.permute.xlu1 %3031  ;;  %2413 = vmatmul.bf16.gmra.mxu2 %v2215_v17  ;;  %v3367_v42 = vpop.permute.xlu2 %3366 }
 0x642   :  { %v2084_v20 = vpop.f32.mrf.mxu1 }
 0x643   :  { %v4274_v21 = vpop.eup %4273  ;;  %v2710_v23 = vmul.f32 1.442695, %v2619_v29  ;;  %v1889_v53 = vpack.c.bf16 %v1857_v11, %v1856_v18  ;;  %v2085_v12 = vadd.f32 %v5082_v1, %v2084_v20 }
 0x644   :  { %v4276_v44 = vpop.eup %4275  ;;  %v2810_v24 = vadd.f32 1.0, %v4274_v21  ;;  %v2374_v48 = vpop.f32.mrf.mxu2 }
 0x645   :  { %4277 = vpow2.f32 %v2710_v23  ;;  %v2375_v26 = vadd.f32 %v5116_v8, %v2374_v48  ;;  %2123 = vmatmul.bf16.gmra.mxu1 %v1889_v53  ;;  %v2940_v28 = vsub.f32 1.0, %v4276_v44  ;;  %v2175_v62 = vmax.f32 %v2085_v12, 0.0 }
 0x646   :  { %4279 = vrcp.f32 %v2810_v24 }
 0x647   :  { %v4048_v51 = vclamps-f32 %v2375_v26, 60.0  ;;  %3426 = vperm.xlu2 %4163, %v2940_v28   ;;  %3106 = vperm.xlu1 %4162, %v4276_v44  }
 0x649   :  { %v2620_v30 = vsub.f32 0.0, %v4048_v51  ;;  %v3357_v32 = vpop.permute.xlu0 %3356  ;;  %v3052_v25 = vpop.permute.xlu2 %3051 }
 0x64a   :  { %v2086_v52 = vpop.f32.mrf.mxu1 }
 0x64b   :  { %v4278_v34 = vpop.eup %4277  ;;  %v2712_v5 = vmul.f32 1.442695, %v2620_v30  ;;  %v2087_v27 = vadd.f32 %v5082_v1, %v2086_v52 }
 0x64c   :  { %v4280_v39 = vpop.eup %4279  ;;  %v2811_v40 = vadd.f32 1.0, %v4278_v34  ;;  %v2376_v41 = vpop.f32.mrf.mxu2 }
 0x64d   :  { %4281 = vpow2.f32 %v2712_v5  ;;  %v2377_v35 = vadd.f32 %v5116_v8, %v2376_v41  ;;  %v2941_v45 = vsub.f32 1.0, %v4280_v39  ;;  %v2176_v46 = vmax.f32 %v2087_v27, 0.0 }
 0x64e   :  { %4283 = vrcp.f32 %v2811_v40 }
 0x64f   :  { %v4049_v47 = vclamps-f32 %v2377_v35, 60.0  ;;  %3111 = vperm.xlu2 %4163, %v4280_v39   ;;  %3431 = vperm.xlu0 %4161, %v2941_v45   ;;  %v2216_v50 = vpack.c.bf16 %v2176_v46, %v2175_v62 }
 0x651   :  { %v2621_v54 = vsub.f32 0.0, %v4049_v47  ;;  %v3042_v56 = vpop.permute.xlu0 %3041  ;;  %v3362_v58 = vpop.permute.xlu1 %3361  ;;  %2418 = vmatmul.bf16.gmra.mxu2 %v2216_v50 }
 0x652   :  { %v2089_v60 = vpop.f32.mrf.mxu1 }
 0x653   :  { %v4282_v59 = vpop.eup %4281  ;;  %v2714_v16 = vmul.f32 1.442695, %v2621_v54  ;;  %v2090_v4 = vadd.f32 %v5082_v1, %v2089_v60 }
 0x654   :  { %v4284_v57 = vpop.eup %4283  ;;  %v2812_v63 = vadd.f32 1.0, %v4282_v59  ;;  %v2379_v0 = vpop.f32.mrf.mxu2 }
 0x655   :  { %4285 = vpow2.f32 %v2714_v16  ;;  %v2380_v2 = vadd.f32 %v5116_v8, %v2379_v0  ;;  %v2942_v22 = vsub.f32 1.0, %v4284_v57  ;;  %v2177_v15 = vmax.f32 %v2090_v4, 0.0 }
 0x656   :  { %4287 = vrcp.f32 %v2812_v63 }
 0x657   :  { %v4050_v3 = vclamps-f32 %v2380_v2, 60.0  ;;  %3116 = vperm.xlu0 %4161, %v4284_v57   ;;  %3436 = vperm.xlu1 %4162, %v2942_v22   ;;  %v5147_v22 = vld [vmem:[#allocation7 + $0x5] ss:$0 sm:$0xff] }
 0x659   :  { %v2622_v43 = vsub.f32 0.0, %v4050_v3  ;;  %v3047_v55 = vpop.permute.xlu1 %3046  ;;  %v3382_v35 = vpop.permute.xlu2 %3381 }
 0x65a   :  { %v2091_v33 = vpop.f32.mrf.mxu1 }
 0x65b   :  { %v4286_v37 = vpop.eup %4285  ;;  %v2716_v9 = vmul.f32 1.442695, %v2622_v43  ;;  %v2092_v6 = vadd.f32 %v5082_v1, %v2091_v33 }
 0x65c   :  { %v4288_v10 = vpop.eup %4287  ;;  %v2813_v49 = vadd.f32 1.0, %v4286_v37  ;;  %v2381_v36 = vpop.f32.mrf.mxu2 }
 0x65d   :  { %4289 = vpow2.f32 %v2716_v9  ;;  %v2382_v13 = vadd.f32 %v5116_v8, %v2381_v36  ;;  %v2943_v14 = vsub.f32 1.0, %v4288_v10  ;;  %v2178_v7 = vmax.f32 %v2092_v6, 0.0 }
 0x65e   :  { %4291 = vrcp.f32 %v2813_v49 }
 0x65f   :  { %v4051_v19 = vclamps-f32 %v2382_v13, 60.0  ;;  %3441 = vperm.xlu2 %4163, %v2943_v14   ;;  %3121 = vperm.xlu1 %4162, %v4288_v10   ;;  %v2217_v38 = vpack.c.bf16 %v2178_v7, %v2177_v15 }
 0x661   :  { %v2623_v17 = vsub.f32 0.0, %v4051_v19  ;;  %v3372_v18 = vpop.permute.xlu0 %3371  ;;  %2423 = vmatmul.bf16.gmra.mxu2 %v2217_v38  ;;  %v3067_v63 = vpop.permute.xlu2 %3066 }
 0x662   :  { %v2094_v61 = vpop.f32.mrf.mxu1 }
 0x663   :  { %v4290_v29 = vpop.eup %4289  ;;  %v2718_v11 = vmul.f32 1.442695, %v2623_v17  ;;  %v2095_v51 = vadd.f32 %v5082_v1, %v2094_v61 }
 0x664   :  { %v4292_v21 = vpop.eup %4291  ;;  %v2814_v23 = vadd.f32 1.0, %v4290_v29  ;;  %v2384_v53 = vpop.f32.mrf.mxu2 }
 0x665   :  { %4293 = vpow2.f32 %v2718_v11  ;;  %v2385_v20 = vadd.f32 %v5116_v8, %v2384_v53  ;;  %v2944_v44 = vsub.f32 1.0, %v4292_v21  ;;  %v2179_v27 = vmax.f32 %v2095_v51, 0.0 }
 0x666   :  { %4295 = vrcp.f32 %v2814_v23 }
 0x667   :  { %v4052_v24 = vclamps-f32 %v2385_v20, 60.0  ;;  %3126 = vperm.xlu2 %4163, %v4292_v21   ;;  %3446 = vperm.xlu0 %4161, %v2944_v44  }
 0x669   :  { %v2624_v48 = vsub.f32 0.0, %v4052_v24  ;;  %v3057_v26 = vpop.permute.xlu0 %3056  ;;  %v3377_v28 = vpop.permute.xlu1 %3376 }
 0x66a   :  { %v2096_v32 = vpop.f32.mrf.mxu1 }
 0x66b   :  { %v4294_v31 = vpop.eup %4293  ;;  %v2720_v30 = vmul.f32 1.442695, %v2624_v48  ;;  %v2097_v5 = vadd.f32 %v5082_v1, %v2096_v32 }
 0x66c   :  { %v4296_v12 = vpop.eup %4295  ;;  %v2815_v34 = vadd.f32 1.0, %v4294_v31  ;;  %v2386_v52 = vpop.f32.mrf.mxu2 }
 0x66d   :  { %4297 = vpow2.f32 %v2720_v30  ;;  %v2387_v39 = vadd.f32 %v5116_v8, %v2386_v52  ;;  %v2945_v40 = vsub.f32 1.0, %v4296_v12  ;;  %v2180_v41 = vmax.f32 %v2097_v5, 0.0 }
 0x66e   :  { %4299 = vrcp.f32 %v2815_v34 }
 0x66f   :  { %v4053_v45 = vclamps-f32 %v2387_v39, 60.0  ;;  %3131 = vperm.xlu0 %4161, %v4296_v12   ;;  %3451 = vperm.xlu1 %4162, %v2945_v40   ;;  %v2218_v62 = vpack.c.bf16 %v2180_v41, %v2179_v27 }
 0x671   :  { %v2625_v46 = vsub.f32 0.0, %v4053_v45  ;;  %v3062_v47 = vpop.permute.xlu1 %3061  ;;  %2428 = vmatmul.bf16.gmra.mxu2 %v2218_v62  ;;  %v3397_v23 = vpop.permute.xlu2 %3396 }
 0x672   :  { %v2099_v56 = vpop.f32.mrf.mxu1 }
 0x673   :  { %v4298_v50 = vpop.eup %4297  ;;  %v2722_v54 = vmul.f32 1.442695, %v2625_v46  ;;  %v2100_v42 = vadd.f32 %v5147_v22, %v2099_v56 }
 0x674   :  { %v4300_v1 = vpop.eup %4299  ;;  %v2816_v58 = vadd.f32 1.0, %v4298_v50  ;;  %v2389_v59 = vpop.f32.mrf.mxu2 }
 0x675   :  { %4301 = vpow2.f32 %v2722_v54  ;;  %v2390_v16 = vadd.f32 %v5116_v8, %v2389_v59  ;;  %v2946_v60 = vsub.f32 1.0, %v4300_v1  ;;  %v2181_v6 = vmax.f32 %v2100_v42, 0.0 }
 0x676   :  { %4303 = vrcp.f32 %v2816_v58 }
 0x677   :  { %v4054_v57 = vclamps-f32 %v2390_v16, 60.0  ;;  %3456 = vperm.xlu2 %4163, %v2946_v60   ;;  %3136 = vperm.xlu1 %4162, %v4300_v1  }
 0x679   :  { %v2626_v0 = vsub.f32 0.0, %v4054_v57  ;;  %v3387_v2 = vpop.permute.xlu0 %3386  ;;  %v3082_v27 = vpop.permute.xlu2 %3081 }
 0x67a   :  { %v2101_v55 = vpop.f32.mrf.mxu1 }
 0x67b   :  { %v4302_v3 = vpop.eup %4301  ;;  %v2724_v43 = vmul.f32 1.442695, %v2626_v0  ;;  %v2102_v9 = vadd.f32 %v5147_v22, %v2101_v55 }
 0x67c   :  { %v4304_v4 = vpop.eup %4303  ;;  %v2817_v37 = vadd.f32 1.0, %v4302_v3  ;;  %v2391_v33 = vpop.f32.mrf.mxu2 }
 0x67d   :  { %4305 = vpow2.f32 %v2724_v43  ;;  %v2392_v10 = vadd.f32 %v5116_v8, %v2391_v33  ;;  %v2947_v49 = vsub.f32 1.0, %v4304_v4  ;;  %v2182_v36 = vmax.f32 %v2102_v9, 0.0 }
 0x67e   :  { %4307 = vrcp.f32 %v2817_v37 }
 0x67f   :  { %v4055_v13 = vclamps-f32 %v2392_v10, 60.0  ;;  %3141 = vperm.xlu2 %4163, %v4304_v4   ;;  %3461 = vperm.xlu0 %4161, %v2947_v49   ;;  %v2219_v14 = vpack.c.bf16 %v2182_v36, %v2181_v6 }
 0x681   :  { %v2627_v15 = vsub.f32 0.0, %v4055_v13  ;;  %v3072_v7 = vpop.permute.xlu0 %3071  ;;  %v3392_v19 = vpop.permute.xlu1 %3391  ;;  %2433 = vmatmul.bf16.gmra.mxu2 %v2219_v14 }
 0x682   :  { %v2104_v17 = vpop.f32.mrf.mxu1 }
 0x683   :  { %v4306_v38 = vpop.eup %4305  ;;  %v2726_v25 = vmul.f32 1.442695, %v2627_v15  ;;  %v2105_v24 = vadd.f32 %v5147_v22, %v2104_v17 }
 0x684   :  { %v4308_v18 = vpop.eup %4307  ;;  %v2818_v29 = vadd.f32 1.0, %v4306_v38  ;;  %v2394_v11 = vpop.f32.mrf.mxu2 }
 0x685   :  { %4309 = vpow2.f32 %v2726_v25  ;;  %v2395_v61 = vadd.f32 %v5116_v8, %v2394_v11  ;;  %v2948_v21 = vsub.f32 1.0, %v4308_v18  ;;  %v2183_v5 = vmax.f32 %v2105_v24, 0.0 }
 0x686   :  { %4311 = vrcp.f32 %v2818_v29 }
 0x687   :  { %v4056_v53 = vclamps-f32 %v2395_v61, 60.0  ;;  %3146 = vperm.xlu0 %4161, %v4308_v18   ;;  %3466 = vperm.xlu1 %4162, %v2948_v21  }
 0x689   :  { %v2628_v20 = vsub.f32 0.0, %v4056_v53  ;;  %v3077_v44 = vpop.permute.xlu1 %3076  ;;  %v3412_v10 = vpop.permute.xlu2 %3411 }
 0x68a   :  { %v2106_v28 = vpop.f32.mrf.mxu1 }
 0x68b   :  { %v4310_v48 = vpop.eup %4309  ;;  %v2728_v26 = vmul.f32 1.442695, %v2628_v20  ;;  %v2107_v30 = vadd.f32 %v5147_v22, %v2106_v28 }
 0x68c   :  { %v4312_v51 = vpop.eup %4311  ;;  %v2819_v31 = vadd.f32 1.0, %v4310_v48  ;;  %v2396_v32 = vpop.f32.mrf.mxu2 }
 0x68d   :  { %4313 = vpow2.f32 %v2728_v26  ;;  %v2397_v12 = vadd.f32 %v5116_v8, %v2396_v32  ;;  %v2949_v34 = vsub.f32 1.0, %v4312_v51  ;;  %v2184_v52 = vmax.f32 %v2107_v30, 0.0 }
 0x68e   :  { %4315 = vrcp.f32 %v2819_v31 }
 0x68f   :  { %v4057_v39 = vclamps-f32 %v2397_v12, 60.0  ;;  %3471 = vperm.xlu2 %4163, %v2949_v34   ;;  %3151 = vperm.xlu1 %4162, %v4312_v51   ;;  %v2220_v40 = vpack.c.bf16 %v2184_v52, %v2183_v5 }
 0x691   :  { %v2629_v41 = vsub.f32 0.0, %v4057_v39  ;;  %v3402_v35 = vpop.permute.xlu0 %3401  ;;  %2438 = vmatmul.bf16.gmra.mxu2 %v2220_v40  ;;  %v3097_v11 = vpop.permute.xlu2 %3096 }
 0x692   :  { %v2109_v46 = vpop.f32.mrf.mxu1 }
 0x693   :  { %v4314_v45 = vpop.eup %4313  ;;  %v2730_v62 = vmul.f32 1.442695, %v2629_v41  ;;  %v2110_v57 = vadd.f32 %v5147_v22, %v2109_v46 }
 0x694   :  { %v4316_v47 = vpop.eup %4315  ;;  %v2820_v50 = vadd.f32 1.0, %v4314_v45  ;;  %v2399_v54 = vpop.f32.mrf.mxu2 }
 0x695   :  { %4317 = vpow2.f32 %v2730_v62  ;;  %v2400_v56 = vadd.f32 %v5116_v8, %v2399_v54  ;;  %v2950_v1 = vsub.f32 1.0, %v4316_v47  ;;  %v2185_v9 = vmax.f32 %v2110_v57, 0.0 }
 0x696   :  { %4319 = vrcp.f32 %v2820_v50 }
 0x697   :  { %v4058_v58 = vclamps-f32 %v2400_v56, 60.0  ;;  %3156 = vperm.xlu2 %4163, %v4316_v47   ;;  %3476 = vperm.xlu0 %4161, %v2950_v1  }
 0x699   :  { %v2630_v59 = vsub.f32 0.0, %v4058_v58  ;;  %v3087_v16 = vpop.permute.xlu0 %3086  ;;  %v3407_v60 = vpop.permute.xlu1 %3406 }
 0x69a   :  { %v2111_v2 = vpop.f32.mrf.mxu1 }
 0x69b   :  { %v4318_v63 = vpop.eup %4317  ;;  %v2732_v0 = vmul.f32 1.442695, %v2630_v59  ;;  %v2112_v43 = vadd.f32 %v5147_v22, %v2111_v2 }
 0x69c   :  { %v4320_v42 = vpop.eup %4319  ;;  %v2821_v3 = vadd.f32 1.0, %v4318_v63  ;;  %v2401_v55 = vpop.f32.mrf.mxu2 }
 0x69d   :  { %4321 = vpow2.f32 %v2732_v0  ;;  %v2402_v4 = vadd.f32 %v5116_v8, %v2401_v55  ;;  %v2951_v37 = vsub.f32 1.0, %v4320_v42  ;;  %v2186_v33 = vmax.f32 %v2112_v43, 0.0 }
 0x69e   :  { %4323 = vrcp.f32 %v2821_v3 }
 0x69f   :  { %v4059_v49 = vclamps-f32 %v2402_v4, 60.0  ;;  %3161 = vperm.xlu0 %4161, %v4320_v42   ;;  %3481 = vperm.xlu1 %4162, %v2951_v37   ;;  %v2221_v6 = vpack.c.bf16 %v2186_v33, %v2185_v9 }
 0x6a1   :  { %v2631_v36 = vsub.f32 0.0, %v4059_v49  ;;  %v3092_v13 = vpop.permute.xlu1 %3091  ;;  %2443 = vmatmul.bf16.gmra.mxu2 %v2221_v6  ;;  %v3427_v50 = vpop.permute.xlu2 %3426 }
 0x6a2   :  { %v2114_v7 = vpop.f32.mrf.mxu1 }
 0x6a3   :  { %v4322_v14 = vpop.eup %4321  ;;  %v2734_v15 = vmul.f32 1.442695, %v2631_v36  ;;  %v2115_v21 = vadd.f32 %v5147_v22, %v2114_v7 }
 0x6a4   :  { %v4324_v19 = vpop.eup %4323  ;;  %v2822_v38 = vadd.f32 1.0, %v4322_v14  ;;  %v2404_v25 = vpop.f32.mrf.mxu2 }
 0x6a5   :  { %4325 = vpow2.f32 %v2734_v15  ;;  %v2952_v17 = vsub.f32 1.0, %v4324_v19  ;;  %v2405_v18 = vadd.f32 %v5116_v8, %v2404_v25  ;;  %v2187_v31 = vmax.f32 %v2115_v21, 0.0 }
 0x6a6   :  { %4327 = vrcp.f32 %v2822_v38 }
 0x6a7   :  { %3486 = vperm.xlu2 %4163, %v2952_v17   ;;  %3166 = vperm.xlu1 %4162, %v4324_v19   ;;  %v4060_v29 = vclamps-f32 %v2405_v18, 60.0 }
 0x6a9   :  { %v3417_v61 = vpop.permute.xlu0 %3416  ;;  %v2632_v23 = vsub.f32 0.0, %v4060_v29  ;;  %v3112_v9 = vpop.permute.xlu2 %3111 }
 0x6aa   :  { %v2116_v20 = vpop.f32.mrf.mxu1 }
 0x6ab   :  { %v4326_v53 = vpop.eup %4325  ;;  %v2736_v48 = vmul.f32 1.442695, %v2632_v23  ;;  %v2117_v26 = vadd.f32 %v5147_v22, %v2116_v20 }
 0x6ac   :  { %v4328_v44 = vpop.eup %4327  ;;  %v2823_v24 = vadd.f32 1.0, %v4326_v53  ;;  %v2406_v28 = vpop.f32.mrf.mxu2 }
 0x6ad   :  { %v2953_v51 = vsub.f32 1.0, %v4328_v44  ;;  %v2188_v30 = vmax.f32 %v2117_v26, 0.0  ;;  %v2407_v32 = vadd.f32 %v5116_v8, %v2406_v28 }
 0x6ae   :  { %4329 = vrcp.f32 %v2823_v24 }
 0x6af   :  { %4331 = vpow2.f32 %v2736_v48  ;;  %3171 = vperm.xlu2 %4163, %v4328_v44   ;;  %3491 = vperm.xlu0 %4161, %v2953_v51   ;;  %v2222_v12 = vpack.c.bf16 %v2188_v30, %v2187_v31  ;;  %v4061_v34 = vclamps-f32 %v2407_v32, 60.0 }
 0x6b1   :  { %v3102_v5 = vpop.permute.xlu0 %3101  ;;  %v3422_v52 = vpop.permute.xlu1 %3421  ;;  %v2633_v39 = vsub.f32 0.0, %v4061_v34  ;;  %2448 = vmatmul.bf16.gmra.mxu2 %v2222_v12 }
 0x6b2   :  { %v2119_v40 = vpop.f32.mrf.mxu1 }
 0x6b3   :  { %v2738_v41 = vmul.f32 1.442695, %v2633_v39  ;;  %v2120_v1 = vadd.f32 %v5147_v22, %v2119_v40  ;;  %v5172_v40 = vld [vmem:[#allocation7 + $0x6] ss:$0 sm:$0xff] }
 0x6b4   :  { %v4330_v27 = vpop.eup %4329  ;;  %v2409_v45 = vpop.f32.mrf.mxu2 }
 0x6b5   :  { %v4332_v35 = vpop.eup %4331  ;;  %v2954_v62 = vsub.f32 1.0, %v4330_v27  ;;  %4333 = vpow2.f32 %v2738_v41  ;;  %v2410_v47 = vadd.f32 %v5116_v8, %v2409_v45  ;;  %v2189_v42 = vmax.f32 %v2120_v1, 0.0 }
 0x6b6   :  { %v2824_v46 = vadd.f32 1.0, %v4332_v35 }
 0x6b7   :  { %3176 = vperm.xlu0 %4161, %v4330_v27   ;;  %3496 = vperm.xlu1 %4162, %v2954_v62   ;;  %v4062_v54 = vclamps-f32 %v2410_v47, 60.0 }
 0x6b8   :  { %4335 = vrcp.f32 %v2824_v46 }
 0x6b9   :  { %v3107_v56 = vpop.permute.xlu1 %3106  ;;  %v2634_v58 = vsub.f32 0.0, %v4062_v54  ;;  %v3442_v51 = vpop.permute.xlu2 %3441 }
 0x6ba   :  { %v2121_v59 = vpop.f32.mrf.mxu1 }
 0x6bb   :  { %v4334_v16 = vpop.eup %4333  ;;  %v2740_v60 = vmul.f32 1.442695, %v2634_v58  ;;  %v2122_v57 = vadd.f32 %v5147_v22, %v2121_v59 }
 0x6bc   :  { %v2825_v63 = vadd.f32 1.0, %v4334_v16  ;;  %v2411_v0 = vpop.f32.mrf.mxu2 }
 0x6bd   :  { %4337 = vpow2.f32 %v2740_v60  ;;  %v2190_v3 = vmax.f32 %v2122_v57, 0.0  ;;  %v2412_v43 = vadd.f32 %v5116_v8, %v2411_v0 }
 0x6be   :  { %v4336_v2 = vpop.eup %4335  ;;  %4339 = vrcp.f32 %v2825_v63 }
 0x6bf   :  { %v2955_v55 = vsub.f32 1.0, %v4336_v2  ;;  %3181 = vperm.xlu1 %4162, %v4336_v2   ;;  %v2223_v4 = vpack.c.bf16 %v2190_v3, %v2189_v42  ;;  %v4063_v37 = vclamps-f32 %v2412_v43, 60.0 }
 0x6c1   :  { %3501 = vperm.xlu2 %4163, %v2955_v55   ;;  %v3432_v33 = vpop.permute.xlu0 %3431  ;;  %v2635_v10 = vsub.f32 0.0, %v4063_v37  ;;  %2453 = vmatmul.bf16.gmra.mxu2 %v2223_v4  ;;  %v3127_v35 = vpop.permute.xlu2 %3126 }
 0x6c2   :  { %v2124_v49 = vpop.f32.mrf.mxu1 }
 0x6c3   :  { %v4338_v6 = vpop.eup %4337  ;;  %v2742_v36 = vmul.f32 1.442695, %v2635_v10  ;;  %v2125_v25 = vadd.f32 %v5147_v22, %v2124_v49 }
 0x6c4   :  { %v4340_v13 = vpop.eup %4339  ;;  %v2826_v14 = vadd.f32 1.0, %v4338_v6  ;;  %v2414_v15 = vpop.f32.mrf.mxu2 }
 0x6c5   :  { %4341 = vpow2.f32 %v2742_v36  ;;  %v2415_v7 = vadd.f32 %v5116_v8, %v2414_v15  ;;  %v2956_v19 = vsub.f32 1.0, %v4340_v13  ;;  %v2191_v44 = vmax.f32 %v2125_v25, 0.0 }
 0x6c6   :  { %4343 = vrcp.f32 %v2826_v14 }
 0x6c7   :  { %v4064_v38 = vclamps-f32 %v2415_v7, 60.0  ;;  %3506 = vperm.xlu0 %4161, %v2956_v19  }
 0x6c9   :  { %3186 = vperm.xlu2 %4163, %v4340_v13   ;;  %v3117_v17 = vpop.permute.xlu0 %3116  ;;  %v3437_v18 = vpop.permute.xlu1 %3436  ;;  %v2636_v29 = vsub.f32 0.0, %v4064_v38 }
 0x6ca   :  { %v2126_v11 = vpop.f32.mrf.mxu1 }
 0x6cb   :  { %v4342_v61 = vpop.eup %4341  ;;  %v2744_v21 = vmul.f32 1.442695, %v2636_v29  ;;  %v2127_v23 = vadd.f32 %v5147_v22, %v2126_v11 }
 0x6cc   :  { %v4344_v53 = vpop.eup %4343  ;;  %v2827_v20 = vadd.f32 1.0, %v4342_v61  ;;  %v2416_v24 = vpop.f32.mrf.mxu2 }
 0x6cd   :  { %4345 = vpow2.f32 %v2744_v21  ;;  %v2192_v48 = vmax.f32 %v2127_v23, 0.0  ;;  %v2417_v26 = vadd.f32 %v5116_v8, %v2416_v24  ;;  %v2957_v28 = vsub.f32 1.0, %v4344_v53 }
 0x6ce   :  { %4347 = vrcp.f32 %v2827_v20 }
 0x6cf   :  { %v2224_v31 = vpack.c.bf16 %v2192_v48, %v2191_v44  ;;  %v4065_v30 = vclamps-f32 %v2417_v26, 60.0  ;;  %3191 = vperm.xlu0 %4161, %v4344_v53   ;;  %3511 = vperm.xlu1 %4162, %v2957_v28  }
 0x6d1   :  { %v3122_v32 = vpop.permute.xlu1 %3121  ;;  %v2637_v12 = vsub.f32 0.0, %v4065_v30  ;;  %2458 = vmatmul.bf16.gmra.mxu2 %v2224_v31  ;;  %v3457_v4 = vpop.permute.xlu2 %3456 }
 0x6d3   :  { %v4346_v34 = vpop.eup %4345  ;;  %v2746_v22 = vmul.f32 1.442695, %v2637_v12 }
 0x6d4   :  { %v4348_v5 = vpop.eup %4347  ;;  %v2828_v52 = vadd.f32 1.0, %v4346_v34  ;;  %v2419_v39 = vpop.f32.mrf.mxu2 }
 0x6d5   :  { %4349 = vpow2.f32 %v2746_v22  ;;  %v2420_v8 = vadd.f32 %v5172_v40, %v2419_v39  ;;  %v2958_v27 = vsub.f32 1.0, %v4348_v5 }
 0x6d6   :  { %4351 = vrcp.f32 %v2828_v52 }
 0x6d7   :  { %v4066_v41 = vclamps-f32 %v2420_v8, 60.0  ;;  %3516 = vperm.xlu2 %4163, %v2958_v27   ;;  %3196 = vperm.xlu1 %4162, %v4348_v5  }
 0x6d9   :  { %v3447_v45 = vpop.permute.xlu0 %3446  ;;  %v2638_v62 = vsub.f32 0.0, %v4066_v41  ;;  %v3142_v19 = vpop.permute.xlu2 %3141 }
 0x6db   :  { %v4350_v46 = vpop.eup %4349  ;;  %v2748_v47 = vmul.f32 1.442695, %v2638_v62 }
 0x6dc   :  { %v4352_v50 = vpop.eup %4351  ;;  %v2829_v54 = vadd.f32 1.0, %v4350_v46  ;;  %v2421_v56 = vpop.f32.mrf.mxu2 }
 0x6dd   :  { %4353 = vpow2.f32 %v2748_v47  ;;  %v2422_v1 = vadd.f32 %v5172_v40, %v2421_v56  ;;  %v2959_v58 = vsub.f32 1.0, %v4352_v50 }
 0x6de   :  { %4355 = vrcp.f32 %v2829_v54 }
 0x6df   :  { %v4067_v59 = vclamps-f32 %v2422_v1, 60.0  ;;  %3201 = vperm.xlu2 %4163, %v4352_v50   ;;  %3521 = vperm.xlu0 %4161, %v2959_v58  }
 0x6e1   :  { %v3132_v16 = vpop.permute.xlu0 %3131  ;;  %v3452_v60 = vpop.permute.xlu1 %3451  ;;  %v2639_v57 = vsub.f32 0.0, %v4067_v59 }
 0x6e3   :  { %v4354_v63 = vpop.eup %4353  ;;  %v2750_v0 = vmul.f32 1.442695, %v2639_v57 }
 0x6e4   :  { %v4356_v2 = vpop.eup %4355  ;;  %v2830_v42 = vadd.f32 1.0, %v4354_v63  ;;  %v2424_v3 = vpop.f32.mrf.mxu2 }
 0x6e5   :  { %4357 = vpow2.f32 %v2750_v0  ;;  %v2425_v43 = vadd.f32 %v5172_v40, %v2424_v3  ;;  %v2960_v55 = vsub.f32 1.0, %v4356_v2 }
 0x6e6   :  { %4359 = vrcp.f32 %v2830_v42 }
 0x6e7   :  { %v4068_v37 = vclamps-f32 %v2425_v43, 60.0  ;;  %3206 = vperm.xlu0 %4161, %v4356_v2   ;;  %3526 = vperm.xlu1 %4162, %v2960_v55  }
 0x6e9   :  { %v3137_v9 = vpop.permute.xlu1 %3136  ;;  %v2640_v33 = vsub.f32 0.0, %v4068_v37  ;;  %v3472_v12 = vpop.permute.xlu2 %3471 }
 0x6eb   :  { %v4358_v10 = vpop.eup %4357  ;;  %v2752_v49 = vmul.f32 1.442695, %v2640_v33 }
 0x6ec   :  { %v4360_v6 = vpop.eup %4359  ;;  %v2831_v36 = vadd.f32 1.0, %v4358_v10  ;;  %v2426_v13 = vpop.f32.mrf.mxu2 }
 0x6ed   :  { %4361 = vpow2.f32 %v2752_v49  ;;  %v2427_v14 = vadd.f32 %v5172_v40, %v2426_v13  ;;  %v2961_v15 = vsub.f32 1.0, %v4360_v6 }
 0x6ee   :  { %4363 = vrcp.f32 %v2831_v36 }
 0x6ef   :  { %v4069_v7 = vclamps-f32 %v2427_v14, 60.0  ;;  %3531 = vperm.xlu2 %4163, %v2961_v15   ;;  %3211 = vperm.xlu1 %4162, %v4360_v6  }
 0x6f1   :  { %v3462_v38 = vpop.permute.xlu0 %3461  ;;  %v2641_v25 = vsub.f32 0.0, %v4069_v7  ;;  %v3157_v46 = vpop.permute.xlu2 %3156 }
 0x6f3   :  { %v4362_v17 = vpop.eup %4361  ;;  %v2754_v18 = vmul.f32 1.442695, %v2641_v25 }
 0x6f4   :  { %v4364_v29 = vpop.eup %4363  ;;  %v2832_v11 = vadd.f32 1.0, %v4362_v17  ;;  %v2429_v61 = vpop.f32.mrf.mxu2 }
 0x6f5   :  { %4365 = vpow2.f32 %v2754_v18  ;;  %v2430_v21 = vadd.f32 %v5172_v40, %v2429_v61  ;;  %v2962_v23 = vsub.f32 1.0, %v4364_v29 }
 0x6f6   :  { %4367 = vrcp.f32 %v2832_v11 }
 0x6f7   :  { %v4070_v53 = vclamps-f32 %v2430_v21, 60.0  ;;  %3216 = vperm.xlu2 %4163, %v4364_v29   ;;  %3536 = vperm.xlu0 %4161, %v2962_v23  }
 0x6f9   :  { %v3147_v20 = vpop.permute.xlu0 %3146  ;;  %v3467_v44 = vpop.permute.xlu1 %3466  ;;  %v2642_v24 = vsub.f32 0.0, %v4070_v53 }
 0x6fb   :  { %v4366_v48 = vpop.eup %4365  ;;  %v2756_v26 = vmul.f32 1.442695, %v2642_v24 }
 0x6fc   :  { %v4368_v28 = vpop.eup %4367  ;;  %v2833_v51 = vadd.f32 1.0, %v4366_v48  ;;  %v2431_v31 = vpop.f32.mrf.mxu2 }
 0x6fd   :  { %4369 = vpow2.f32 %v2756_v26  ;;  %v2432_v30 = vadd.f32 %v5172_v40, %v2431_v31  ;;  %v2963_v32 = vsub.f32 1.0, %v4368_v28 }
 0x6fe   :  { %4371 = vrcp.f32 %v2833_v51 }
 0x6ff   :  { %v4071_v34 = vclamps-f32 %v2432_v30, 60.0  ;;  %3221 = vperm.xlu0 %4161, %v4368_v28   ;;  %3541 = vperm.xlu1 %4162, %v2963_v32  }
 0x701   :  { %v3152_v22 = vpop.permute.xlu1 %3151  ;;  %v2643_v5 = vsub.f32 0.0, %v4071_v34  ;;  %v3487_v33 = vpop.permute.xlu2 %3486 }
 0x703   :  { %v4370_v52 = vpop.eup %4369  ;;  %v2758_v39 = vmul.f32 1.442695, %v2643_v5 }
 0x704   :  { %v4372_v8 = vpop.eup %4371  ;;  %v2834_v27 = vadd.f32 1.0, %v4370_v52  ;;  %v2434_v41 = vpop.f32.mrf.mxu2 }
 0x705   :  { %4373 = vpow2.f32 %v2758_v39  ;;  %v2435_v35 = vadd.f32 %v5172_v40, %v2434_v41  ;;  %v2964_v45 = vsub.f32 1.0, %v4372_v8 }
 0x706   :  { %4375 = vrcp.f32 %v2834_v27 }
 0x707   :  { %v4072_v62 = vclamps-f32 %v2435_v35, 60.0  ;;  %3546 = vperm.xlu2 %4163, %v2964_v45   ;;  %3226 = vperm.xlu1 %4162, %v4372_v8  }
 0x709   :  { %v3477_v47 = vpop.permute.xlu0 %3476  ;;  %v2644_v50 = vsub.f32 0.0, %v4072_v62  ;;  %v3172_v17 = vpop.permute.xlu2 %3171 }
 0x70b   :  { %v4374_v54 = vpop.eup %4373  ;;  %v2760_v56 = vmul.f32 1.442695, %v2644_v50 }
 0x70c   :  { %v4376_v1 = vpop.eup %4375  ;;  %v2835_v58 = vadd.f32 1.0, %v4374_v54  ;;  %v2436_v59 = vpop.f32.mrf.mxu2 }
 0x70d   :  { %4377 = vpow2.f32 %v2760_v56  ;;  %v2437_v16 = vadd.f32 %v5172_v40, %v2436_v59  ;;  %v2965_v60 = vsub.f32 1.0, %v4376_v1 }
 0x70e   :  { %4379 = vrcp.f32 %v2835_v58 }
 0x70f   :  { %v4073_v57 = vclamps-f32 %v2437_v16, 60.0  ;;  %3231 = vperm.xlu2 %4163, %v4376_v1   ;;  %3551 = vperm.xlu0 %4161, %v2965_v60  }
 0x711   :  { %v3162_v63 = vpop.permute.xlu0 %3161  ;;  %v3482_v0 = vpop.permute.xlu1 %3481  ;;  %v2645_v2 = vsub.f32 0.0, %v4073_v57 }
 0x713   :  { %v4378_v42 = vpop.eup %4377  ;;  %v2762_v3 = vmul.f32 1.442695, %v2645_v2 }
 0x714   :  { %v4380_v43 = vpop.eup %4379  ;;  %v2836_v55 = vadd.f32 1.0, %v4378_v42  ;;  %v2439_v4 = vpop.f32.mrf.mxu2 }
 0x715   :  { %4381 = vpow2.f32 %v2762_v3  ;;  %v2440_v37 = vadd.f32 %v5172_v40, %v2439_v4  ;;  %v2966_v9 = vsub.f32 1.0, %v4380_v43 }
 0x716   :  { %4383 = vrcp.f32 %v2836_v55 }
 0x717   :  { %v4074_v10 = vclamps-f32 %v2440_v37, 60.0  ;;  %3236 = vperm.xlu0 %4161, %v4380_v43   ;;  %3556 = vperm.xlu1 %4162, %v2966_v9  }
 0x719   :  { %v3167_v49 = vpop.permute.xlu1 %3166  ;;  %v2646_v6 = vsub.f32 0.0, %v4074_v10 }
 0x71b   :  { %v4382_v36 = vpop.eup %4381  ;;  %v2764_v13 = vmul.f32 1.442695, %v2646_v6  ;;  %v3502_v5 = vpop.permute.xlu2 %3501 }
 0x71c   :  { %v4384_v14 = vpop.eup %4383  ;;  %v2837_v15 = vadd.f32 1.0, %v4382_v36  ;;  %v2441_v7 = vpop.f32.mrf.mxu2 }
 0x71d   :  { %4385 = vpow2.f32 %v2764_v13  ;;  %v2442_v19 = vadd.f32 %v5172_v40, %v2441_v7  ;;  %v2967_v38 = vsub.f32 1.0, %v4384_v14 }
 0x71e   :  { %4387 = vrcp.f32 %v2837_v15 }
 0x71f   :  { %v4075_v25 = vclamps-f32 %v2442_v19, 60.0  ;;  %3561 = vperm.xlu2 %4163, %v2967_v38   ;;  %3241 = vperm.xlu1 %4162, %v4384_v14  }
 0x721   :  { %v3492_v18 = vpop.permute.xlu0 %3491  ;;  %v2647_v29 = vsub.f32 0.0, %v4075_v25 }
 0x723   :  { %v4386_v11 = vpop.eup %4385  ;;  %v2766_v61 = vmul.f32 1.442695, %v2647_v29  ;;  %v3187_v54 = vpop.permute.xlu2 %3186 }
 0x724   :  { %v4388_v21 = vpop.eup %4387  ;;  %v2838_v23 = vadd.f32 1.0, %v4386_v11  ;;  %v2444_v53 = vpop.f32.mrf.mxu2 }
 0x725   :  { %4389 = vpow2.f32 %v2766_v61  ;;  %v2445_v20 = vadd.f32 %v5172_v40, %v2444_v53  ;;  %v2968_v44 = vsub.f32 1.0, %v4388_v21 }
 0x726   :  { %4391 = vrcp.f32 %v2838_v23 }
 0x727   :  { %v4076_v24 = vclamps-f32 %v2445_v20, 60.0  ;;  %3246 = vperm.xlu2 %4163, %v4388_v21   ;;  %3566 = vperm.xlu0 %4161, %v2968_v44  }
 0x729   :  { %v3177_v48 = vpop.permute.xlu0 %3176  ;;  %v3497_v26 = vpop.permute.xlu1 %3496  ;;  %v2648_v28 = vsub.f32 0.0, %v4076_v24 }
 0x72b   :  { %v4390_v51 = vpop.eup %4389  ;;  %v2768_v31 = vmul.f32 1.442695, %v2648_v28 }
 0x72c   :  { %v4392_v30 = vpop.eup %4391  ;;  %v2839_v32 = vadd.f32 1.0, %v4390_v51  ;;  %v2446_v12 = vpop.f32.mrf.mxu2 }
 0x72d   :  { %4393 = vpow2.f32 %v2768_v31  ;;  %v2447_v34 = vadd.f32 %v5172_v40, %v2446_v12  ;;  %v2969_v22 = vsub.f32 1.0, %v4392_v30 }
 0x72e   :  { %4395 = vrcp.f32 %v2839_v32 }
 0x72f   :  { %v4077_v52 = vclamps-f32 %v2447_v34, 60.0  ;;  %3251 = vperm.xlu0 %4161, %v4392_v30   ;;  %3571 = vperm.xlu1 %4162, %v2969_v22  }
 0x731   :  { %v3182_v39 = vpop.permute.xlu1 %3181  ;;  %v2649_v8 = vsub.f32 0.0, %v4077_v52  ;;  %v3517_v6 = vpop.permute.xlu2 %3516 }
 0x733   :  { %v4394_v27 = vpop.eup %4393  ;;  %v2770_v41 = vmul.f32 1.442695, %v2649_v8 }
 0x734   :  { %v4396_v35 = vpop.eup %4395  ;;  %v2840_v45 = vadd.f32 1.0, %v4394_v27  ;;  %v2449_v62 = vpop.f32.mrf.mxu2 }
 0x735   :  { %4397 = vpow2.f32 %v2770_v41  ;;  %v2450_v46 = vadd.f32 %v5172_v40, %v2449_v62  ;;  %v2970_v47 = vsub.f32 1.0, %v4396_v35 }
 0x736   :  { %4399 = vrcp.f32 %v2840_v45 }
 0x737   :  { %v4078_v50 = vclamps-f32 %v2450_v46, 60.0  ;;  %3576 = vperm.xlu2 %4163, %v2970_v47   ;;  %3256 = vperm.xlu1 %4162, %v4396_v35  }
 0x739   :  { %v2650_v56 = vsub.f32 0.0, %v4078_v50  ;;  %v3507_v1 = vpop.permute.xlu0 %3506  ;;  %v3202_v11 = vpop.permute.xlu2 %3201 }
 0x73b   :  { %v4398_v58 = vpop.eup %4397  ;;  %v2772_v59 = vmul.f32 1.442695, %v2650_v56 }
 0x73c   :  { %v4400_v16 = vpop.eup %4399  ;;  %v2841_v60 = vadd.f32 1.0, %v4398_v58  ;;  %v2451_v57 = vpop.f32.mrf.mxu2 }
 0x73d   :  { %4401 = vpow2.f32 %v2772_v59  ;;  %v2452_v63 = vadd.f32 %v5172_v40, %v2451_v57  ;;  %v2971_v0 = vsub.f32 1.0, %v4400_v16 }
 0x73e   :  { %4403 = vrcp.f32 %v2841_v60 }
 0x73f   :  { %v4079_v2 = vclamps-f32 %v2452_v63, 60.0  ;;  %3261 = vperm.xlu2 %4163, %v4400_v16   ;;  %3581 = vperm.xlu0 %4161, %v2971_v0  }
 0x741   :  { %v2651_v42 = vsub.f32 0.0, %v4079_v2  ;;  %v3192_v3 = vpop.permute.xlu0 %3191  ;;  %v3512_v43 = vpop.permute.xlu1 %3511 }
 0x743   :  { %v4402_v55 = vpop.eup %4401  ;;  %v2774_v4 = vmul.f32 1.442695, %v2651_v42 }
 0x744   :  { %v4404_v37 = vpop.eup %4403  ;;  %v2842_v9 = vadd.f32 1.0, %v4402_v55  ;;  %v2454_v33 = vpop.f32.mrf.mxu2 }
 0x745   :  { %4405 = vpow2.f32 %v2774_v4  ;;  %v2455_v10 = vadd.f32 %v5172_v40, %v2454_v33  ;;  %v2972_v49 = vsub.f32 1.0, %v4404_v37 }
 0x746   :  { %4407 = vrcp.f32 %v2842_v9 }
 0x747   :  { %v4080_v36 = vclamps-f32 %v2455_v10, 60.0  ;;  %3266 = vperm.xlu0 %4161, %v4404_v37   ;;  %3586 = vperm.xlu1 %4162, %v2972_v49  }
 0x749   :  { %v2652_v13 = vsub.f32 0.0, %v4080_v36  ;;  %v3197_v14 = vpop.permute.xlu1 %3196  ;;  %v3532_v8 = vpop.permute.xlu2 %3531 }
 0x74b   :  { %v4406_v15 = vpop.eup %4405  ;;  %v2776_v7 = vmul.f32 1.442695, %v2652_v13 }
 0x74c   :  { %v4408_v19 = vpop.eup %4407  ;;  %v2843_v38 = vadd.f32 1.0, %v4406_v15  ;;  %v2456_v25 = vpop.f32.mrf.mxu2 }
 0x74d   :  { %4409 = vpow2.f32 %v2776_v7  ;;  %v2457_v17 = vadd.f32 %v5172_v40, %v2456_v25  ;;  %v2973_v18 = vsub.f32 1.0, %v4408_v19 }
 0x74e   :  { %4411 = vrcp.f32 %v2843_v38 }
 0x74f   :  { %v4081_v29 = vclamps-f32 %v2457_v17, 60.0  ;;  %3591 = vperm.xlu2 %4163, %v2973_v18   ;;  %3271 = vperm.xlu1 %4162, %v4408_v19  }
 0x751   :  { %v2653_v61 = vsub.f32 0.0, %v4081_v29  ;;  %v3522_v21 = vpop.permute.xlu0 %3521  ;;  %v3217_v50 = vpop.permute.xlu2 %3216 }
 0x753   :  { %v4410_v23 = vpop.eup %4409  ;;  %v2778_v53 = vmul.f32 1.442695, %v2653_v61 }
 0x754   :  { %v4412_v20 = vpop.eup %4411  ;;  %v2844_v44 = vadd.f32 1.0, %v4410_v23  ;;  %v2459_v24 = vpop.f32.mrf.mxu2 }
 0x755   :  { %4413 = vpow2.f32 %v2778_v53  ;;  %v2460_v48 = vadd.f32 %v5172_v40, %v2459_v24  ;;  %v2974_v26 = vsub.f32 1.0, %v4412_v20 }
 0x756   :  { %4415 = vrcp.f32 %v2844_v44 }
 0x757   :  { %v4082_v28 = vclamps-f32 %v2460_v48, 60.0  ;;  %3276 = vperm.xlu2 %4163, %v4412_v20   ;;  %3596 = vperm.xlu0 %4161, %v2974_v26  }
 0x759   :  { %v2654_v51 = vsub.f32 0.0, %v4082_v28  ;;  %v3207_v31 = vpop.permute.xlu0 %3206  ;;  %v3527_v30 = vpop.permute.xlu1 %3526 }
 0x75b   :  { %v4414_v32 = vpop.eup %4413  ;;  %v2780_v12 = vmul.f32 1.442695, %v2654_v51 }
 0x75c   :  { %v4416_v34 = vpop.eup %4415  ;;  %v2845_v22 = vadd.f32 1.0, %v4414_v32  ;;  %v2461_v5 = vpop.f32.mrf.mxu2 }
 0x75d   :  { %4417 = vpow2.f32 %v2780_v12  ;;  %v2462_v52 = vadd.f32 %v5172_v40, %v2461_v5  ;;  %v2975_v39 = vsub.f32 1.0, %v4416_v34 }
 0x75e   :  { %4419 = vrcp.f32 %v2845_v22 }
 0x75f   :  { %v4083_v27 = vclamps-f32 %v2462_v52, 60.0  ;;  %3281 = vperm.xlu0 %4161, %v4416_v34   ;;  %3601 = vperm.xlu1 %4162, %v2975_v39  }
 0x761   :  { %v2655_v41 = vsub.f32 0.0, %v4083_v27  ;;  %v3212_v35 = vpop.permute.xlu1 %3211  ;;  %v3547_v63 = vpop.permute.xlu2 %3546 }
 0x763   :  { %v4418_v45 = vpop.eup %4417  ;;  %v2782_v62 = vmul.f32 1.442695, %v2655_v41 }
 0x764   :  { %v2846_v46 = vadd.f32 1.0, %v4418_v45  ;;  %v4420_v47 = vpop.eup %4419 }
 0x765   :  { %4421 = vpow2.f32 %v2782_v62  ;;  %v2976_v16 = vsub.f32 1.0, %v4420_v47 }
 0x766   :  { %4423 = vrcp.f32 %v2846_v46 }
 0x767   :  { %3286 = vperm.xlu1 %4162, %v4420_v47  }
 0x769   :  { %v3537_v54 = vpop.permute.xlu0 %3536  ;;  %v3232_v42 = vpop.permute.xlu2 %3231 }
 0x76b   :  { %v4422_v56 = vpop.eup %4421 }
 0x76c   :  { %v4424_v1 = vpop.eup %4423  ;;  %v2847_v40 = vadd.f32 1.0, %v4422_v56 }
 0x76d   :  { %3291 = vperm.xlu2 %4163, %v4424_v1   ;;  %v2977_v2 = vsub.f32 1.0, %v4424_v1 }
 0x76e   :  { %4425 = vrcp.f32 %v2847_v40 }
 0x771   :  { %v3222_v58 = vpop.permute.xlu0 %3221  ;;  %v3542_v59 = vpop.permute.xlu1 %3541 }
 0x774   :  { %v4426_v60 = vpop.eup %4425 }
 0x775   :  { %3606 = vperm.xlu2 %4163, %v2976_v16   ;;  %3296 = vperm.xlu0 %4161, %v4426_v60   ;;  %v2978_v57 = vsub.f32 1.0, %v4426_v60 }
 0x777   :  { %3616 = vperm.xlu1 %4162, %v2978_v57  }
 0x779   :  { %v3227_v0 = vpop.permute.xlu1 %3226  ;;  %v3562_v4 = vpop.permute.xlu2 %3561 }
 0x77d   :  { %3611 = vperm.xlu0 %4161, %v2977_v2  }
 0x781   :  { %v3552_v3 = vpop.permute.xlu0 %3551  ;;  %v3247_v9 = vpop.permute.xlu2 %3246 }
 0x789   :  { %v3237_v43 = vpop.permute.xlu0 %3236  ;;  %v3557_v55 = vpop.permute.xlu1 %3556 }
 0x791   :  { %v3242_v37 = vpop.permute.xlu1 %3241  ;;  %v3577_v6 = vpop.permute.xlu2 %3576 }
 0x799   :  { %v3567_v33 = vpop.permute.xlu0 %3566  ;;  %v3262_v13 = vpop.permute.xlu2 %3261 }
 0x7a1   :  { %v3252_v10 = vpop.permute.xlu0 %3251  ;;  %v3572_v49 = vpop.permute.xlu1 %3571 }
 0x7a9   :  { %v3257_v36 = vpop.permute.xlu1 %3256  ;;  %v3592_v19 = vpop.permute.xlu2 %3591 }
 0x7b1   :  { %v3582_v14 = vpop.permute.xlu0 %3581  ;;  %v3277_v25 = vpop.permute.xlu2 %3276 }
 0x7b9   :  { %v3267_v15 = vpop.permute.xlu0 %3266  ;;  %v3587_v7 = vpop.permute.xlu1 %3586 }
 0x7c1   :  { %v3272_v38 = vpop.permute.xlu1 %3271 }
 0x7c7   :  { %v3292_v18 = vpop.permute.xlu2 %3291 }
 0x7c9   :  { %v3597_v17 = vpop.permute.xlu0 %3596 }
 0x7cf   :  { %v3607_v61 = vpop.permute.xlu2 %3606 }
 0x7d1   :  { %v3282_v29 = vpop.permute.xlu0 %3281  ;;  %v3602_v11 = vpop.permute.xlu1 %3601 }
 0x7d9   :  { %v3287_v21 = vpop.permute.xlu1 %3286 }
 0x7e7   :  { %v3297_v23 = vpop.permute.xlu0 %3296 }
 0x7e9   :  { %v3617_v53 = vpop.permute.xlu1 %3616 }
 0x7ef   :  { %v3612_v20 = vpop.permute.xlu0 %3611 }
 0x7f0   :  { %3785 = vsyncpa [#allocation3], 1 }
 0x7f1   :  { %3786 = vsyncpa [#allocation5], 1 }
 0x7f2   :  { %3787 = vsyncpa [#allocation8], 1 }

</bundles_post_ra>
